<compile_context>
chip_gen: v7x
topology: tpu7x:2x2x1
jax: 0.10.0
libtpu: 0.0.40
codegen_flags: <defaults>
</compile_context>

<pallas_src>
import functools
import math

import jax
import jax.numpy as jnp
from jax.experimental import pallas as pl
from jax.experimental.pallas import tpu as pltpu


# ----------------------------------------------------------------------------
# config (mirrors `opt` in the PyTorch module)
# ----------------------------------------------------------------------------
class Opt:
    n_layers = 3
    d_hid = 32
    d_in = 5                  # local_pose feature dim
    d_out = 3                 # deformation offset dim
    d_deformed_feature = 13   # extra deformed feature dim
    skip_in = ()
    weight_norm = True


def _round_up(x, m):
    return ((x + m - 1) // m) * m


# ----------------------------------------------------------------------------
# softplus (exact PyTorch nn.Softplus(beta=100, threshold=20) semantics)
# ----------------------------------------------------------------------------
def _softplus_beta(x, beta=100.0, threshold=20.0):
    #   f(x) = x                          if beta*x > threshold
    #        = log1p(exp(beta*x)) / beta  otherwise
    # minimum() clamps the discarded branch (exp(20) is finite), so only one
    # compare+select is needed.
    bx = beta * x
    sp = jnp.log1p(jnp.exp(jnp.minimum(bx, threshold))) * (1.0 / beta)
    return jnp.where(bx > threshold, x, sp)


# ----------------------------------------------------------------------------
# kernel
# ----------------------------------------------------------------------------
def _deformer_mlp_kernel(n_lin, n_chunks, ch, *refs):
    """Fused MLP, feature-major (lane-dense) hidden layers.

    refs = (inp_ref, xc_ref,
            w0a_t, w0b_t, b0_row,                 # layer 0, point-major (in, out)/(1, out)
            w1, b1_col, ..., w_{L-2}, b_col,      # middle layers, feature-major (out, in)/(out, 1)
            wL_t, bL_row,                         # last layer, point-major (in, out)/(1, out)
            out_ref)

    inp_ref : (TM, d_in)   local_pose tile      out_ref : (TM, d_out_total)
    xc_ref  : (TM, d_xc)   query-coordinate tile
    """
    inp_ref, xc_ref = refs[0], refs[1]
    out_ref = refs[-1]
    w_refs = refs[2:-1]

    # Statically-unrolled row-chunk loop: keeps each chunk's activations inside
    # the 64-vreg register file instead of spilling a (TM, d_hid) value to VMEM
    # between layers.  Chunk slice starts are Python ints -> zero-cost slices.
    for c in range(n_chunks):
        r0 = c * ch
        inp = inp_ref[pl.ds(r0, ch), :]       # (ch, d_in)  lane-sparse, read once
        xcv = xc_ref[pl.ds(r0, ch), :]        # (ch, d_xc)

        # layer 0: split matmul == Linear(cat([inp, xc], 1)); the concatenated
        # activation never exists anywhere (no HBM round-trip, no lane concat).
        x = (jnp.dot(inp, w_refs[0][...], preferred_element_type=jnp.float32)
             + jnp.dot(xcv, w_refs[1][...], preferred_element_type=jnp.float32)
             + w_refs[2][...])                                    # (ch, d1) point-major

        if n_lin == 1:
            y = x
        else:
            # Go feature-major: points move onto the 128-lane axis so softplus
            # (EUP) and the middle matmuls run on fully dense vregs.
            x = _softplus_beta(x.T)                               # (d1, ch) lane-dense
            for l in range(1, n_lin - 1):                         # middle layers
                w = w_refs[3 + 2 * (l - 1)][...]                  # (out_l, in_l)
                b = w_refs[4 + 2 * (l - 1)][...]                  # (out_l, 1)
                x = _softplus_beta(
                    jnp.dot(w, x, preferred_element_type=jnp.float32) + b)
            # last layer back in point-major so the store matches the (N, d_out)
            # output layout.
            y = (jnp.dot(x.T, w_refs[-2][...],
                         preferred_element_type=jnp.float32)
                 + w_refs[-1][...])                               # (ch, d_out_total)

        out_ref[pl.ds(r0, ch), :] = y.astype(out_ref.dtype)


# ----------------------------------------------------------------------------
# wrapper
# ----------------------------------------------------------------------------
def deformer_mlp_forward(inp, xc, params, skip_in=(), tm=8192, ch=512,
                         min_grid_blocks=8):
    """inp: (N, d_in) local_pose, xc: (N, d_xc).  Returns (N, d_out_total) f32.

    params[l] = (W_l (out, in), b_l (out,))  -- PyTorch Linear orientation.
    """
    if tuple(skip_in):
        # TODO(synk): see module-level note; source module's skip path is
        # shape-inconsistent, so it is rejected rather than faked.
        raise NotImplementedError("skip_in != () is not supported")

    N, d_in = inp.shape
    d_xc = xc.shape[1]
    n_lin = len(params)
    d_final = params[-1][0].shape[0]

    # --- tile / chunk selection ---------------------------------------------
    # ch-row chunks are processed fully in vregs; the grid block (tm_eff rows)
    # is always a whole number of chunks (so chunk slices never leave the VMEM
    # block; ragged HBM edges are handled by Pallas DMA masking).
    # Per-row VMEM for the three pipelined streams (inp, xc, out): each block is
    # lane-padded to 128 lanes, f32, double-buffered.
    bytes_per_row = 3 * 2 * 128 * 4
    vmem_stream_budget = 28 << 20                 # conservative: v7x has 64 MiB physical VMEM
    tm_vmem_cap = max(ch, (vmem_stream_budget // bytes_per_row) // ch * ch)
    # Keep >= min_grid_blocks grid blocks so v7x's 2 TensorCores both get work.
    tm_split_cap = max(ch, _round_up(-(-N // min_grid_blocks), ch))
    tm_eff = min(_round_up(min(tm, _round_up(N, ch)), ch), tm_vmem_cap, tm_split_cap)
    n_chunks = tm_eff // ch
    grid = (pl.cdiv(N, tm_eff),)

    # Explicit VMEM limit: double-buffered stream blocks + headroom for weights,
    # spills and internal scratch (v5e's default scoped limit is 16 MiB).
    stream_bytes = 2 * 4 * tm_eff * (_round_up(d_in, 128) + _round_up(d_xc, 128)
                                     + _round_up(d_final, 128))
    vmem_limit = int(stream_bytes + (8 << 20))

    # --- parameter packing: layer 0 / last layer point-major, middle feature-major
    w0, b0 = params[0]                            # (d1, d_in + d_xc), (d1,)
    w0a_t = jnp.asarray(w0[:, :d_in].T)           # (d_in, d1)  rows acting on local_pose
    w0b_t = jnp.asarray(w0[:, d_in:].T)           # (d_xc, d1)  rows acting on xc

    flat = [inp, xc, w0a_t, w0b_t, b0.reshape(1, -1)]
    in_specs = [
        pl.BlockSpec((tm_eff, d_in), lambda i: (i, 0)),     # local_pose tile
        pl.BlockSpec((tm_eff, d_xc), lambda i: (i, 0)),     # xc tile
        pl.BlockSpec(w0a_t.shape, lambda i: (0, 0)),        # weights/biases: constant
        pl.BlockSpec(w0b_t.shape, lambda i: (0, 0)),        # index_map -> fetched once,
        pl.BlockSpec((1, w0.shape[0]), lambda i: (0, 0)),   # resident in VMEM
    ]
    for w, b in params[1:-1]:                     # middle layers, feature-major
        flat += [w, b.reshape(-1, 1)]
        in_specs += [pl.BlockSpec(w.shape, lambda i: (0, 0)),
                     pl.BlockSpec((w.shape[0], 1), lambda i: (0, 0))]
    if n_lin >= 2:                                # last layer, point-major
        w_last, b_last = params[-1]
        flat += [jnp.asarray(w_last.T), b_last.reshape(1, -1)]
        in_specs += [pl.BlockSpec((w_last.shape[1], w_last.shape[0]), lambda i: (0, 0)),
                     pl.BlockSpec((1, w_last.shape[0]), lambda i: (0, 0))]

    kernel = functools.partial(_deformer_mlp_kernel, n_lin, n_chunks, ch)

    return pl.pallas_call(
        kernel,
        out_shape=jax.ShapeDtypeStruct((N, d_final), jnp.float32),
        grid=grid,
        in_specs=in_specs,
        out_specs=pl.BlockSpec((tm_eff, d_final), lambda i: (i, 0)),
        compiler_params=pltpu.CompilerParams(
            dimension_semantics=("parallel",),
            vmem_limit_bytes=vmem_limit),
    )(*flat)


# ----------------------------------------------------------------------------
# deterministic parameter init (matches nn.Linear default init; weight_norm at
# init is an identity reparameterization: g = ||v|| so W_eff = v)
# ----------------------------------------------------------------------------
def init_params(opt, key):
    dims = [opt.d_in + 3] + [opt.d_hid] * opt.n_layers + [opt.d_out + opt.d_deformed_feature]
    params = []
    for l in range(len(dims) - 1):
        dim_out = dims[l + 1] - dims[0] if (l + 1) in opt.skip_in else dims[l + 1]
        key, kw, kb = jax.random.split(key, 3)
        bound = 1.0 / math.sqrt(dims[l])
        v = jax.random.uniform(kw, (dim_out, dims[l]), jnp.float32, -bound, bound)  # (out, in)
        b = jax.random.uniform(kb, (dim_out,), jnp.float32, -bound, bound)
        if opt.weight_norm:
            norm = jnp.linalg.norm(v, axis=1, keepdims=True)
            w_eff = norm * v / norm            # identity at init
        else:
            w_eff = v
        params.append((w_eff, b))              # (out, in), (out,)
    return params, dims


# pure-JAX reference (mirrors the PyTorch forward) for verification
def reference_forward(inp, xc, params, skip_in=()):
    x = jnp.concatenate([inp, xc], axis=1)
    n_lin = len(params)
    for l in range(n_lin):
        w, b = params[l]                       # (out, in), (out,)
        if l in skip_in:
            x = jnp.concatenate([x, inp], axis=1) / math.sqrt(2.0)
        x = x @ w.T + b
        if l < n_lin - 1:
            x = _softplus_beta(x)
    return x


def _run_case(N, opt, params, key):
    kp, kx = jax.random.split(key)
    local_pose = jax.random.normal(kp, (N, opt.d_in), jnp.float32)   # "input"
    xc = jax.random.normal(kx, (N, 3), jnp.float32)                  # query coords

    out = jax.block_until_ready(
        deformer_mlp_forward(local_pose, xc, params, skip_in=opt.skip_in))
    ref = reference_forward(local_pose, xc, params, skip_in=opt.skip_in)

    assert out.shape == (N, opt.d_out + opt.d_deformed_feature), out.shape
    err = float(jnp.max(jnp.abs(out - ref)))
    assert jnp.allclose(out, ref, atol=2e-4, rtol=2e-4), err


# ----------------------------------------------------------------------------
if __name__ == "__main__":
    opt = Opt()
    kparams, k1, k2 = jax.random.split(jax.random.PRNGKey(0), 3)
    params, _ = init_params(opt, kparams)

    # small case: single grid block, single chunk, ragged (N not multiple of 8*128)
    _run_case(200, opt, params, k1)
    # larger case: multi-block grid + multi-chunk inner loop + ragged last block
    _run_case(8200, opt, params, k2)

    print("KERNEL_OK")
</pallas_src>

<mosaic_0001>
module attributes {stable_mosaic.version = 11 : i64} {
  func.func @_deformer_mlp_kernel(%arg0: i32, %arg1: memref<512x5xf32, #tpu.memory_space<vmem>>, %arg2: memref<512x3xf32, #tpu.memory_space<vmem>>, %arg3: memref<5x32xf32, #tpu.memory_space<vmem>>, %arg4: memref<3x32xf32, #tpu.memory_space<vmem>>, %arg5: memref<1x32xf32, #tpu.memory_space<vmem>>, %arg6: memref<32x32xf32, #tpu.memory_space<vmem>>, %arg7: memref<32x1xf32, #tpu.memory_space<vmem>>, %arg8: memref<32x32xf32, #tpu.memory_space<vmem>>, %arg9: memref<32x1xf32, #tpu.memory_space<vmem>>, %arg10: memref<32x16xf32, #tpu.memory_space<vmem>>, %arg11: memref<1x16xf32, #tpu.memory_space<vmem>>, %arg12: memref<512x16xf32, #tpu.memory_space<vmem>>) attributes {dimension_semantics = [#tpu.dimension_semantics<parallel>], iteration_bounds = array<i64: 1>, scalar_prefetch = 0 : i64, scratch_operands = 0 : i64, tpu.core_type = #tpu.core_type<tc>, window_params = [{transform_indices = @transform_0, window_bounds = array<i64: 512, 5>}, {transform_indices = @transform_1, window_bounds = array<i64: 512, 3>}, {pipeline_mode = #tpu.pipeline_mode<synchronous>, transform_indices = @transform_2, window_bounds = array<i64: 5, 32>}, {pipeline_mode = #tpu.pipeline_mode<synchronous>, transform_indices = @transform_3, window_bounds = array<i64: 3, 32>}, {pipeline_mode = #tpu.pipeline_mode<synchronous>, transform_indices = @transform_4, window_bounds = array<i64: 1, 32>}, {pipeline_mode = #tpu.pipeline_mode<synchronous>, transform_indices = @transform_5, window_bounds = array<i64: 32, 32>}, {pipeline_mode = #tpu.pipeline_mode<synchronous>, transform_indices = @transform_6, window_bounds = array<i64: 32, 1>}, {pipeline_mode = #tpu.pipeline_mode<synchronous>, transform_indices = @transform_7, window_bounds = array<i64: 32, 32>}, {pipeline_mode = #tpu.pipeline_mode<synchronous>, transform_indices = @transform_8, window_bounds = array<i64: 32, 1>}, {pipeline_mode = #tpu.pipeline_mode<synchronous>, transform_indices = @transform_9, window_bounds = array<i64: 32, 16>}, {pipeline_mode = #tpu.pipeline_mode<synchronous>, transform_indices = @transform_10, window_bounds = array<i64: 1, 16>}, {transform_indices = @transform_11, window_bounds = array<i64: 512, 16>}]} {
    %c0 = arith.constant 0 : index
    %c0_0 = arith.constant 0 : index
    %0 = vector.load %arg1[%c0, %c0_0] : memref<512x5xf32, #tpu.memory_space<vmem>>, vector<512x5xf32>
    %c0_1 = arith.constant 0 : index
    %c0_2 = arith.constant 0 : index
    %1 = vector.load %arg2[%c0_1, %c0_2] : memref<512x3xf32, #tpu.memory_space<vmem>>, vector<512x3xf32>
    %c0_3 = arith.constant 0 : index
    %c0_4 = arith.constant 0 : index
    %2 = vector.load %arg3[%c0_3, %c0_4] : memref<5x32xf32, #tpu.memory_space<vmem>>, vector<5x32xf32>
    %cst = arith.constant dense<0.000000e+00> : vector<512x32xf32>
    %3 = tpu.matmul %0, %2, %cst {dimension_numbers = #tpu.dot_dimension_numbers<[1], [0], [0], [1], [0, 0, 1, 1], [], []>} : vector<512x5xf32>, vector<5x32xf32>, vector<512x32xf32> -> vector<512x32xf32>
    %c0_5 = arith.constant 0 : index
    %c0_6 = arith.constant 0 : index
    %4 = vector.load %arg4[%c0_5, %c0_6] : memref<3x32xf32, #tpu.memory_space<vmem>>, vector<3x32xf32>
    %cst_7 = arith.constant dense<0.000000e+00> : vector<512x32xf32>
    %5 = tpu.matmul %1, %4, %cst_7 {dimension_numbers = #tpu.dot_dimension_numbers<[1], [0], [0], [1], [0, 0, 1, 1], [], []>} : vector<512x3xf32>, vector<3x32xf32>, vector<512x32xf32> -> vector<512x32xf32>
    %6 = arith.addf %3, %5 : vector<512x32xf32>
    %c0_8 = arith.constant 0 : index
    %c0_9 = arith.constant 0 : index
    %7 = vector.load %arg5[%c0_8, %c0_9] : memref<1x32xf32, #tpu.memory_space<vmem>>, vector<1x32xf32>
    %8 = vector.broadcast %7 : vector<1x32xf32> to vector<512x32xf32>
    %9 = arith.addf %6, %8 : vector<512x32xf32>
    %10 = tpu.transpose %9, [1, 0] : vector<512x32xf32> -> vector<32x512xf32>
    %cst_10 = arith.constant 1.000000e+02 : f32
    %11 = vector.broadcast %cst_10 : f32 to vector<32x512xf32>
    %12 = arith.mulf %11, %10 : vector<32x512xf32>
    %cst_11 = arith.constant 2.000000e+01 : f32
    %13 = vector.broadcast %cst_11 : f32 to vector<32x512xf32>
    %14 = arith.minimumf %12, %13 : vector<32x512xf32>
    %15 = math.exp %14 : vector<32x512xf32>
    %16 = math.log1p %15 : vector<32x512xf32>
    %cst_12 = arith.constant 0.00999999977 : f32
    %17 = vector.broadcast %cst_12 : f32 to vector<32x512xf32>
    %18 = arith.mulf %16, %17 : vector<32x512xf32>
    %cst_13 = arith.constant 2.000000e+01 : f32
    %19 = vector.broadcast %cst_13 : f32 to vector<32x512xf32>
    %20 = arith.cmpf ogt, %12, %19 : vector<32x512xf32>
    %21 = arith.select %20, %10, %18 : vector<32x512xi1>, vector<32x512xf32>
    %c0_14 = arith.constant 0 : index
    %c0_15 = arith.constant 0 : index
    %22 = vector.load %arg6[%c0_14, %c0_15] : memref<32x32xf32, #tpu.memory_space<vmem>>, vector<32x32xf32>
    %c0_16 = arith.constant 0 : index
    %c0_17 = arith.constant 0 : index
    %23 = vector.load %arg7[%c0_16, %c0_17] : memref<32x1xf32, #tpu.memory_space<vmem>>, vector<32x1xf32>
    %cst_18 = arith.constant dense<0.000000e+00> : vector<32x512xf32>
    %24 = tpu.matmul %22, %21, %cst_18 {dimension_numbers = #tpu.dot_dimension_numbers<[1], [0], [0], [1], [0, 0, 1, 1], [], []>} : vector<32x32xf32>, vector<32x512xf32>, vector<32x512xf32> -> vector<32x512xf32>
    %25 = vector.broadcast %23 : vector<32x1xf32> to vector<32x512xf32>
    %26 = arith.addf %24, %25 : vector<32x512xf32>
    %cst_19 = arith.constant 1.000000e+02 : f32
    %27 = vector.broadcast %cst_19 : f32 to vector<32x512xf32>
    %28 = arith.mulf %27, %26 : vector<32x512xf32>
    %cst_20 = arith.constant 2.000000e+01 : f32
    %29 = vector.broadcast %cst_20 : f32 to vector<32x512xf32>
    %30 = arith.minimumf %28, %29 : vector<32x512xf32>
    %31 = math.exp %30 : vector<32x512xf32>
    %32 = math.log1p %31 : vector<32x512xf32>
    %cst_21 = arith.constant 0.00999999977 : f32
    %33 = vector.broadcast %cst_21 : f32 to vector<32x512xf32>
    %34 = arith.mulf %32, %33 : vector<32x512xf32>
    %cst_22 = arith.constant 2.000000e+01 : f32
    %35 = vector.broadcast %cst_22 : f32 to vector<32x512xf32>
    %36 = arith.cmpf ogt, %28, %35 : vector<32x512xf32>
    %37 = arith.select %36, %26, %34 : vector<32x512xi1>, vector<32x512xf32>
    %c0_23 = arith.constant 0 : index
    %c0_24 = arith.constant 0 : index
    %38 = vector.load %arg8[%c0_23, %c0_24] : memref<32x32xf32, #tpu.memory_space<vmem>>, vector<32x32xf32>
    %c0_25 = arith.constant 0 : index
    %c0_26 = arith.constant 0 : index
    %39 = vector.load %arg9[%c0_25, %c0_26] : memref<32x1xf32, #tpu.memory_space<vmem>>, vector<32x1xf32>
    %cst_27 = arith.constant dense<0.000000e+00> : vector<32x512xf32>
    %40 = tpu.matmul %38, %37, %cst_27 {dimension_numbers = #tpu.dot_dimension_numbers<[1], [0], [0], [1], [0, 0, 1, 1], [], []>} : vector<32x32xf32>, vector<32x512xf32>, vector<32x512xf32> -> vector<32x512xf32>
    %41 = vector.broadcast %39 : vector<32x1xf32> to vector<32x512xf32>
    %42 = arith.addf %40, %41 : vector<32x512xf32>
    %cst_28 = arith.constant 1.000000e+02 : f32
    %43 = vector.broadcast %cst_28 : f32 to vector<32x512xf32>
    %44 = arith.mulf %43, %42 : vector<32x512xf32>
    %cst_29 = arith.constant 2.000000e+01 : f32
    %45 = vector.broadcast %cst_29 : f32 to vector<32x512xf32>
    %46 = arith.minimumf %44, %45 : vector<32x512xf32>
    %47 = math.exp %46 : vector<32x512xf32>
    %48 = math.log1p %47 : vector<32x512xf32>
    %cst_30 = arith.constant 0.00999999977 : f32
    %49 = vector.broadcast %cst_30 : f32 to vector<32x512xf32>
    %50 = arith.mulf %48, %49 : vector<32x512xf32>
    %cst_31 = arith.constant 2.000000e+01 : f32
    %51 = vector.broadcast %cst_31 : f32 to vector<32x512xf32>
    %52 = arith.cmpf ogt, %44, %51 : vector<32x512xf32>
    %53 = arith.select %52, %42, %50 : vector<32x512xi1>, vector<32x512xf32>
    %54 = tpu.transpose %53, [1, 0] : vector<32x512xf32> -> vector<512x32xf32>
    %c0_32 = arith.constant 0 : index
    %c0_33 = arith.constant 0 : index
    %55 = vector.load %arg10[%c0_32, %c0_33] : memref<32x16xf32, #tpu.memory_space<vmem>>, vector<32x16xf32>
    %cst_34 = arith.constant dense<0.000000e+00> : vector<512x16xf32>
    %56 = tpu.matmul %54, %55, %cst_34 {dimension_numbers = #tpu.dot_dimension_numbers<[1], [0], [0], [1], [0, 0, 1, 1], [], []>} : vector<512x32xf32>, vector<32x16xf32>, vector<512x16xf32> -> vector<512x16xf32>
    %c0_35 = arith.constant 0 : index
    %c0_36 = arith.constant 0 : index
    %57 = vector.load %arg11[%c0_35, %c0_36] : memref<1x16xf32, #tpu.memory_space<vmem>>, vector<1x16xf32>
    %58 = vector.broadcast %57 : vector<1x16xf32> to vector<512x16xf32>
    %59 = arith.addf %56, %58 : vector<512x16xf32>
    %c0_37 = arith.constant 0 : index
    %c0_38 = arith.constant 0 : index
    %60 = vector.load %arg12[%c0_37, %c0_38] : memref<512x16xf32, #tpu.memory_space<vmem>>, vector<512x16xf32>
    tpu.vector_store %arg12[%c0_37, %c0_38], %59 {strides = array<i32>} : memref<512x16xf32, #tpu.memory_space<vmem>>, vector<512x16xf32>,
    return
  }
  func.func @transform_0(%arg0: i32) -> (i32, i32) {
    %c0_i32 = arith.constant 0 : i32
    %c0_i32_0 = arith.constant 0 : i32
    return %arg0, %c0_i32 : i32, i32
  }
  func.func @transform_1(%arg0: i32) -> (i32, i32) {
    %c0_i32 = arith.constant 0 : i32
    %c0_i32_0 = arith.constant 0 : i32
    return %arg0, %c0_i32 : i32, i32
  }
  func.func @transform_2(%arg0: i32) -> (i32, i32) {
    %c0_i32 = arith.constant 0 : i32
    %c0_i32_0 = arith.constant 0 : i32
    %c0_i32_1 = arith.constant 0 : i32
    return %c0_i32, %c0_i32_0 : i32, i32
  }
  func.func @transform_3(%arg0: i32) -> (i32, i32) {
    %c0_i32 = arith.constant 0 : i32
    %c0_i32_0 = arith.constant 0 : i32
    %c0_i32_1 = arith.constant 0 : i32
    return %c0_i32, %c0_i32_0 : i32, i32
  }
  func.func @transform_4(%arg0: i32) -> (i32, i32) {
    %c0_i32 = arith.constant 0 : i32
    %c0_i32_0 = arith.constant 0 : i32
    %c0_i32_1 = arith.constant 0 : i32
    return %c0_i32, %c0_i32_0 : i32, i32
  }
  func.func @transform_5(%arg0: i32) -> (i32, i32) {
    %c0_i32 = arith.constant 0 : i32
    %c0_i32_0 = arith.constant 0 : i32
    %c0_i32_1 = arith.constant 0 : i32
    return %c0_i32, %c0_i32_0 : i32, i32
  }
  func.func @transform_6(%arg0: i32) -> (i32, i32) {
    %c0_i32 = arith.constant 0 : i32
    %c0_i32_0 = arith.constant 0 : i32
    %c0_i32_1 = arith.constant 0 : i32
    return %c0_i32, %c0_i32_0 : i32, i32
  }
  func.func @transform_7(%arg0: i32) -> (i32, i32) {
    %c0_i32 = arith.constant 0 : i32
    %c0_i32_0 = arith.constant 0 : i32
    %c0_i32_1 = arith.constant 0 : i32
    return %c0_i32, %c0_i32_0 : i32, i32
  }
  func.func @transform_8(%arg0: i32) -> (i32, i32) {
    %c0_i32 = arith.constant 0 : i32
    %c0_i32_0 = arith.constant 0 : i32
    %c0_i32_1 = arith.constant 0 : i32
    return %c0_i32, %c0_i32_0 : i32, i32
  }
  func.func @transform_9(%arg0: i32) -> (i32, i32) {
    %c0_i32 = arith.constant 0 : i32
    %c0_i32_0 = arith.constant 0 : i32
    %c0_i32_1 = arith.constant 0 : i32
    return %c0_i32, %c0_i32_0 : i32, i32
  }
  func.func @transform_10(%arg0: i32) -> (i32, i32) {
    %c0_i32 = arith.constant 0 : i32
    %c0_i32_0 = arith.constant 0 : i32
    %c0_i32_1 = arith.constant 0 : i32
    return %c0_i32, %c0_i32_0 : i32, i32
  }
  func.func @transform_11(%arg0: i32) -> (i32, i32) {
    %c0_i32 = arith.constant 0 : i32
    %c0_i32_0 = arith.constant 0 : i32
    return %arg0, %c0_i32 : i32, i32
  }
}

</mosaic_0001>

<bundles_post_ra>
// kernel: tpu_custom_call.1
= control target key start
LH: loop header
LB: loop body
LE: loop exit
PB: predicated region body
PF: predicated region fallthrough
CT: control target
= control target key end

     0   :  { %vm361_vm0 = vcmask 1042432   ;;  %vm168_vm1 = vcmask 23552   ;;  %vm943_vm2 = vcmask 1044480   ;;  %vm750_vm3 = vcmask 39936   ;;  %s6475_s0 = inlined_call_operand.vmem [shape: f32[200,5], index: 0, kind: input, shape index: {}]   ;;  %s6476_s1 = inlined_call_operand.vmem [shape: f32[200,3], index: 1, kind: input, shape index: {}]   ;;  %s6477_s2 = inlined_call_operand.vmem [shape: f32[5,32], index: 2, kind: input, shape index: {}]   ;;  %s6478_s3 = inlined_call_operand.vmem [shape: f32[3,32], index: 3, kind: input, shape index: {}]   ;;  %s6479_s4 = inlined_call_operand.vmem [shape: f32[1,32], index: 4, kind: input, shape index: {}]   ;;  %s6480_s5 = inlined_call_operand.vmem [shape: f32[32,32], index: 5, kind: input, shape index: {}]   ;;  %s6481_s6 = inlined_call_operand.vmem [shape: f32[32,1], index: 6, kind: input, shape index: {}]   ;;  %s6482_s7 = inlined_call_operand.vmem [shape: f32[32,32], index: 7, kind: input, shape index: {}]   ;;  %s6483_s8 = inlined_call_operand.vmem [shape: f32[32,1], index: 8, kind: input, shape index: {}]   ;;  %s6484_s9 = inlined_call_operand.vmem [shape: f32[32,16], index: 9, kind: input, shape index: {}]   ;;  %s6485_s10 = inlined_call_operand.vmem [shape: f32[1,16], index: 10, kind: input, shape index: {}]   ;;  %s6486_s11 = inlined_call_operand.vmem [shape: f32[200,16], index: 11, kind: output, shape index: {}]  }
   0x1   :  { %v167_v0 = vld [vmem:[%s6478_s3] sm:$0x7]  ;;  %v103_v2 = vld [vmem:[%s6476_s1 + $0x8] sm:$0xff]  ;;  %v104_v3 = vld [vmem:[%s6476_s1 + $0x10] sm:$0xff] }
   0x2   :  { %v102_v1 = vld [vmem:[%s6476_s1] sm:$0xff]  ;;  %4063 = vmatprep.subr.msk.mxu0 %vm361_vm0, %v167_v0  ;;  %4403 = vmatprep.subr.msk.mxu1 %vm361_vm0, %v167_v0  ;;  %v105_v4 = vld [vmem:[%s6476_s1 + $0x18] sm:$0xff]  ;;  %v107_v7 = vld [vmem:[%s6476_s1 + $0x28] sm:$0xff] }
   0x3   :  { %4065 = vmatprep.mubr.msk.f32.mxu0 %vm168_vm1, %v102_v1  ;;  %4064 = vmatpush3.msk.msra.mxu0 %vm361_vm0, %v167_v0  ;;  %v166_v5 = vld [vmem:[%s6477_s2] sm:$0x1f]  ;;  %v108_v8 = vld [vmem:[%s6476_s1 + $0x30] sm:$0xff]  ;;  %v109_v9 = vld [vmem:[%s6476_s1 + $0x38] sm:$0xff] }
   0x4   :  { %4066 = vmatmul.mubr.msk.f32.vlgmr.msra.gmra.mrb[0].mxu0 %vm168_vm1, %v103_v2  ;;  %4404 = vmatpush3.msk.msra.mxu1 %vm361_vm0, %v167_v0  ;;  %v106_v6 = vld [vmem:[%s6476_s1 + $0x20] sm:$0xff]  ;;  %v111_v11 = vld [vmem:[%s6476_s1 + $0x48] sm:$0xff]  ;;  %v112_v12 = vld [vmem:[%s6476_s1 + $0x50] sm:$0xff] }
   0x5   :  { %4068 = vmatprep.mubr.msk.f32.mxu0 %vm168_vm1, %v104_v3  ;;  %4161 = vmatprep.subr.msk.mxu0 %vm943_vm2, %v166_v5  ;;  %v110_v10 = vld [vmem:[%s6476_s1 + $0x40] sm:$0xff]  ;;  %v113_v13 = vld [vmem:[%s6476_s1 + $0x58] sm:$0xff]  ;;  %v115_v15 = vld [vmem:[%s6476_s1 + $0x68] sm:$0xff] }
   0x6   :  { %4162 = vmatpush3.msk.msra.mxu0 %vm943_vm2, %v166_v5  ;;  %v114_v14 = vld [vmem:[%s6476_s1 + $0x60] sm:$0xff]  ;;  %v116_v16 = vld [vmem:[%s6476_s1 + $0x70] sm:$0xff]  ;;  %v117_v17 = vld [vmem:[%s6476_s1 + $0x78] sm:$0xff] }
   0x7   :  { %v118_v18 = vld [vmem:[%s6476_s1 + $0x80] sm:$0xff]  ;;  %v119_v19 = vld [vmem:[%s6476_s1 + $0x88] sm:$0xff]  ;;  %v120_v20 = vld [vmem:[%s6476_s1 + $0x90] sm:$0xff] }
   0x8   :  { %4069 = vmatmul.mubr.msk.f32.gmra.mrb[2].mxu0 %vm168_vm1, %v105_v4  ;;  %v121_v21 = vld [vmem:[%s6476_s1 + $0x98] sm:$0xff]  ;;  %v122_v22 = vld [vmem:[%s6476_s1 + $0xa0] sm:$0xff]  ;;  %v123_v23 = vld [vmem:[%s6476_s1 + $0xa8] sm:$0xff] }
   0x9   :  { %4071 = vmatprep.mubr.msk.f32.mxu0 %vm168_vm1, %v106_v6  ;;  %v124_v24 = vld [vmem:[%s6476_s1 + $0xb0] sm:$0xff]  ;;  %v125_v25 = vld [vmem:[%s6476_s1 + $0xb8] sm:$0xff]  ;;  %v126_v26 = vld [vmem:[%s6476_s1 + $0xc0] sm:$0xff] }
   0xa   :  { %v127_v27 = vld [vmem:[%s6476_s1 + $0xc8] sm:$0xff]  ;;  %v128_v28 = vld [vmem:[%s6476_s1 + $0xd0] sm:$0xff]  ;;  %v129_v29 = vld [vmem:[%s6476_s1 + $0xd8] sm:$0xff] }
   0xb   :  { %v130_v30 = vld [vmem:[%s6476_s1 + $0xe0] sm:$0xff]  ;;  %v131_v31 = vld [vmem:[%s6476_s1 + $0xe8] sm:$0xff]  ;;  %v132_v32 = vld [vmem:[%s6476_s1 + $0xf0] sm:$0xff] }
   0xc   :  { %4072 = vmatmul.mubr.msk.f32.gmra.mrb[4].mxu0 %vm168_vm1, %v107_v7  ;;  %v133_v33 = vld [vmem:[%s6476_s1 + $0xf8] sm:$0xff]  ;;  %v134_v34 = vld [vmem:[%s6476_s1 + $0x100] sm:$0xff]  ;;  %v135_v36 = vld [vmem:[%s6476_s1 + $0x108] sm:$0xff] }
   0xd   :  { %4074 = vmatprep.mubr.msk.f32.mxu0 %vm168_vm1, %v108_v8  ;;  %v150_v35 = vld [vmem:[%s6476_s1 + $0x180] sm:$0xff]  ;;  %v151_v37 = vld [vmem:[%s6476_s1 + $0x188] sm:$0xff]  ;;  %v136_v38 = vld [vmem:[%s6476_s1 + $0x110] sm:$0xff] }
   0xe   :  { %4137 = vmatprep.mubr.msk.f32.mxu1 %vm168_vm1, %v150_v35  ;;  %v152_v39 = vld [vmem:[%s6476_s1 + $0x190] sm:$0xff]  ;;  %v137_v40 = vld [vmem:[%s6476_s1 + $0x118] sm:$0xff]  ;;  %v138_v42 = vld [vmem:[%s6476_s1 + $0x120] sm:$0xff] }
   0xf   :  { %4138 = vmatmul.mubr.msk.f32.vlgmr.msra.gmra.mrb[0].mxu1 %vm168_vm1, %v151_v37  ;;  %v153_v41 = vld [vmem:[%s6476_s1 + $0x198] sm:$0xff]  ;;  %v154_v43 = vld [vmem:[%s6476_s1 + $0x1a0] sm:$0xff]  ;;  %v139_v44 = vld [vmem:[%s6476_s1 + $0x128] sm:$0xff] }
  0x10   :  { %4075 = vmatmul.mubr.msk.f32.gmra.mrb[6].mxu0 %vm168_vm1, %v109_v9  ;;  %4140 = vmatprep.mubr.msk.f32.mxu1 %vm168_vm1, %v152_v39  ;;  %v155_v45 = vld [vmem:[%s6476_s1 + $0x1a8] sm:$0xff]  ;;  %v140_v46 = vld [vmem:[%s6476_s1 + $0x130] sm:$0xff]  ;;  %v141_v48 = vld [vmem:[%s6476_s1 + $0x138] sm:$0xff] }
  0x11   :  { %4077 = vmatprep.mubr.msk.f32.mxu0 %vm168_vm1, %v110_v10  ;;  %v156_v47 = vld [vmem:[%s6476_s1 + $0x1b0] sm:$0xff]  ;;  %v157_v49 = vld [vmem:[%s6476_s1 + $0x1b8] sm:$0xff]  ;;  %v142_v50 = vld [vmem:[%s6476_s1 + $0x140] sm:$0xff] }
  0x12   :  { %v158_v51 = vld [vmem:[%s6476_s1 + $0x1c0] sm:$0xff]  ;;  %v143_v52 = vld [vmem:[%s6476_s1 + $0x148] sm:$0xff]  ;;  %v144_v54 = vld [vmem:[%s6476_s1 + $0x150] sm:$0xff] }
  0x13   :  { %4141 = vmatmul.mubr.msk.f32.gmra.mrb[2].mxu1 %vm168_vm1, %v153_v41  ;;  %v159_v53 = vld [vmem:[%s6476_s1 + $0x1c8] sm:$0xff]  ;;  %v160_v55 = vld [vmem:[%s6476_s1 + $0x1d0] sm:$0xff]  ;;  %v145_v56 = vld [vmem:[%s6476_s1 + $0x158] sm:$0xff] }
  0x14   :  { %4078 = vmatmul.mubr.msk.f32.gmra.mrb[8].mxu0 %vm168_vm1, %v111_v11  ;;  %4143 = vmatprep.mubr.msk.f32.mxu1 %vm168_vm1, %v154_v43  ;;  %v161_v57 = vld [vmem:[%s6476_s1 + $0x1d8] sm:$0xff]  ;;  %v146_v58 = vld [vmem:[%s6476_s1 + $0x160] sm:$0xff]  ;;  %v147_v60 = vld [vmem:[%s6476_s1 + $0x168] sm:$0xff] }
  0x15   :  { %4080 = vmatprep.mubr.msk.f32.mxu0 %vm168_vm1, %v112_v12  ;;  %v162_v59 = vld [vmem:[%s6476_s1 + $0x1e0] sm:$0xff]  ;;  %v163_v61 = vld [vmem:[%s6476_s1 + $0x1e8] sm:$0xff]  ;;  %v148_v62 = vld [vmem:[%s6476_s1 + $0x170] sm:$0xff] }
  0x16   :  { %v164_v63 = vld [vmem:[%s6476_s1 + $0x1f0] sm:$0xff]  ;;  %v149_v0 = vld [vmem:[%s6476_s1 + $0x178] sm:$0xff]  ;;  %v38_v2 = vld [vmem:[%s6475_s0] sm:$0xff] }
  0x17   :  { %4144 = vmatmul.mubr.msk.f32.gmra.mrb[4].mxu1 %vm168_vm1, %v155_v45  ;;  %v165_v1 = vld [vmem:[%s6476_s1 + $0x1f8] sm:$0xff]  ;;  %v39_v3 = vld [vmem:[%s6475_s0 + $0x8] sm:$0xff]  ;;  %v40_v4 = vld [vmem:[%s6475_s0 + $0x10] sm:$0xff] }
  0x18   :  { %4081 = vmatmul.mubr.msk.f32.gmra.mrb[10].mxu0 %vm168_vm1, %v113_v13  ;;  %4146 = vmatprep.mubr.msk.f32.mxu1 %vm168_vm1, %v156_v47  ;;  %v41_v5 = vld [vmem:[%s6475_s0 + $0x18] sm:$0xff]  ;;  %v42_v6 = vld [vmem:[%s6475_s0 + $0x20] sm:$0xff]  ;;  %v43_v7 = vld [vmem:[%s6475_s0 + $0x28] sm:$0xff] }
  0x19   :  { %4083 = vmatprep.mubr.msk.f32.mxu0 %vm168_vm1, %v114_v14  ;;  %v44_v8 = vld [vmem:[%s6475_s0 + $0x30] sm:$0xff]  ;;  %v45_v9 = vld [vmem:[%s6475_s0 + $0x38] sm:$0xff]  ;;  %v46_v10 = vld [vmem:[%s6475_s0 + $0x40] sm:$0xff] }
  0x1a   :  { %v47_v11 = vld [vmem:[%s6475_s0 + $0x48] sm:$0xff]  ;;  %v48_v12 = vld [vmem:[%s6475_s0 + $0x50] sm:$0xff]  ;;  %v49_v13 = vld [vmem:[%s6475_s0 + $0x58] sm:$0xff] }
  0x1b   :  { %4147 = vmatmul.mubr.msk.f32.gmra.mrb[6].mxu1 %vm168_vm1, %v157_v49  ;;  %v50_v14 = vld [vmem:[%s6475_s0 + $0x60] sm:$0xff]  ;;  %v71_v35 = vld [vmem:[%s6475_s0 + $0x108] sm:$0xff]  ;;  %v73_v37 = vld [vmem:[%s6475_s0 + $0x118] sm:$0xff] }
  0x1c   :  { %4084 = vmatmul.mubr.msk.f32.gmra.mrb[12].mxu0 %vm168_vm1, %v115_v15  ;;  %4149 = vmatprep.mubr.msk.f32.mxu1 %vm168_vm1, %v158_v51  ;;  %v51_v15 = vld [vmem:[%s6475_s0 + $0x68] sm:$0xff]  ;;  %v77_v41 = vld [vmem:[%s6475_s0 + $0x138] sm:$0xff] }
  0x1d   :  { %4086 = vmatprep.mubr.msk.f32.mxu0 %vm168_vm1, %v116_v16  ;;  %v52_v16 = vld [vmem:[%s6475_s0 + $0x70] sm:$0xff]  ;;  %v75_v39 = vld [vmem:[%s6475_s0 + $0x128] sm:$0xff]  ;;  %v81_v45 = vld [vmem:[%s6475_s0 + $0x158] sm:$0xff] }
  0x1e   :  { %v79_v43 = vld [vmem:[%s6475_s0 + $0x148] sm:$0xff]  ;;  %v85_v49 = vld [vmem:[%s6475_s0 + $0x178] sm:$0xff] }
  0x1f   :  { %4150 = vmatmul.mubr.msk.f32.gmra.mrb[8].mxu1 %vm168_vm1, %v159_v53  ;;  %v83_v47 = vld [vmem:[%s6475_s0 + $0x168] sm:$0xff]  ;;  %v89_v53 = vld [vmem:[%s6475_s0 + $0x198] sm:$0xff] }
  0x20   :  { %4087 = vmatmul.mubr.msk.f32.gmra.mrb[14].mxu0 %vm168_vm1, %v117_v17  ;;  %4152 = vmatprep.mubr.msk.f32.mxu1 %vm168_vm1, %v160_v55  ;;  %v53_v17 = vld [vmem:[%s6475_s0 + $0x78] sm:$0xff]  ;;  %v87_v51 = vld [vmem:[%s6475_s0 + $0x188] sm:$0xff] }
  0x21   :  { %4089 = vmatprep.mubr.msk.f32.mxu0 %vm168_vm1, %v118_v18  ;;  %v54_v18 = vld [vmem:[%s6475_s0 + $0x80] sm:$0xff]  ;;  %v91_v55 = vld [vmem:[%s6475_s0 + $0x1a8] sm:$0xff] }
  0x23   :  { %4153 = vmatmul.mubr.msk.f32.gmra.mrb[10].mxu1 %vm168_vm1, %v161_v57  ;;  %v93_v57 = vld [vmem:[%s6475_s0 + $0x1b8] sm:$0xff] }
  0x24   :  { %4090 = vmatmul.mubr.msk.f32.gmra.mrb[16].mxu0 %vm168_vm1, %v119_v19  ;;  %4155 = vmatprep.mubr.msk.f32.mxu1 %vm168_vm1, %v162_v59  ;;  %v55_v19 = vld [vmem:[%s6475_s0 + $0x88] sm:$0xff] }
  0x25   :  { %4092 = vmatprep.mubr.msk.f32.mxu0 %vm168_vm1, %v120_v20  ;;  %v56_v20 = vld [vmem:[%s6475_s0 + $0x90] sm:$0xff]  ;;  %v95_v59 = vld [vmem:[%s6475_s0 + $0x1c8] sm:$0xff] }
  0x27   :  { %4156 = vmatmul.mubr.msk.f32.gmra.mrb[12].mxu1 %vm168_vm1, %v163_v61  ;;  %v97_v61 = vld [vmem:[%s6475_s0 + $0x1d8] sm:$0xff] }
  0x28   :  { %4093 = vmatmul.mubr.msk.f32.gmra.mrb[18].mxu0 %vm168_vm1, %v121_v21  ;;  %4158 = vmatprep.mubr.msk.f32.mxu1 %vm168_vm1, %v164_v63  ;;  %v57_v21 = vld [vmem:[%s6475_s0 + $0x98] sm:$0xff]  ;;  %v99_v63 = vld [vmem:[%s6475_s0 + $0x1e8] sm:$0xff] }
  0x29   :  { %4095 = vmatprep.mubr.msk.f32.mxu0 %vm168_vm1, %v122_v22  ;;  %v58_v22 = vld [vmem:[%s6475_s0 + $0xa0] sm:$0xff] }
  0x2b   :  { %4159 = vmatmul.mubr.msk.f32.gmra.mrb[14].mxu1 %vm168_vm1, %v165_v1  ;;  %v101_v1 = vld [vmem:[%s6475_s0 + $0x1f8] sm:$0xff] }
  0x2c   :  { %4096 = vmatmul.mubr.msk.f32.gmra.mrb[20].mxu0 %vm168_vm1, %v123_v23  ;;  %v59_v23 = vld [vmem:[%s6475_s0 + $0xa8] sm:$0xff] }
  0x2d   :  { %4098 = vmatprep.mubr.msk.f32.mxu0 %vm168_vm1, %v124_v24  ;;  %v60_v24 = vld [vmem:[%s6475_s0 + $0xb0] sm:$0xff] }
  0x30   :  { %4099 = vmatmul.mubr.msk.f32.gmra.mrb[22].mxu0 %vm168_vm1, %v125_v25  ;;  %v61_v25 = vld [vmem:[%s6475_s0 + $0xb8] sm:$0xff] }
  0x31   :  { %4101 = vmatprep.mubr.msk.f32.mxu0 %vm168_vm1, %v126_v26  ;;  %v62_v26 = vld [vmem:[%s6475_s0 + $0xc0] sm:$0xff] }
  0x34   :  { %4102 = vmatmul.mubr.msk.f32.gmra.mrb[24].mxu0 %vm168_vm1, %v127_v27  ;;  %v63_v27 = vld [vmem:[%s6475_s0 + $0xc8] sm:$0xff] }
  0x35   :  { %4104 = vmatprep.mubr.msk.f32.mxu0 %vm168_vm1, %v128_v28  ;;  %v64_v28 = vld [vmem:[%s6475_s0 + $0xd0] sm:$0xff] }
  0x38   :  { %4105 = vmatmul.mubr.msk.f32.gmra.mrb[26].mxu0 %vm168_vm1, %v129_v29  ;;  %v65_v29 = vld [vmem:[%s6475_s0 + $0xd8] sm:$0xff] }
  0x39   :  { %4107 = vmatprep.mubr.msk.f32.mxu0 %vm168_vm1, %v130_v30  ;;  %v66_v30 = vld [vmem:[%s6475_s0 + $0xe0] sm:$0xff] }
  0x3c   :  { %4108 = vmatmul.mubr.msk.f32.gmra.mrb[28].mxu0 %vm168_vm1, %v131_v31  ;;  %v67_v31 = vld [vmem:[%s6475_s0 + $0xe8] sm:$0xff] }
  0x3d   :  { %4110 = vmatprep.mubr.msk.f32.mxu0 %vm168_vm1, %v132_v32  ;;  %v68_v32 = vld [vmem:[%s6475_s0 + $0xf0] sm:$0xff] }
  0x40   :  { %4111 = vmatmul.mubr.msk.f32.gmra.mrb[30].mxu0 %vm168_vm1, %v133_v33  ;;  %v69_v33 = vld [vmem:[%s6475_s0 + $0xf8] sm:$0xff] }
  0x41   :  { %4113 = vmatprep.mubr.msk.f32.mxu0 %vm168_vm1, %v134_v34  ;;  %v70_v34 = vld [vmem:[%s6475_s0 + $0x100] sm:$0xff] }
  0x44   :  { %4114 = vmatmul.mubr.msk.f32.gmra.mrb[32].mxu0 %vm168_vm1, %v135_v36  ;;  %v72_v36 = vld [vmem:[%s6475_s0 + $0x110] sm:$0xff] }
  0x45   :  { %4116 = vmatprep.mubr.msk.f32.mxu0 %vm168_vm1, %v136_v38  ;;  %v74_v38 = vld [vmem:[%s6475_s0 + $0x120] sm:$0xff] }
  0x48   :  { %4117 = vmatmul.mubr.msk.f32.gmra.mrb[34].mxu0 %vm168_vm1, %v137_v40  ;;  %v76_v40 = vld [vmem:[%s6475_s0 + $0x130] sm:$0xff] }
  0x49   :  { %4119 = vmatprep.mubr.msk.f32.mxu0 %vm168_vm1, %v138_v42  ;;  %v78_v42 = vld [vmem:[%s6475_s0 + $0x140] sm:$0xff] }
  0x4c   :  { %4120 = vmatmul.mubr.msk.f32.gmra.mrb[36].mxu0 %vm168_vm1, %v139_v44  ;;  %v80_v44 = vld [vmem:[%s6475_s0 + $0x150] sm:$0xff] }
  0x4d   :  { %4122 = vmatprep.mubr.msk.f32.mxu0 %vm168_vm1, %v140_v46  ;;  %v82_v46 = vld [vmem:[%s6475_s0 + $0x160] sm:$0xff] }
  0x50   :  { %4123 = vmatmul.mubr.msk.f32.gmra.mrb[38].mxu0 %vm168_vm1, %v141_v48  ;;  %v84_v48 = vld [vmem:[%s6475_s0 + $0x170] sm:$0xff] }
  0x51   :  { %4125 = vmatprep.mubr.msk.f32.mxu0 %vm168_vm1, %v142_v50  ;;  %v86_v50 = vld [vmem:[%s6475_s0 + $0x180] sm:$0xff] }
  0x54   :  { %4126 = vmatmul.mubr.msk.f32.gmra.mrb[40].mxu0 %vm168_vm1, %v143_v52  ;;  %v88_v52 = vld [vmem:[%s6475_s0 + $0x190] sm:$0xff] }
  0x55   :  { %4128 = vmatprep.mubr.msk.f32.mxu0 %vm168_vm1, %v144_v54  ;;  %v90_v54 = vld [vmem:[%s6475_s0 + $0x1a0] sm:$0xff] }
  0x58   :  { %4129 = vmatmul.mubr.msk.f32.gmra.mrb[42].mxu0 %vm168_vm1, %v145_v56  ;;  %v92_v56 = vld [vmem:[%s6475_s0 + $0x1b0] sm:$0xff] }
  0x59   :  { %4131 = vmatprep.mubr.msk.f32.mxu0 %vm168_vm1, %v146_v58  ;;  %v94_v58 = vld [vmem:[%s6475_s0 + $0x1c0] sm:$0xff] }
  0x5c   :  { %4132 = vmatmul.mubr.msk.f32.gmra.mrb[44].mxu0 %vm168_vm1, %v147_v60  ;;  %v96_v60 = vld [vmem:[%s6475_s0 + $0x1d0] sm:$0xff] }
  0x5d   :  { %4134 = vmatprep.mubr.msk.f32.mxu0 %vm168_vm1, %v148_v62  ;;  %v98_v62 = vld [vmem:[%s6475_s0 + $0x1e0] sm:$0xff] }
  0x60   :  { %4135 = vmatmul.mubr.msk.f32.gmra.mrb[46].mxu0 %vm168_vm1, %v149_v0  ;;  %v100_v0 = vld [vmem:[%s6475_s0 + $0x1f0] sm:$0xff] }
  0x61   :  { %4163 = vmatprep.mubr.msk.f32.mxu0 %vm750_vm3, %v38_v2 }
  0x64   :  { %4164 = vmatmul.mubr.msk.f32.vlgmr.msra.gmra.mrb[0].mxu0 %vm750_vm3, %v39_v3 }
  0x65   :  { %4166 = vmatprep.mubr.msk.f32.mxu0 %vm750_vm3, %v40_v4 }
  0x68   :  { %4167 = vmatmul.mubr.msk.f32.gmra.mrb[2].mxu0 %vm750_vm3, %v41_v5 }
  0x69   :  { %4169 = vmatprep.mubr.msk.f32.mxu0 %vm750_vm3, %v42_v6 }
  0x6c   :  { %4170 = vmatmul.mubr.msk.f32.gmra.mrb[4].mxu0 %vm750_vm3, %v43_v7 }
  0x6d   :  { %4172 = vmatprep.mubr.msk.f32.mxu0 %vm750_vm3, %v44_v8 }
  0x70   :  { %4173 = vmatmul.mubr.msk.f32.gmra.mrb[6].mxu0 %vm750_vm3, %v45_v9 }
  0x71   :  { %4175 = vmatprep.mubr.msk.f32.mxu0 %vm750_vm3, %v46_v10 }
  0x74   :  { %4176 = vmatmul.mubr.msk.f32.gmra.mrb[8].mxu0 %vm750_vm3, %v47_v11  ;;  %v5266_v11 = vld [vmem:[%s6479_s4] ss:$0 sm:$0xff] }
  0x75   :  { %4178 = vmatprep.mubr.msk.f32.mxu0 %vm750_vm3, %v48_v12 }
  0x78   :  { %4179 = vmatmul.mubr.msk.f32.gmra.mrb[10].mxu0 %vm750_vm3, %v49_v13 }
  0x79   :  { %4181 = vmatprep.mubr.msk.f32.mxu0 %vm750_vm3, %v50_v14 }
  0x7c   :  { %4182 = vmatmul.mubr.msk.f32.gmra.mrb[12].mxu0 %vm750_vm3, %v51_v15 }
  0x7d   :  { %4184 = vmatprep.mubr.msk.f32.mxu0 %vm750_vm3, %v52_v16 }
  0x80   :  { %4185 = vmatmul.mubr.msk.f32.gmra.mrb[14].mxu0 %vm750_vm3, %v53_v17 }
  0x81   :  { %4187 = vmatprep.mubr.msk.f32.mxu0 %vm750_vm3, %v54_v18 }
  0x84   :  { %4188 = vmatmul.mubr.msk.f32.gmra.mrb[16].mxu0 %vm750_vm3, %v55_v19 }
  0x85   :  { %4190 = vmatprep.mubr.msk.f32.mxu0 %vm750_vm3, %v56_v20 }
  0x88   :  { %4191 = vmatmul.mubr.msk.f32.gmra.mrb[18].mxu0 %vm750_vm3, %v57_v21 }
  0x89   :  { %4193 = vmatprep.mubr.msk.f32.mxu0 %vm750_vm3, %v58_v22 }
  0x8c   :  { %4194 = vmatmul.mubr.msk.f32.gmra.mrb[20].mxu0 %vm750_vm3, %v59_v23 }
  0x8d   :  { %4196 = vmatprep.mubr.msk.f32.mxu0 %vm750_vm3, %v60_v24 }
  0x90   :  { %4197 = vmatmul.mubr.msk.f32.gmra.mrb[22].mxu0 %vm750_vm3, %v61_v25 }
  0x91   :  { %4199 = vmatprep.mubr.msk.f32.mxu0 %vm750_vm3, %v62_v26 }
  0x94   :  { %4200 = vmatmul.mubr.msk.f32.gmra.mrb[24].mxu0 %vm750_vm3, %v63_v27 }
  0x95   :  { %4202 = vmatprep.mubr.msk.f32.mxu0 %vm750_vm3, %v64_v28 }
  0x98   :  { %4203 = vmatmul.mubr.msk.f32.gmra.mrb[26].mxu0 %vm750_vm3, %v65_v29 }
  0x99   :  { %4205 = vmatprep.mubr.msk.f32.mxu0 %vm750_vm3, %v66_v30 }
  0x9c   :  { %4206 = vmatmul.mubr.msk.f32.gmra.mrb[28].mxu0 %vm750_vm3, %v67_v31 }
  0x9d   :  { %4208 = vmatprep.mubr.msk.f32.mxu0 %vm750_vm3, %v68_v32 }
  0xa0   :  { %4209 = vmatmul.mubr.msk.f32.gmra.mrb[30].mxu0 %vm750_vm3, %v69_v33 }
  0xa1   :  { %4211 = vmatprep.mubr.msk.f32.mxu0 %vm750_vm3, %v70_v34 }
  0xa4   :  { %4212 = vmatmul.mubr.msk.f32.gmra.mrb[32].mxu0 %vm750_vm3, %v71_v35 }
  0xa5   :  { %4214 = vmatprep.mubr.msk.f32.mxu0 %vm750_vm3, %v72_v36 }
  0xa8   :  { %4215 = vmatmul.mubr.msk.f32.gmra.mrb[34].mxu0 %vm750_vm3, %v73_v37 }
  0xa9   :  { %4217 = vmatprep.mubr.msk.f32.mxu0 %vm750_vm3, %v74_v38 }
  0xac   :  { %4218 = vmatmul.mubr.msk.f32.gmra.mrb[36].mxu0 %vm750_vm3, %v75_v39 }
  0xad   :  { %4220 = vmatprep.mubr.msk.f32.mxu0 %vm750_vm3, %v76_v40 }
  0xb0   :  { %4221 = vmatmul.mubr.msk.f32.gmra.mrb[38].mxu0 %vm750_vm3, %v77_v41 }
  0xb1   :  { %4223 = vmatprep.mubr.msk.f32.mxu0 %vm750_vm3, %v78_v42 }
  0xb4   :  { %4224 = vmatmul.mubr.msk.f32.gmra.mrb[40].mxu0 %vm750_vm3, %v79_v43 }
  0xb5   :  { %4226 = vmatprep.mubr.msk.f32.mxu0 %vm750_vm3, %v80_v44 }
  0xb8   :  { %4227 = vmatmul.mubr.msk.f32.gmra.mrb[42].mxu0 %vm750_vm3, %v81_v45 }
  0xb9   :  { %4229 = vmatprep.mubr.msk.f32.mxu0 %vm750_vm3, %v82_v46 }
  0xbc   :  { %4230 = vmatmul.mubr.msk.f32.gmra.mrb[44].mxu0 %vm750_vm3, %v83_v47 }
  0xbd   :  { %4232 = vmatprep.mubr.msk.f32.mxu0 %vm750_vm3, %v84_v48 }
  0xc0   :  { %4233 = vmatmul.mubr.msk.f32.gmra.mrb[46].mxu0 %vm750_vm3, %v85_v49 }
  0xc1   :  { %4235 = vmatprep.mubr.msk.f32.mxu0 %vm750_vm3, %v86_v50 }
  0xc4   :  { %4236 = vmatmul.mubr.msk.f32.gmra.mrb[48].mxu0 %vm750_vm3, %v87_v51 }
  0xc5   :  { %4238 = vmatprep.mubr.msk.f32.mxu0 %vm750_vm3, %v88_v52 }
  0xc8   :  { %4239 = vmatmul.mubr.msk.f32.gmra.mrb[50].mxu0 %vm750_vm3, %v89_v53 }
  0xc9   :  { %4241 = vmatprep.mubr.msk.f32.mxu0 %vm750_vm3, %v90_v54 }
  0xcc   :  { %4242 = vmatmul.mubr.msk.f32.gmra.mrb[52].mxu0 %vm750_vm3, %v91_v55 }
  0xcd   :  { %4244 = vmatprep.mubr.msk.f32.mxu0 %vm750_vm3, %v92_v56 }
  0xd0   :  { %4245 = vmatmul.mubr.msk.f32.gmra.mrb[54].mxu0 %vm750_vm3, %v93_v57 }
  0xd1   :  { %4247 = vmatprep.mubr.msk.f32.mxu0 %vm750_vm3, %v94_v58 }
  0xd4   :  { %4248 = vmatmul.mubr.msk.f32.gmra.mrb[56].mxu0 %vm750_vm3, %v95_v59 }
  0xd5   :  { %4250 = vmatprep.mubr.msk.f32.mxu0 %vm750_vm3, %v96_v60 }
  0xd8   :  { %4251 = vmatmul.mubr.msk.f32.gmra.mrb[58].mxu0 %vm750_vm3, %v97_v61 }
  0xd9   :  { %4253 = vmatprep.mubr.msk.f32.mxu0 %vm750_vm3, %v98_v62 }
  0xdc   :  { %4254 = vmatmul.mubr.msk.f32.gmra.mrb[60].mxu0 %vm750_vm3, %v99_v63 }
  0xdd   :  { %4256 = vmatprep.mubr.msk.f32.mxu0 %vm750_vm3, %v100_v0 }
  0xe0   :  { %4257 = vmatmul.mubr.msk.f32.gmra.mrb[62].mxu0 %vm750_vm3, %v101_v1 }
  0xe2   :  { %v5245_v2 = vpop.f32.mrb[0].mxu1 }
  0xe3   :  { %v5247_v3 = vpop.f32.mrb[1].mxu1 }
  0xe6   :  { %v5249_v4 = vpop.f32.mrb[2].mxu1 }
  0xe7   :  { %v5251_v5 = vpop.f32.mrb[3].mxu1 }
  0xea   :  { %v5253_v6 = vpop.f32.mrb[4].mxu1 }
  0xeb   :  { %v5255_v7 = vpop.f32.mrb[5].mxu1 }
  0xee   :  { %v5257_v8 = vpop.f32.mrb[6].mxu1 }
  0xef   :  { %v5259_v9 = vpop.f32.mrb[7].mxu1 }
  0xf2   :  { %v5261_v10 = vpop.f32.mrb[8].mxu1 }
  0xf3   :  { %v5268_v13 = vpop.f32.mrb[9].mxu1 }
  0xf6   :  { %v5272_v19 = vpop.f32.mrb[10].mxu1 }
  0xf7   :  { %v5274_v21 = vpop.f32.mrb[11].mxu1 }
  0xfa   :  { %v5278_v27 = vpop.f32.mrb[12].mxu1 }
  0xfb   :  { %v5280_v29 = vpop.f32.mrb[13].mxu1 }
  0xfe   :  { %v5284_v35 = vpop.f32.mrb[14].mxu1 }
  0xff   :  { %v5286_v37 = vpop.f32.mrb[15].mxu1 }
 0x137   :  { %v4165_v12 = vpop.f32.mrb[0].mxu0 }
 0x138   :  { %v1013_v14 = vpop.f32.mrb[1].mxu0  ;;  %v1340_v18 = vadd.f32 %v4165_v12, %v5266_v11 }
 0x139   :  { %v1339_v15 = vadd.f32 %v5266_v11, %v1013_v14 }
 0x13b   :  { %1403 = vxpose.xlu1.b32.start [1/16] (narrow) %v1339_v15, 32  ;;  %v4168_v16 = vpop.f32.mrb[2].mxu0 }
 0x13c   :  { %v1023_v17 = vpop.f32.mrb[3].mxu0  ;;  %v1342_v26 = vadd.f32 %v4168_v16, %v5266_v11 }
 0x13d   :  { %v1341_v23 = vadd.f32 %v5266_v11, %v1023_v17 }
 0x13f   :  { %1404 = vxpose.xlu1.b32.cont [2/16] (narrow) %v1340_v18, 32  ;;  %v4171_v20 = vpop.f32.mrb[4].mxu0 }
 0x140   :  { %v1033_v22 = vpop.f32.mrb[5].mxu0  ;;  %v1344_v34 = vadd.f32 %v4171_v20, %v5266_v11 }
 0x141   :  { %v1343_v31 = vadd.f32 %v5266_v11, %v1033_v22 }
 0x143   :  { %1405 = vxpose.xlu1.b32.cont [3/16] (narrow) %v1341_v23, 32  ;;  %v4174_v24 = vpop.f32.mrb[6].mxu0 }
 0x144   :  { %v1043_v25 = vpop.f32.mrb[7].mxu0  ;;  %v1346_v42 = vadd.f32 %v4174_v24, %v5266_v11 }
 0x145   :  { %v1345_v39 = vadd.f32 %v5266_v11, %v1043_v25 }
 0x147   :  { %1406 = vxpose.xlu1.b32.cont [4/16] (narrow) %v1342_v26, 32  ;;  %v4177_v28 = vpop.f32.mrb[8].mxu0 }
 0x148   :  { %v1053_v30 = vpop.f32.mrb[9].mxu0  ;;  %v1348_v49 = vadd.f32 %v4177_v28, %v5266_v11 }
 0x149   :  { %v1347_v45 = vadd.f32 %v5266_v11, %v1053_v30 }
 0x14b   :  { %1407 = vxpose.xlu1.b32.cont [5/16] (narrow) %v1343_v31, 32  ;;  %v4180_v32 = vpop.f32.mrb[10].mxu0 }
 0x14c   :  { %v1063_v33 = vpop.f32.mrb[11].mxu0  ;;  %v1350_v57 = vadd.f32 %v4180_v32, %v5266_v11 }
 0x14d   :  { %v1349_v53 = vadd.f32 %v5266_v11, %v1063_v33 }
 0x14f   :  { %1408 = vxpose.xlu1.b32.cont [6/16] (narrow) %v1344_v34, 32  ;;  %v4183_v36 = vpop.f32.mrb[12].mxu0 }
 0x150   :  { %v1073_v38 = vpop.f32.mrb[13].mxu0  ;;  %v1352_v1 = vadd.f32 %v4183_v36, %v5266_v11 }
 0x151   :  { %v1351_v61 = vadd.f32 %v5266_v11, %v1073_v38 }
 0x153   :  { %1409 = vxpose.xlu1.b32.cont [7/16] (narrow) %v1345_v39, 32  ;;  %v4186_v40 = vpop.f32.mrb[14].mxu0 }
 0x154   :  { %v1083_v41 = vpop.f32.mrb[15].mxu0  ;;  %v1354_v22 = vadd.f32 %v4186_v40, %v5266_v11 }
 0x155   :  { %v1353_v16 = vadd.f32 %v5266_v11, %v1083_v41 }
 0x157   :  { %1410 = vxpose.xlu1.b32.cont [8/16] (narrow) %v1346_v42, 32  ;;  %v4189_v43 = vpop.f32.mrb[16].mxu0 }
 0x158   :  { %v1093_v44 = vpop.f32.mrb[17].mxu0  ;;  %v1356_v50 = vadd.f32 %v4189_v43, %v5266_v11 }
 0x159   :  { %v1355_v46 = vadd.f32 %v5266_v11, %v1093_v44 }
 0x15b   :  { %1411 = vxpose.xlu1.b32.cont [9/16] (narrow) %v1347_v45, 32  ;;  %1435 = vxpose.xlu0.b32.start [1/16] (narrow) %v1355_v46, 32  ;;  %v4192_v47 = vpop.f32.mrb[18].mxu0 }
 0x15c   :  { %v1103_v48 = vpop.f32.mrb[19].mxu0  ;;  %v1358_v58 = vadd.f32 %v4192_v47, %v5266_v11 }
 0x15d   :  { %v1357_v54 = vadd.f32 %v5266_v11, %v1103_v48 }
 0x15f   :  { %1412 = vxpose.xlu1.b32.cont [10/16] (narrow) %v1348_v49, 32  ;;  %1436 = vxpose.xlu0.b32.cont [2/16] (narrow) %v1356_v50, 32  ;;  %v4195_v51 = vpop.f32.mrb[20].mxu0 }
 0x160   :  { %v1113_v52 = vpop.f32.mrb[21].mxu0  ;;  %v1360_v12 = vadd.f32 %v4195_v51, %v5266_v11 }
 0x161   :  { %v1359_v62 = vadd.f32 %v5266_v11, %v1113_v52 }
 0x163   :  { %1413 = vxpose.xlu1.b32.cont [11/16] (narrow) %v1349_v53, 32  ;;  %1437 = vxpose.xlu0.b32.cont [3/16] (narrow) %v1357_v54, 32  ;;  %v4198_v55 = vpop.f32.mrb[22].mxu0 }
 0x164   :  { %v1123_v56 = vpop.f32.mrb[23].mxu0  ;;  %v1362_v23 = vadd.f32 %v4198_v55, %v5266_v11 }
 0x165   :  { %v1361_v17 = vadd.f32 %v5266_v11, %v1123_v56  ;;  %v4665_v56 = vmov 0.0  }
 0x166   :  { %1892 = vmatprep.mubr.f32.mxu1 %v4665_v56 }
 0x167   :  { %1414 = vxpose.xlu1.b32.cont [12/16] (narrow) %v1350_v57, 32  ;;  %1438 = vxpose.xlu0.b32.cont [4/16] (narrow) %v1358_v58, 32  ;;  %v4201_v59 = vpop.f32.mrb[24].mxu0 }
 0x168   :  { %v1133_v60 = vpop.f32.mrb[25].mxu0  ;;  %v1364_v32 = vadd.f32 %v4201_v59, %v5266_v11 }
 0x169   :  { %v1363_v26 = vadd.f32 %v5266_v11, %v1133_v60 }
 0x16b   :  { %1415 = vxpose.xlu1.b32.cont [13/16] (narrow) %v1351_v61, 32  ;;  %1439 = vxpose.xlu0.b32.cont [5/16] (narrow) %v1359_v62, 32  ;;  %v4204_v63 = vpop.f32.mrb[26].mxu0 }
 0x16c   :  { %v1143_v0 = vpop.f32.mrb[27].mxu0  ;;  %v1366_v42 = vadd.f32 %v4204_v63, %v5266_v11 }
 0x16d   :  { %v1365_v38 = vadd.f32 %v5266_v11, %v1143_v0 }
 0x16f   :  { %1416 = vxpose.xlu1.b32.cont [14/16] (narrow) %v1352_v1, 32  ;;  %1440 = vxpose.xlu0.b32.cont [6/16] (narrow) %v1360_v12, 32  ;;  %v4207_v14 = vpop.f32.mrb[28].mxu0 }
 0x170   :  { %v1153_v15 = vpop.f32.mrb[29].mxu0  ;;  %v1368_v50 = vadd.f32 %v4207_v14, %v5266_v11 }
 0x171   :  { %v1367_v46 = vadd.f32 %v5266_v11, %v1153_v15 }
 0x173   :  { %1417 = vxpose.xlu1.b32.cont [15/16] (narrow) %v1353_v16, 32  ;;  %1441 = vxpose.xlu0.b32.cont [7/16] (narrow) %v1361_v17, 32  ;;  %v4210_v18 = vpop.f32.mrb[30].mxu0 }
 0x174   :  { %v1163_v20 = vpop.f32.mrb[31].mxu0  ;;  %v1370_v59 = vadd.f32 %v4210_v18, %v5266_v11 }
 0x175   :  { %v1369_v54 = vadd.f32 %v5266_v11, %v1163_v20 }
 0x177   :  { %1418 = vxpose.xlu1.b32.end [16/16] (narrow) %v1354_v22, 32  ;;  %1442 = vxpose.xlu0.b32.cont [8/16] (narrow) %v1362_v23, 32  ;;  %v4213_v24 = vpop.f32.mrb[32].mxu0 }
 0x178   :  { %v1173_v25 = vpop.f32.mrb[33].mxu0  ;;  %v1372_v33 = vadd.f32 %v4213_v24, %v5266_v11 }
 0x179   :  { %v1371_v28 = vadd.f32 %v5266_v11, %v1173_v25 }
 0x17b   :  { %1443 = vxpose.xlu0.b32.cont [9/16] (narrow) %v1363_v26, 32  ;;  %1467 = vxpose.xlu1.b32.start [1/16] (narrow) %v1371_v28, 32  ;;  %v4216_v30 = vpop.f32.mrb[34].mxu0 }
 0x17c   :  { %v1183_v31 = vpop.f32.mrb[35].mxu0  ;;  %v1374_v43 = vadd.f32 %v4216_v30, %v5266_v11 }
 0x17d   :  { %v1373_v39 = vadd.f32 %v5266_v11, %v1183_v31 }
 0x17f   :  { %1444 = vxpose.xlu0.b32.cont [10/16] (narrow) %v1364_v32, 32  ;;  %1468 = vxpose.xlu1.b32.cont [2/16] (narrow) %v1372_v33, 32  ;;  %v4219_v34 = vpop.f32.mrb[36].mxu0 }
 0x180   :  { %v1193_v36 = vpop.f32.mrb[37].mxu0  ;;  %v1376_v51 = vadd.f32 %v4219_v34, %v5266_v11 }
 0x181   :  { %v1375_v47 = vadd.f32 %v5266_v11, %v1193_v36 }
 0x183   :  { %1445 = vxpose.xlu0.b32.cont [11/16] (narrow) %v1365_v38, 32  ;;  %1469 = vxpose.xlu1.b32.cont [3/16] (narrow) %v1373_v39, 32  ;;  %v4222_v40 = vpop.f32.mrb[38].mxu0 }
 0x184   :  { %v1203_v41 = vpop.f32.mrb[39].mxu0  ;;  %v1378_v60 = vadd.f32 %v4222_v40, %v5266_v11 }
 0x185   :  { %v1377_v55 = vadd.f32 %v5266_v11, %v1203_v41 }
 0x187   :  { %1446 = vxpose.xlu0.b32.cont [12/16] (narrow) %v1366_v42, 32  ;;  %1470 = vxpose.xlu1.b32.cont [4/16] (narrow) %v1374_v43, 32  ;;  %v4225_v44 = vpop.f32.mrb[40].mxu0 }
 0x188   :  { %v1213_v45 = vpop.f32.mrb[41].mxu0  ;;  %v1380_v17 = vadd.f32 %v4225_v44, %v5266_v11 }
 0x189   :  { %v1379_v0 = vadd.f32 %v5266_v11, %v1213_v45 }
 0x18b   :  { %1447 = vxpose.xlu0.b32.cont [13/16] (narrow) %v1367_v46, 32  ;;  %1471 = vxpose.xlu1.b32.cont [5/16] (narrow) %v1375_v47, 32  ;;  %v4228_v48 = vpop.f32.mrb[42].mxu0 }
 0x18c   :  { %v1223_v49 = vpop.f32.mrb[43].mxu0 }
 0x18f   :  { %1448 = vxpose.xlu0.b32.cont [14/16] (narrow) %v1368_v50, 32  ;;  %1472 = vxpose.xlu1.b32.cont [6/16] (narrow) %v1376_v51, 32  ;;  %v4231_v52 = vpop.f32.mrb[44].mxu0 }
 0x190   :  { %v1233_v53 = vpop.f32.mrb[45].mxu0 }
 0x191   :  { %v1383_v34 = vadd.f32 %v5266_v11, %v1233_v53 }
 0x193   :  { %1449 = vxpose.xlu0.b32.cont [15/16] (narrow) %v1369_v54, 32  ;;  %1473 = vxpose.xlu1.b32.cont [7/16] (narrow) %v1377_v55, 32  ;;  %v5321_v57 = vpop.f32.mrb[46].mxu0 }
 0x194   :  { %v1243_v58 = vpop.f32.mrb[47].mxu0 }
 0x195   :  { %v1385_v44 = vadd.f32 %v5266_v11, %v1243_v58 }
 0x197   :  { %1450 = vxpose.xlu0.b32.end [16/16] (narrow) %v1370_v59, 32  ;;  %1474 = vxpose.xlu1.b32.cont [8/16] (narrow) %v1378_v60, 32  ;;  %v4237_v61 = vpop.f32.mrb[48].mxu0 }
 0x198   :  { %v1259_v62 = vadd.f32 %v4237_v61, %v5245_v2  ;;  %v1253_v63 = vpop.f32.mrb[49].mxu0 }
 0x199   :  { %v1254_v1 = vadd.f32 %v1253_v63, %v5247_v3  ;;  %v1381_v3 = vadd.f32 %v5266_v11, %v1223_v49 }
 0x19a   :  { %v1388_v20 = vadd.f32 %v5266_v11, %v1259_v62 }
 0x19b   :  { %1475 = vxpose.xlu1.b32.cont [9/16] (narrow) %v1379_v0, 32  ;;  %v1387_v12 = vadd.f32 %v5266_v11, %v1254_v1  ;;  %v4240_v14 = vpop.f32.mrb[50].mxu0 }
 0x19c   :  { %v1269_v15 = vadd.f32 %v4240_v14, %v5249_v4  ;;  %v1263_v16 = vpop.f32.mrb[51].mxu0 }
 0x19d   :  { %1499 = vxpose.xlu0.b32.start [1/16] (narrow) %v1387_v12, 32  ;;  %v1264_v18 = vadd.f32 %v1263_v16, %v5251_v5  ;;  %v1382_v5 = vadd.f32 %v4228_v48, %v5266_v11 }
 0x19f   :  { %1476 = vxpose.xlu1.b32.cont [10/16] (narrow) %v1380_v17, 32  ;;  %v4243_v2 = vpop.f32.mrb[52].mxu0  ;;  %v1389_v24 = vadd.f32 %v5266_v11, %v1264_v18 }
 0x1a0   :  { %v1279_v22 = vadd.f32 %v4243_v2, %v5253_v6  ;;  %v1273_v23 = vpop.f32.mrb[53].mxu0  ;;  %v1390_v6 = vadd.f32 %v5266_v11, %v1269_v15 }
 0x1a1   :  { %1500 = vxpose.xlu0.b32.cont [2/16] (narrow) %v1388_v20, 32  ;;  %v1274_v4 = vadd.f32 %v1273_v23, %v5255_v7  ;;  %v4666_v20 = vmov 0  }
 0x1a3   :  { %1477 = vxpose.xlu1.b32.cont [11/16] (narrow) %v1381_v3, 32  ;;  %v4246_v25 = vpop.f32.mrb[54].mxu0  ;;  %v1391_v7 = vadd.f32 %v5266_v11, %v1274_v4  ;;  %v1793_v4 = vld [vmem:[%s6481_s6 + $0x10] sm:$0xff] }
 0x1a4   :  { %v1289_v26 = vadd.f32 %v4246_v25, %v5257_v8  ;;  %v1283_v28 = vpop.f32.mrb[55].mxu0 }
 0x1a5   :  { %1501 = vxpose.xlu0.b32.cont [3/16] (narrow) %v1389_v24, 32  ;;  %v1284_v30 = vadd.f32 %v1283_v28, %v5259_v9  ;;  %v1384_v9 = vadd.f32 %v4231_v52, %v5266_v11  ;;  %v1794_v28 = vld [vmem:[%s6481_s6 + $0x18] sm:$0xff] }
 0x1a7   :  { %1478 = vxpose.xlu1.b32.cont [12/16] (narrow) %v1382_v5, 32  ;;  %v4249_v31 = vpop.f32.mrb[56].mxu0 }
 0x1a8   :  { %v1299_v32 = vadd.f32 %v4249_v31, %v5261_v10  ;;  %v1293_v33 = vpop.f32.mrb[57].mxu0  ;;  %v1392_v10 = vadd.f32 %v5266_v11, %v1279_v22 }
 0x1a9   :  { %1502 = vxpose.xlu0.b32.cont [4/16] (narrow) %v1390_v6, 32  ;;  %v1294_v8 = vadd.f32 %v1293_v33, %v5268_v13  ;;  %v1393_v13 = vadd.f32 %v5266_v11, %v1284_v30 }
 0x1ab   :  { %1479 = vxpose.xlu1.b32.cont [13/16] (narrow) %v1383_v34, 32  ;;  %v4252_v36 = vpop.f32.mrb[58].mxu0  ;;  %v1395_v49 = vadd.f32 %v5266_v11, %v1294_v8  ;;  %v2266_v34 = vld [vmem:[%s6483_s8] sm:$0xff] }
 0x1ac   :  { %v1309_v38 = vadd.f32 %v4252_v36, %v5272_v19  ;;  %v1303_v39 = vpop.f32.mrb[59].mxu0 }
 0x1ad   :  { %1503 = vxpose.xlu0.b32.cont [5/16] (narrow) %v1391_v7, 32  ;;  %v1304_v40 = vadd.f32 %v1303_v39, %v5274_v21  ;;  %v1386_v21 = vadd.f32 %v5321_v57, %v5266_v11 }
 0x1ae   :  { %v1398_v52 = vadd.f32 %v5266_v11, %v1309_v38 }
 0x1af   :  { %1480 = vxpose.xlu1.b32.cont [14/16] (narrow) %v1384_v9, 32  ;;  %v4255_v41 = vpop.f32.mrb[60].mxu0 }
 0x1b0   :  { %v1319_v42 = vadd.f32 %v4255_v41, %v5278_v27  ;;  %v1313_v43 = vpop.f32.mrb[61].mxu0  ;;  %v1394_v27 = vadd.f32 %v5266_v11, %v1289_v26 }
 0x1b1   :  { %1504 = vxpose.xlu0.b32.cont [6/16] (narrow) %v1392_v10, 32  ;;  %v1314_v19 = vadd.f32 %v1313_v43, %v5280_v29  ;;  %v1396_v29 = vadd.f32 %v5266_v11, %v1299_v32 }
 0x1b2   :  { %v1400_v58 = vadd.f32 %v5266_v11, %v1319_v42 }
 0x1b3   :  { %1481 = vxpose.xlu1.b32.cont [15/16] (narrow) %v1385_v44, 32  ;;  %v4258_v45 = vpop.f32.mrb[62].mxu0 }
 0x1b4   :  { %v1329_v46 = vadd.f32 %v4258_v45, %v5284_v35  ;;  %v1323_v47 = vpop.f32.mrb[63].mxu0  ;;  %v1397_v35 = vadd.f32 %v5266_v11, %v1304_v40  ;;  %v2268_v40 = vld [vmem:[%s6483_s8 + $0x10] sm:$0xff] }
 0x1b5   :  { %1505 = vxpose.xlu0.b32.cont [7/16] (narrow) %v1393_v13, 32  ;;  %v1324_v48 = vadd.f32 %v1323_v47, %v5286_v37  ;;  %v1399_v37 = vadd.f32 %v5266_v11, %v1314_v19 }
 0x1b6   :  { %v1402_v0 = vadd.f32 %v5266_v11, %v1329_v46 }
 0x1b7   :  { %1482 = vxpose.xlu1.b32.end [16/16] (narrow) %v1386_v21, 32  ;;  %v1401_v60 = vadd.f32 %v5266_v11, %v1324_v48  ;;  %v1792_v11 = vld [vmem:[%s6481_s6 + $0x8] sm:$0xff] }
 0x1b9   :  { %1506 = vxpose.xlu0.b32.cont [8/16] (narrow) %v1394_v27, 32 }
 0x1bb   :  { %v5359_v50 = vpop.trf.xlu1 }
 0x1bc   :  { %v5373_v55 = vmul.f32 100.0, %v5359_v50 }
 0x1bd   :  { %1507 = vxpose.xlu0.b32.cont [9/16] (narrow) %v1395_v49, 32 }
 0x1be   :  { %v1547_v61 = vmin.f32 %v5373_v55, 20.0  ;;  %vm1755_vm6 = vcmp.gt.f32.partialorder %v5373_v55, 20.0 }
 0x1bf   :  { %v5363_v51 = vpop.trf.xlu1 }
 0x1c0   :  { %v5370_v54 = vmul.f32 100.0, %v5363_v51  ;;  %v1563_v1 = vmul.f32 1.442695, %v1547_v61 }
 0x1c1   :  { %1508 = vxpose.xlu0.b32.cont [10/16] (narrow) %v1396_v29, 32 }
 0x1c2   :  { %v1551_v57 = vmin.f32 %v5370_v54, 20.0  ;;  %vm1759_vm7 = vcmp.gt.f32.partialorder %v5370_v54, 20.0 }
 0x1c3   :  { %v5367_v53 = vpop.trf.xlu1 }
 0x1c4   :  { %v1571_v62 = vmul.f32 1.442695, %v1551_v57  ;;  %v5386_v12 = vmul.f32 100.0, %v5367_v53 }
 0x1c5   :  { %1509 = vxpose.xlu0.b32.cont [11/16] (narrow) %v1397_v35, 32 }
 0x1c6   :  { %4473 = vpow2.f32 %v1571_v62  ;;  %v1555_v15 = vmin.f32 %v5386_v12, 20.0  ;;  %vm1763_vm1 = vcmp.gt.f32.partialorder %v5386_v12, 20.0 }
 0x1c7   :  { %v5377_v59 = vpop.trf.xlu1  ;;  %4475 = vpow2.f32 %v1563_v1 }
 0x1c8   :  { %v5382_v63 = vmul.f32 100.0, %v5377_v59  ;;  %v1579_v22 = vmul.f32 1.442695, %v1555_v15 }
 0x1c9   :  { %1510 = vxpose.xlu0.b32.cont [12/16] (narrow) %v1398_v52, 32 }
 0x1ca   :  { %v1559_v14 = vmin.f32 %v5382_v63, 20.0  ;;  %vm1767_vm15 = vcmp.gt.f32.partialorder %v5382_v63, 20.0 }
 0x1cc   :  { %v1587_v16 = vmul.f32 1.442695, %v1559_v14 }
 0x1cd   :  { %1511 = vxpose.xlu0.b32.cont [13/16] (narrow) %v1399_v37, 32 }
 0x1ce   :  { %4477 = vpow2.f32 %v1587_v16 }
 0x1d0   :  { %v4474_v25 = vpop.eup %4473 }
 0x1d1   :  { %1512 = vxpose.xlu0.b32.cont [14/16] (narrow) %v1400_v58, 32  ;;  %v1631_v30 = vadd.f32 1.0, %v4474_v25  ;;  %v4476_v32 = vpop.eup %4475  ;;  %v1634_v44 = vmul.f32 -0.5, %v4474_v25  ;;  %v1637_v27 = vand.u32 2147483647, %v4474_v25 }
 0x1d2   :  { %v1595_v8 = vadd.f32 1.0, %v4476_v32  ;;  %v1598_v45 = vmul.f32 -0.5, %v4476_v32  ;;  %v1601_v29 = vand.u32 2147483647, %v4476_v32 }
 0x1d3   :  { %v1635_v47 = vadd.f32 1.0, %v1634_v44  ;;  %vm5440_vm4 = vcmp.lt.f32.partialorder %v1637_v27, 0.0004427343 }
 0x1d4   :  { %v1599_v52 = vadd.f32 1.0, %v1598_v45  ;;  %vm5444_vm5 = vcmp.lt.f32.partialorder %v1601_v29, 0.0004427343 }
 0x1d5   :  { %1513 = vxpose.xlu0.b32.cont [15/16] (narrow) %v1401_v60, 32  ;;  %4472 = vset.pattern.permute.xlu1 %v4666_v20  ;;  %v1636_v57 = vmul.f32 %v4474_v25, %v1635_v47 }
 0x1d6   :  { %1802 = vperm.xlu1 %4472, %v1792_v11   ;;  %v1600_v11 = vmul.f32 %v4476_v32, %v1599_v52 }
 0x1d8   :  { %v5426_v39 = vpop.eup %4477 }
 0x1d9   :  { %1514 = vxpose.xlu0.b32.end [16/16] (narrow) %v1402_v0, 32  ;;  %v1703_v41 = vadd.f32 1.0, %v5426_v39  ;;  %v1706_v58 = vmul.f32 -0.5, %v5426_v39 }
 0x1da   :  { %1807 = vperm.xlu1 %4472, %v1793_v4  }
 0x1db   :  { %v5390_v17 = vpop.trf.xlu0 }
 0x1dc   :  { %v5393_v18 = vmul.f32 100.0, %v5390_v17 }
 0x1de   :  { %v1548_v2 = vmin.f32 %v5393_v18, 20.0  ;;  %1812 = vperm.xlu1 %4472, %v1794_v28   ;;  %v1707_v28 = vadd.f32 1.0, %v1706_v58  ;;  %vm1756_vm12 = vcmp.gt.f32.partialorder %v5393_v18, 20.0 }
 0x1df   :  { %v5400_v23 = vpop.trf.xlu0 }
 0x1e0   :  { %v1565_v3 = vmul.f32 1.442695, %v1548_v2  ;;  %v5403_v24 = vmul.f32 100.0, %v5400_v23  ;;  %v1708_v47 = vmul.f32 %v5426_v39, %v1707_v28 }
 0x1e2   :  { %4479 = vpow2.f32 %v1565_v3  ;;  %v1552_v26 = vmin.f32 %v5403_v24, 20.0  ;;  %2272 = vperm.xlu1 %4472, %v2266_v34   ;;  %v1709_v3 = vand.u32 2147483647, %v5426_v39  ;;  %v1791_v39 = vld [vmem:[%s6481_s6] sm:$0xff]  ;;  %vm1760_vm13 = vcmp.gt.f32.partialorder %v5403_v24, 20.0 }
 0x1e3   :  { %4481 = vpow2.f32 %v1579_v22  ;;  %v5412_v5 = vpop.trf.xlu0 }
 0x1e4   :  { %v1573_v6 = vmul.f32 1.442695, %v1552_v26  ;;  %v5415_v31 = vmul.f32 100.0, %v5412_v5  ;;  %vm5467_vm10 = vcmp.lt.f32.partialorder %v1709_v3, 0.0004427343 }
 0x1e6   :  { %4483 = vpow2.f32 %v1573_v6  ;;  %v1556_v33 = vmin.f32 %v5415_v31, 20.0  ;;  %2282 = vperm.xlu1 %4472, %v2268_v40   ;;  %vm1764_vm2 = vcmp.gt.f32.partialorder %v5415_v31, 20.0 }
 0x1e7   :  { %v5421_v7 = vpop.trf.xlu0  ;;  %4485 = vlog2.f32 %v1631_v30 }
 0x1e8   :  { %v1581_v36 = vmul.f32 1.442695, %v1556_v33  ;;  %v5424_v38 = vmul.f32 100.0, %v5421_v7 }
 0x1ea   :  { %4487 = vpow2.f32 %v1581_v36  ;;  %v1560_v9 = vmin.f32 %v5424_v38, 20.0  ;;  %vm1768_vm3 = vcmp.gt.f32.partialorder %v5424_v38, 20.0 }
 0x1eb   :  { %4489 = vlog2.f32 %v1595_v8 }
 0x1ec   :  { %v4480_v10 = vpop.eup %4479  ;;  %v1589_v42 = vmul.f32 1.442695, %v1560_v9 }
 0x1ed   :  { %v5433_v43 = vpop.eup %4481  ;;  %v1604_v13 = vadd.f32 1.0, %v4480_v10  ;;  %v1607_v49 = vmul.f32 -0.5, %v4480_v10  ;;  %v1610_v15 = vand.u32 2147483647, %v4480_v10 }
 0x1ee   :  { %4491 = vpow2.f32 %v1589_v42  ;;  %v1667_v46 = vadd.f32 1.0, %v5433_v43  ;;  %v1670_v2 = vmul.f32 -0.5, %v5433_v43  ;;  %v1673_v22 = vand.u32 2147483647, %v5433_v43  ;;  %v5558_v42 = vld [vmem:[%s6480_s5 + $0x10] sm:$0xff] }
 0x1ef   :  { %4493 = vlog2.f32 %v1604_v13  ;;  %v1608_v0 = vadd.f32 1.0, %v1607_v49  ;;  %vm5459_vm8 = vcmp.lt.f32.partialorder %v1610_v15, 0.0004427343 }
 0x1f0   :  { %v4484_v19 = vpop.eup %4483  ;;  %4495 = vlog2.f32 %v1703_v41  ;;  %v1671_v40 = vadd.f32 1.0, %v1670_v2  ;;  %vm5463_vm9 = vcmp.lt.f32.partialorder %v1673_v22, 0.0004427343 }
 0x1f1   :  { %v1640_v21 = vadd.f32 1.0, %v4484_v19  ;;  %v4486_v48 = vpop.eup %4485  ;;  %v1643_v1 = vmul.f32 -0.5, %v4484_v19  ;;  %v1609_v34 = vmul.f32 %v4480_v10, %v1608_v0  ;;  %v1646_v9 = vand.u32 2147483647, %v4484_v19 }
 0x1f2   :  { %v1633_v37 = vmul.f32 0.6931472, %v4486_v48  ;;  %v1672_v58 = vmul.f32 %v5433_v43, %v1671_v40 }
 0x1f3   :  { %4497 = vlog2.f32 %v1640_v21  ;;  %v1644_v32 = vadd.f32 1.0, %v1643_v1  ;;  %vm1647_vm11 = vcmp.lt.f32.partialorder %v1646_v9, 0.0004427343 }
 0x1f4   :  { %v5436_v35 = vpop.eup %4487  ;;  %4499 = vlog2.f32 %v1667_v46  ;;  %v1639_v26 = vsel %vm5440_vm4, %v1636_v57, %v1633_v37  ;;  %vm1815_vm4 = vcmask 261120  }
 0x1f5   :  { %v1676_v60 = vadd.f32 1.0, %v5436_v35  ;;  %v4490_v61 = vpop.eup %4489  ;;  %v1679_v8 = vmul.f32 -0.5, %v5436_v35  ;;  %v1743_v45 = vmul.f32 0.01, %v1639_v26  ;;  %v1645_v27 = vmul.f32 %v4484_v19, %v1644_v32 }
 0x1f6   :  { %v1597_v25 = vmul.f32 0.6931472, %v4490_v61  ;;  %v1682_v37 = vand.u32 2147483647, %v5436_v35 }
 0x1f7   :  { %4501 = vlog2.f32 %v1676_v60  ;;  %v1680_v49 = vadd.f32 1.0, %v1679_v8  ;;  %v1775_v62 = vsel %vm1759_vm7, %v5363_v51, %v1743_v45  ;;  %v5570_v45 = vld [vmem:[%s6480_s5 + $0x18] sm:$0xff] }
 0x1f8   :  { %v5448_v16 = vpop.eup %4491  ;;  %v1603_v13 = vsel %vm5444_vm5, %v1600_v11, %v1597_v25  ;;  %vm5495_vm14 = vcmp.lt.f32.partialorder %v1682_v37, 0.0004427343 }
 0x1f9   :  { %v4494_v4 = vpop.eup %4493  ;;  %v1712_v30 = vadd.f32 1.0, %v5448_v16  ;;  %v1715_v29 = vmul.f32 -0.5, %v5448_v16  ;;  %v1739_v57 = vmul.f32 0.01, %v1603_v13  ;;  %v1681_v14 = vmul.f32 %v5436_v35, %v1680_v49 }
 0x1fa   :  { %v4496_v6 = vpop.eup %4495  ;;  %v1606_v33 = vmul.f32 0.6931472, %v4494_v4  ;;  %v1718_v51 = vand.u32 2147483647, %v5448_v16 }
 0x1fb   :  { %4503 = vlog2.f32 %v1712_v30  ;;  %v1705_v46 = vmul.f32 0.6931472, %v4496_v6  ;;  %v5480_v61 = vpop.trf.xlu1  ;;  %v1716_v15 = vadd.f32 1.0, %v1715_v29  ;;  %v1771_v24 = vsel %vm1755_vm6, %v5359_v50, %v1739_v57  ;;  %v2269_v6 = vld [vmem:[%s6483_s8 + $0x18] sm:$0xff] }
 0x1fc   :  { %v1612_v10 = vsel %vm5459_vm8, %v1609_v34, %v1606_v33  ;;  %vm1719_vm0 = vcmp.lt.f32.partialorder %v1718_v51, 0.0004427343 }
 0x1fd   :  { %v4498_v44 = vpop.eup %4497  ;;  %v1740_v52 = vmul.f32 0.01, %v1612_v10  ;;  %v1711_v43 = vsel %vm5467_vm10, %v1708_v47, %v1705_v46  ;;  %v1717_v26 = vmul.f32 %v5448_v16, %v1716_v15 }
 0x1fe   :  { %v4500_v21 = vpop.eup %4499  ;;  %v1642_v48 = vmul.f32 0.6931472, %v4498_v44  ;;  %v1751_v4 = vmul.f32 0.01, %v1711_v43 }
 0x1ff   :  { %v1669_v0 = vmul.f32 0.6931472, %v4500_v21  ;;  %v1772_v11 = vsel %vm1756_vm12, %v5390_v17, %v1740_v52  ;;  %v2267_v17 = vld [vmem:[%s6483_s8 + $0x8] sm:$0xff]  ;;  %v5511_v55 = vpop.trf.xlu1 }
 0x200   :  { %v1648_v60 = vsel %vm1647_vm11, %v1645_v27, %v1642_v48  ;;  %v1783_v16 = vsel %vm1767_vm15, %v5377_v59, %v1751_v4  ;;  %v5527_v12 = vmul.f32 100.0, %v5511_v55  ;;  %v5532_v59 = vld [vmem:[%s6480_s5] sm:$0xff] }
 0x201   :  { %v4502_v19 = vpop.eup %4501  ;;  %v1744_v1 = vmul.f32 0.01, %v1648_v60  ;;  %v1675_v3 = vsel %vm5463_vm9, %v1672_v58, %v1669_v0 }
 0x202   :  { %v1678_v18 = vmul.f32 0.6931472, %v4502_v19  ;;  %4471 = vset.pattern.permute.xlu0 %v4666_v20  ;;  %v1747_v28 = vmul.f32 0.01, %v1675_v3  ;;  %vm1761_vm8 = vcmp.gt.f32.partialorder %v5527_v12, 20.0 }
 0x203   :  { %v1776_v2 = vsel %vm1760_vm13, %v5400_v23, %v1744_v1  ;;  %1797 = vperm.xlu0 %4471, %v1791_v39   ;;  %v4365_v23 = vpack.c.bf16 %v1775_v62, %v1771_v24  ;;  %v5524_v36 = vpop.trf.xlu1 }
 0x204   :  { %v4363_v22 = vpack.c.bf16 %v1776_v2, %v1772_v11  ;;  %v1684_v35 = vsel %vm5495_vm14, %v1681_v14, %v1678_v18  ;;  %v1779_v32 = vsel %vm1763_vm1, %v5367_v53, %v1747_v28  ;;  %v1553_v53 = vmin.f32 %v5527_v12, 20.0 }
 0x205   :  { %v4504_v20 = vpop.eup %4503  ;;  %v1748_v50 = vmul.f32 0.01, %v1684_v35  ;;  %v4369_v9 = vpack.c.bf16 %v1783_v16, %v1779_v32  ;;  %v5561_v44 = vmul.f32 100.0, %v5524_v36 }
 0x206   :  { %v1714_v25 = vmul.f32 0.6931472, %v4504_v20  ;;  %4364 = vmatprep.subr.bf16.mxu1 %v4363_v22  ;;  %v1575_v40 = vmul.f32 1.442695, %v1553_v53 }
 0x207   :  { %4366 = vmatpush1.bf16.msra.mxu1 %v4365_v23  ;;  %2277 = vperm.xlu0 %4471, %v2267_v17   ;;  %v1780_v63 = vsel %vm1764_vm2, %v5412_v5, %v1748_v50  ;;  %v5535_v5 = vmul.f32 100.0, %v5480_v61  ;;  %v5540_v31 = vpop.trf.xlu1  ;;  %v1557_v46 = vmin.f32 %v5561_v44, 20.0  ;;  %vm1765_vm2 = vcmp.gt.f32.partialorder %v5561_v44, 20.0 }
 0x208   :  { %v1720_v30 = vsel %vm1719_vm0, %v1717_v26, %v1714_v25  ;;  %v5550_v41 = vmul.f32 100.0, %v5540_v31  ;;  %4505 = vpow2.f32 %v1575_v40 }
 0x209   :  { %v1752_v33 = vmul.f32 0.01, %v1720_v30  ;;  %v1549_v38 = vmin.f32 %v5535_v5, 20.0  ;;  %v1583_v49 = vmul.f32 1.442695, %v1557_v46  ;;  %vm1757_vm7 = vcmp.gt.f32.partialorder %v5535_v5, 20.0 }
 0x20a   :  { %v1561_v13 = vmin.f32 %v5550_v41, 20.0  ;;  %vm1769_vm0 = vcmp.gt.f32.partialorder %v5550_v41, 20.0 }
 0x20b   :  { %v1784_v34 = vsel %vm1768_vm3, %v5421_v7, %v1752_v33  ;;  %2287 = vperm.xlu0 %4471, %v2269_v6   ;;  %v5546_v7 = vld [vmem:[%s6480_s5 + $0x8] sm:$0xff]  ;;  %v1567_v10 = vmul.f32 1.442695, %v1549_v38 }
 0x20c   :  { %v4367_v8 = vpack.c.bf16 %v1784_v34, %v1780_v63  ;;  %v1591_v47 = vmul.f32 1.442695, %v1561_v13 }
 0x20d   :  { %4507 = vpow2.f32 %v1567_v10 }
 0x20e   :  { %4368 = vmatprep.subr.bf16.mxu1 %v4367_v8  ;;  %4509 = vpow2.f32 %v1591_v47 }
 0x20f   :  { %4370 = vmatpush1.bf16.msra.mxu1 %v4369_v9 }
 0x212   :  { %3784 = vmatmul.mubr.msk.f32.vlgmr.msra.gmra.mrb[16].mxu1 %vm1815_vm4, %v5532_v59  ;;  %v4506_v57 = vpop.eup %4505 }
 0x213   :  { %1898 = vmatprep.mubr.f32.mxu1 %v4665_v56  ;;  %v1649_v39 = vadd.f32 1.0, %v4506_v57  ;;  %v1652_v35 = vmul.f32 -0.5, %v4506_v57  ;;  %v1655_v50 = vand.u32 2147483647, %v4506_v57 }
 0x215   :  { %v1653_v4 = vadd.f32 1.0, %v1652_v35  ;;  %vm5610_vm5 = vcmp.lt.f32.partialorder %v1655_v50, 0.0004427343 }
 0x216   :  { %3785 = vmatmul.mubr.msk.f32.gmra.mrb[18].mxu1 %vm1815_vm4, %v5546_v7 }
 0x217   :  { %1904 = vmatprep.mubr.f32.mxu1 %v4665_v56  ;;  %v4508_v0 = vpop.eup %4507  ;;  %v1654_v63 = vmul.f32 %v4506_v57, %v1653_v4 }
 0x218   :  { %v1613_v18 = vadd.f32 1.0, %v4508_v0  ;;  %v5599_v11 = vpop.eup %4509  ;;  %v1616_v23 = vmul.f32 -0.5, %v4508_v0  ;;  %v1619_v30 = vand.u32 2147483647, %v4508_v0 }
 0x219   :  { %v1721_v51 = vadd.f32 1.0, %v5599_v11  ;;  %v1724_v34 = vmul.f32 -0.5, %v5599_v11 }
 0x21a   :  { %3786 = vmatmul.mubr.msk.f32.gmra.mrb[20].mxu1 %vm1815_vm4, %v5558_v42  ;;  %v1617_v33 = vadd.f32 1.0, %v1616_v23  ;;  %vm5614_vm6 = vcmp.lt.f32.partialorder %v1619_v30, 0.0004427343 }
 0x21b   :  { %1910 = vmatprep.mubr.f32.mxu1 %v4665_v56 }
 0x21c   :  { %v1618_v46 = vmul.f32 %v4508_v0, %v1617_v33 }
 0x21d   :  { %v5573_v21 = vpop.trf.xlu0 }
 0x21e   :  { %v5576_v48 = vmul.f32 100.0, %v5573_v21  ;;  %3787 = vmatmul.mubr.msk.f32.gmra.mrb[22].mxu1 %vm1815_vm4, %v5570_v45 }
 0x21f   :  { %1981 = vmatprep.mubr.f32.mxu1 %v4665_v56 }
 0x220   :  { %v1550_v27 = vmin.f32 %v5576_v48, 20.0  ;;  %vm1758_vm13 = vcmp.gt.f32.partialorder %v5576_v48, 20.0 }
 0x221   :  { %v5582_v29 = vpop.trf.xlu0 }
 0x222   :  { %v1569_v52 = vmul.f32 1.442695, %v1550_v27  ;;  %v5585_v37 = vmul.f32 100.0, %v5582_v29 }
 0x224   :  { %4511 = vpow2.f32 %v1569_v52  ;;  %v1554_v58 = vmin.f32 %v5585_v37, 20.0  ;;  %vm1762_vm14 = vcmp.gt.f32.partialorder %v5585_v37, 20.0 }
 0x225   :  { %4513 = vpow2.f32 %v1583_v49  ;;  %v5588_v60 = vpop.trf.xlu0  ;;  %v1727_v49 = vand.u32 2147483647, %v5599_v11 }
 0x226   :  { %v1577_v19 = vmul.f32 1.442695, %v1554_v58  ;;  %v5591_v62 = vmul.f32 100.0, %v5588_v60 }
 0x227   :  { %vm5637_vm11 = vcmp.lt.f32.partialorder %v1727_v49, 0.0004427343 }
 0x228   :  { %4515 = vpow2.f32 %v1577_v19  ;;  %v1558_v1 = vmin.f32 %v5591_v62, 20.0  ;;  %vm1766_vm3 = vcmp.gt.f32.partialorder %v5591_v62, 20.0 }
 0x229   :  { %v5594_v43 = vpop.trf.xlu0  ;;  %4517 = vlog2.f32 %v1649_v39  ;;  %v1725_v39 = vadd.f32 1.0, %v1724_v34 }
 0x22a   :  { %v1585_v14 = vmul.f32 1.442695, %v1558_v1  ;;  %v5597_v15 = vmul.f32 100.0, %v5594_v43 }
 0x22b   :  { %v1726_v50 = vmul.f32 %v5599_v11, %v1725_v39 }
 0x22c   :  { %4519 = vpow2.f32 %v1585_v14  ;;  %v1562_v2 = vmin.f32 %v5597_v15, 20.0 }
 0x22d   :  { %4521 = vlog2.f32 %v1613_v18 }
 0x22e   :  { %v4512_v54 = vpop.eup %4511  ;;  %v1593_v24 = vmul.f32 1.442695, %v1562_v2 }
 0x22f   :  { %v5603_v22 = vpop.eup %4513  ;;  %v1622_v17 = vadd.f32 1.0, %v4512_v54  ;;  %v1625_v28 = vmul.f32 -0.5, %v4512_v54  ;;  %v1628_v10 = vand.u32 2147483647, %v4512_v54 }
 0x230   :  { %4523 = vpow2.f32 %v1593_v24  ;;  %v1685_v3 = vadd.f32 1.0, %v5603_v22  ;;  %v1688_v47 = vmul.f32 -0.5, %v5603_v22  ;;  %v1691_v27 = vand.u32 2147483647, %v5603_v22 }
 0x231   :  { %4525 = vlog2.f32 %v1622_v17  ;;  %v1626_v53 = vadd.f32 1.0, %v1625_v28  ;;  %vm5629_vm9 = vcmp.lt.f32.partialorder %v1628_v10, 0.0004427343 }
 0x232   :  { %v4516_v20 = vpop.eup %4515  ;;  %4527 = vlog2.f32 %v1721_v51  ;;  %v1689_v35 = vadd.f32 1.0, %v1688_v47  ;;  %vm5633_vm10 = vcmp.lt.f32.partialorder %v1691_v27, 0.0004427343 }
 0x233   :  { %v1658_v25 = vadd.f32 1.0, %v4516_v20  ;;  %v4518_v26 = vpop.eup %4517  ;;  %v1661_v38 = vmul.f32 -0.5, %v4516_v20  ;;  %v1627_v14 = vmul.f32 %v4512_v54, %v1626_v53  ;;  %v1664_v24 = vand.u32 2147483647, %v4516_v20 }
 0x234   :  { %v1651_v16 = vmul.f32 0.6931472, %v4518_v26  ;;  %v1690_v9 = vmul.f32 %v5603_v22, %v1689_v35 }
 0x235   :  { %4529 = vlog2.f32 %v1658_v25  ;;  %v1662_v0 = vadd.f32 1.0, %v1661_v38  ;;  %vm1665_vm12 = vcmp.lt.f32.partialorder %v1664_v24, 0.0004427343 }
 0x236   :  { %v5606_v6 = vpop.eup %4519  ;;  %4531 = vlog2.f32 %v1685_v3  ;;  %v1657_v58 = vsel %vm5610_vm5, %v1654_v63, %v1651_v16  ;;  %vm1770_vm5 = vcmp.gt.f32.partialorder %v5597_v15, 20.0 }
 0x237   :  { %v1694_v32 = vadd.f32 1.0, %v5606_v6  ;;  %v4522_v8 = vpop.eup %4521  ;;  %v1697_v2 = vmul.f32 -0.5, %v5606_v6  ;;  %v1745_v25 = vmul.f32 0.01, %v1657_v58  ;;  %v1663_v33 = vmul.f32 %v4516_v20, %v1662_v0 }
 0x238   :  { %v1615_v57 = vmul.f32 0.6931472, %v4522_v8 }
 0x239   :  { %4533 = vlog2.f32 %v1694_v32  ;;  %v1698_v16 = vadd.f32 1.0, %v1697_v2  ;;  %v1700_v32 = vand.u32 2147483647, %v5606_v6  ;;  %v1777_v11 = vsel %vm1761_vm8, %v5511_v55, %v1745_v25 }
 0x23a   :  { %v5618_v13 = vpop.eup %4523  ;;  %v1621_v4 = vsel %vm5614_vm6, %v1618_v46, %v1615_v57 }
 0x23b   :  { %v4526_v52 = vpop.eup %4525  ;;  %v1730_v19 = vadd.f32 1.0, %v5618_v13  ;;  %v1733_v63 = vmul.f32 -0.5, %v5618_v13  ;;  %v1741_v8 = vmul.f32 0.01, %v1621_v4  ;;  %v1699_v47 = vmul.f32 %v5606_v6, %v1698_v16 }
 0x23c   :  { %v4528_v1 = vpop.eup %4527  ;;  %v1624_v18 = vmul.f32 0.6931472, %v4526_v52  ;;  %vm1701_vm15 = vcmp.lt.f32.partialorder %v1700_v32, 0.0004427343  ;;  %v1736_v49 = vand.u32 2147483647, %v5618_v13 }
 0x23d   :  { %4535 = vlog2.f32 %v1730_v19  ;;  %v1723_v26 = vmul.f32 0.6931472, %v4528_v1  ;;  %v1734_v27 = vadd.f32 1.0, %v1733_v63  ;;  %v1773_v55 = vsel %vm1757_vm7, %v5480_v61, %v1741_v8 }
 0x23e   :  { %v1630_v54 = vsel %vm5629_vm9, %v1627_v14, %v1624_v18  ;;  %v4373_v57 = vpack.c.bf16 %v1777_v11, %v1773_v55  ;;  %vm1737_vm1 = vcmp.lt.f32.partialorder %v1736_v49, 0.0004427343 }
 0x23f   :  { %v4530_v3 = vpop.eup %4529  ;;  %v1742_v34 = vmul.f32 0.01, %v1630_v54  ;;  %v1729_v10 = vsel %vm5637_vm11, %v1726_v50, %v1723_v26 }
 0x240   :  { %v4532_v28 = vpop.eup %4531  ;;  %v1660_v30 = vmul.f32 0.6931472, %v4530_v3  ;;  %v1753_v6 = vmul.f32 0.01, %v1729_v10 }
 0x241   :  { %v1687_v40 = vmul.f32 0.6931472, %v4532_v28  ;;  %v1774_v22 = vsel %vm1758_vm13, %v5573_v21, %v1742_v34  ;;  %v1735_v21 = vmul.f32 %v5618_v13, %v1734_v27 }
 0x242   :  { %v1666_v53 = vsel %vm1665_vm12, %v1663_v33, %v1660_v30  ;;  %v1785_v1 = vsel %vm1769_vm0, %v5540_v31, %v1753_v6 }
 0x243   :  { %v4534_v38 = vpop.eup %4533  ;;  %v1746_v20 = vmul.f32 0.01, %v1666_v53  ;;  %v1693_v58 = vsel %vm5633_vm10, %v1690_v9, %v1687_v40 }
 0x244   :  { %v1696_v46 = vmul.f32 0.6931472, %v4534_v38  ;;  %v1749_v19 = vmul.f32 0.01, %v1693_v58 }
 0x245   :  { %v1778_v48 = vsel %vm1762_vm14, %v5582_v29, %v1746_v20 }
 0x246   :  { %v4371_v12 = vpack.c.bf16 %v1778_v48, %v1774_v22  ;;  %v1702_v37 = vsel %vm1701_vm15, %v1699_v47, %v1696_v46  ;;  %v1781_v41 = vsel %vm1765_vm2, %v5524_v36, %v1749_v19 }
 0x247   :  { %v4536_v52 = vpop.eup %4535  ;;  %v1750_v29 = vmul.f32 0.01, %v1702_v37  ;;  %v4377_v0 = vpack.c.bf16 %v1785_v1, %v1781_v41 }
 0x248   :  { %v1732_v39 = vmul.f32 0.6931472, %v4536_v52  ;;  %4372 = vmatprep.subr.bf16.mxu1 %v4371_v12 }
 0x249   :  { %4374 = vmatpush1.bf16.msra.mxu1 %v4373_v57  ;;  %v1782_v18 = vsel %vm1766_vm3, %v5588_v60, %v1750_v29 }
 0x24a   :  { %v1738_v5 = vsel %vm1737_vm1, %v1735_v21, %v1732_v39 }
 0x24b   :  { %v1754_v61 = vmul.f32 0.01, %v1738_v5 }
 0x24d   :  { %v1786_v13 = vsel %vm1770_vm5, %v5594_v43, %v1754_v61 }
 0x24e   :  { %v4375_v14 = vpack.c.bf16 %v1786_v13, %v1782_v18 }
 0x250   :  { %4376 = vmatprep.subr.bf16.mxu1 %v4375_v14 }
 0x251   :  { %4378 = vmatpush1.bf16.msra.mxu1 %v4377_v0 }
 0x254   :  { %3788 = vmatmul.mubr.msk.f32.vlgmr.msra.gmra.mrb[24].mxu1 %vm1815_vm4, %v5532_v59 }
 0x255   :  { %1987 = vmatprep.mubr.f32.mxu1 %v4665_v56  ;;  %v5688_v31 = vpop.permute.xlu1 %1802 }
 0x258   :  { %3789 = vmatmul.mubr.msk.f32.gmra.mrb[26].mxu1 %vm1815_vm4, %v5546_v7 }
 0x259   :  { %1993 = vmatprep.mubr.f32.mxu1 %v4665_v56  ;;  %v5710_v35 = vpop.permute.xlu1 %1807 }
 0x25c   :  { %3790 = vmatmul.mubr.msk.f32.gmra.mrb[28].mxu1 %vm1815_vm4, %v5558_v42 }
 0x25d   :  { %1999 = vmatprep.mubr.f32.mxu1 %v4665_v56  ;;  %v5732_v8 = vpop.permute.xlu1 %1812 }
 0x260   :  { %3791 = vmatmul.mubr.msk.f32.gmra.mrb[30].mxu1 %vm1815_vm4, %v5570_v45 }
 0x261   :  { %2366 = vmatprep.mubr.f32.mxu1 %v4665_v56 }
 0x282   :  { %v5686_v36 = vpop.permute.xlu0 %1797 }
 0x2e5   :  { %v1894_v59 = vpop.f32.mrb[16].mxu1 }
 0x2e6   :  { %v5691_v44 = vadd.f32 %v1894_v59, %v5686_v36  ;;  %v1896_v7 = vpop.f32.mrb[17].mxu1 }
 0x2e7   :  { %v5694_v60 = vadd.f32 %v1896_v7, %v5686_v36 }
 0x2e8   :  { %v5697_v42 = vmul.f32 100.0, %v5691_v44 }
 0x2e9   :  { %v5700_v62 = vmul.f32 100.0, %v5694_v60  ;;  %v1900_v45 = vpop.f32.mrb[18].mxu1 }
 0x2ea   :  { %v2022_v43 = vmin.f32 %v5697_v42, 20.0  ;;  %v5704_v15 = vadd.f32 %v1900_v45, %v5688_v31  ;;  %v1902_v2 = vpop.f32.mrb[19].mxu1  ;;  %vm2230_vm8 = vcmp.gt.f32.partialorder %v5697_v42, 20.0 }
 0x2eb   :  { %v2023_v51 = vmin.f32 %v5700_v62, 20.0  ;;  %v5708_v24 = vadd.f32 %v1902_v2, %v5688_v31  ;;  %vm2231_vm10 = vcmp.gt.f32.partialorder %v5700_v62, 20.0 }
 0x2ec   :  { %v2038_v17 = vmul.f32 1.442695, %v2022_v43  ;;  %v5713_v23 = vmul.f32 100.0, %v5704_v15 }
 0x2ed   :  { %v2040_v54 = vmul.f32 1.442695, %v2023_v51  ;;  %v5716_v3 = vmul.f32 100.0, %v5708_v24  ;;  %v1906_v4 = vpop.f32.mrb[20].mxu1 }
 0x2ee   :  { %4537 = vpow2.f32 %v2038_v17  ;;  %v2026_v25 = vmin.f32 %v5713_v23, 20.0  ;;  %v5720_v26 = vadd.f32 %v1906_v4, %v5710_v35  ;;  %v1908_v50 = vpop.f32.mrb[21].mxu1  ;;  %vm2234_vm9 = vcmp.gt.f32.partialorder %v5713_v23, 20.0 }
 0x2ef   :  { %4539 = vpow2.f32 %v2040_v54  ;;  %v2027_v28 = vmin.f32 %v5716_v3, 20.0  ;;  %v5724_v30 = vadd.f32 %v1908_v50, %v5710_v35  ;;  %vm2235_vm11 = vcmp.gt.f32.partialorder %v5716_v3, 20.0 }
 0x2f0   :  { %v2046_v33 = vmul.f32 1.442695, %v2026_v25  ;;  %v5727_v16 = vmul.f32 100.0, %v5720_v26 }
 0x2f1   :  { %v2048_v63 = vmul.f32 1.442695, %v2027_v28  ;;  %v5730_v34 = vmul.f32 100.0, %v5724_v30  ;;  %v1912_v32 = vpop.f32.mrb[22].mxu1 }
 0x2f2   :  { %4541 = vpow2.f32 %v2046_v33  ;;  %v2030_v9 = vmin.f32 %v5727_v16, 20.0  ;;  %v5736_v53 = vadd.f32 %v1912_v32, %v5732_v8  ;;  %v1914_v38 = vpop.f32.mrb[23].mxu1  ;;  %vm2238_vm2 = vcmp.gt.f32.partialorder %v5727_v16, 20.0  ;;  %v5825_v16 = vld [vmem:[%s6482_s7] sm:$0xff] }
 0x2f3   :  { %4543 = vpow2.f32 %v2048_v63  ;;  %v2031_v11 = vmin.f32 %v5730_v34, 20.0  ;;  %v5740_v40 = vadd.f32 %v1914_v38, %v5732_v8  ;;  %vm2239_vm5 = vcmp.gt.f32.partialorder %v5730_v34, 20.0 }
 0x2f4   :  { %v2054_v20 = vmul.f32 1.442695, %v2030_v9  ;;  %v5743_v10 = vmul.f32 100.0, %v5736_v53 }
 0x2f5   :  { %v2056_v46 = vmul.f32 1.442695, %v2031_v11  ;;  %v5746_v47 = vmul.f32 100.0, %v5740_v40 }
 0x2f6   :  { %4545 = vpow2.f32 %v2054_v20  ;;  %v2034_v27 = vmin.f32 %v5743_v10, 20.0  ;;  %vm2242_vm3 = vcmp.gt.f32.partialorder %v5743_v10, 20.0  ;;  %v5852_v10 = vld [vmem:[%s6482_s7 + $0x18] sm:$0xff] }
 0x2f7   :  { %4547 = vpow2.f32 %v2056_v46  ;;  %v2035_v22 = vmin.f32 %v5746_v47, 20.0 }
 0x2f8   :  { %v4538_v48 = vpop.eup %4537  ;;  %v2062_v49 = vmul.f32 1.442695, %v2034_v27 }
 0x2f9   :  { %v4540_v55 = vpop.eup %4539  ;;  %v2064_v12 = vmul.f32 1.442695, %v2035_v22  ;;  %v2070_v37 = vadd.f32 1.0, %v4538_v48  ;;  %v2073_v6 = vmul.f32 -0.5, %v4538_v48  ;;  %v2076_v61 = vand.u32 2147483647, %v4538_v48 }
 0x2fa   :  { %4549 = vpow2.f32 %v2062_v49  ;;  %v2079_v52 = vadd.f32 1.0, %v4540_v55  ;;  %v2082_v21 = vmul.f32 -0.5, %v4540_v55  ;;  %v2085_v5 = vand.u32 2147483647, %v4540_v55 }
 0x2fb   :  { %4551 = vpow2.f32 %v2064_v12  ;;  %v2074_v18 = vadd.f32 1.0, %v2073_v6  ;;  %vm5756_vm7 = vcmp.lt.f32.partialorder %v2076_v61, 0.0004427343 }
 0x2fc   :  { %v4542_v57 = vpop.eup %4541  ;;  %4553 = vlog2.f32 %v2079_v52  ;;  %v2083_v14 = vadd.f32 1.0, %v2082_v21  ;;  %vm5752_vm6 = vcmp.lt.f32.partialorder %v2085_v5, 0.0004427343 }
 0x2fd   :  { %v4544_v58 = vpop.eup %4543  ;;  %4555 = vlog2.f32 %v2070_v37  ;;  %v2106_v39 = vadd.f32 1.0, %v4542_v57  ;;  %v2109_v13 = vmul.f32 -0.5, %v4542_v57  ;;  %v2075_v54 = vmul.f32 %v4538_v48, %v2074_v18 }
 0x2fe   :  { %v2115_v29 = vadd.f32 1.0, %v4544_v58  ;;  %v2118_v59 = vmul.f32 -0.5, %v4544_v58  ;;  %v2121_v7 = vand.u32 2147483647, %v4544_v58  ;;  %v2112_v25 = vand.u32 2147483647, %v4542_v57 }
 0x2ff   :  { %4557 = vlog2.f32 %v2106_v39  ;;  %v2110_v4 = vadd.f32 1.0, %v2109_v13  ;;  %v2084_v33 = vmul.f32 %v4540_v55, %v2083_v14 }
 0x300   :  { %v4546_v19 = vpop.eup %4545  ;;  %4559 = vlog2.f32 %v2115_v29  ;;  %v2119_v20 = vadd.f32 1.0, %v2118_v59  ;;  %vm5768_vm12 = vcmp.lt.f32.partialorder %v2121_v7, 0.0004427343  ;;  %vm5774_vm13 = vcmp.lt.f32.partialorder %v2112_v25, 0.0004427343 }
 0x301   :  { %v4548_v1 = vpop.eup %4547  ;;  %v2142_v41 = vadd.f32 1.0, %v4546_v19  ;;  %v2145_v51 = vmul.f32 -0.5, %v4546_v19  ;;  %v2148_v48 = vand.u32 2147483647, %v4546_v19  ;;  %v2111_v12 = vmul.f32 %v4542_v57, %v2110_v4 }
 0x302   :  { %v2151_v0 = vadd.f32 1.0, %v4548_v1  ;;  %v2154_v63 = vmul.f32 -0.5, %v4548_v1  ;;  %v2157_v32 = vand.u32 2147483647, %v4548_v1  ;;  %v2120_v18 = vmul.f32 %v4544_v58, %v2119_v20 }
 0x303   :  { %4561 = vlog2.f32 %v2142_v41  ;;  %v2146_v22 = vadd.f32 1.0, %v2145_v51  ;;  %vm5788_vm15 = vcmp.lt.f32.partialorder %v2148_v48, 0.0004427343 }
 0x304   :  { %v5750_v45 = vpop.eup %4549  ;;  %4563 = vlog2.f32 %v2151_v0  ;;  %v2155_v29 = vadd.f32 1.0, %v2154_v63  ;;  %vm5781_vm14 = vcmp.lt.f32.partialorder %v2157_v32, 0.0004427343 }
 0x305   :  { %v5760_v17 = vpop.eup %4551  ;;  %v2178_v50 = vadd.f32 1.0, %v5750_v45  ;;  %v2181_v52 = vmul.f32 -0.5, %v5750_v45  ;;  %v2147_v0 = vmul.f32 %v4546_v19, %v2146_v22 }
 0x306   :  { %v4554_v28 = vpop.eup %4553  ;;  %v2187_v9 = vadd.f32 1.0, %v5760_v17  ;;  %v2190_v57 = vmul.f32 -0.5, %v5760_v17  ;;  %v2193_v51 = vand.u32 2147483647, %v5760_v17  ;;  %v2156_v25 = vmul.f32 %v4548_v1, %v2155_v29 }
 0x307   :  { %v4556_v38 = vpop.eup %4555  ;;  %v2081_v11 = vmul.f32 0.6931472, %v4554_v28  ;;  %4565 = vlog2.f32 %v2178_v50  ;;  %v2182_v58 = vadd.f32 1.0, %v2181_v52  ;;  %v2184_v28 = vand.u32 2147483647, %v5750_v45 }
 0x308   :  { %v2072_v27 = vmul.f32 0.6931472, %v4556_v38  ;;  %4567 = vlog2.f32 %v2187_v9  ;;  %v2191_v32 = vadd.f32 1.0, %v2190_v57  ;;  %vm2194_vm1 = vcmp.lt.f32.partialorder %v2193_v51, 0.0004427343 }
 0x309   :  { %v4558_v49 = vpop.eup %4557  ;;  %v2087_v55 = vsel %vm5752_vm6, %v2084_v33, %v2081_v11  ;;  %v2183_v46 = vmul.f32 %v5750_v45, %v2182_v58  ;;  %vm2185_vm0 = vcmp.lt.f32.partialorder %v2184_v28, 0.0004427343  ;;  %vm2243_vm6 = vcmp.gt.f32.partialorder %v5746_v47, 20.0 }
 0x30a   :  { %v4560_v6 = vpop.eup %4559  ;;  %v2078_v39 = vsel %vm5756_vm7, %v2075_v54, %v2072_v27  ;;  %v2108_v21 = vmul.f32 0.6931472, %v4558_v49  ;;  %v2215_v41 = vmul.f32 0.01, %v2087_v55 }
 0x30b   :  { %v2117_v61 = vmul.f32 0.6931472, %v4560_v6  ;;  %v2214_v13 = vmul.f32 0.01, %v2078_v39 }
 0x30c   :  { %v2114_v14 = vsel %vm5774_vm13, %v2111_v12, %v2108_v21  ;;  %v2247_v9 = vsel %vm2231_vm10, %v5694_v60, %v2215_v41  ;;  %v2192_v60 = vmul.f32 %v5760_v17, %v2191_v32 }
 0x30d   :  { %v4562_v7 = vpop.eup %4561  ;;  %v2123_v43 = vsel %vm5768_vm12, %v2120_v18, %v2117_v61  ;;  %v2218_v2 = vmul.f32 0.01, %v2114_v14  ;;  %v2246_v19 = vsel %vm2230_vm8, %v5691_v44, %v2214_v13 }
 0x30e   :  { %v4564_v54 = vpop.eup %4563  ;;  %v2219_v4 = vmul.f32 0.01, %v2123_v43  ;;  %v2144_v50 = vmul.f32 0.6931472, %v4562_v7 }
 0x30f   :  { %v2250_v33 = vsel %vm2234_vm9, %v5704_v15, %v2218_v2  ;;  %v2153_v63 = vmul.f32 0.6931472, %v4564_v54 }
 0x310   :  { %v2251_v1 = vsel %vm2235_vm11, %v5708_v24, %v2219_v4  ;;  %v4381_v38 = vpack.c.bf16 %v2250_v33, %v2246_v19  ;;  %v2150_v11 = vsel %vm5788_vm15, %v2147_v0, %v2144_v50 }
 0x311   :  { %v4566_v42 = vpop.eup %4565  ;;  %v4379_v44 = vpack.c.bf16 %v2251_v1, %v2247_v9  ;;  %v2159_v23 = vsel %vm5781_vm14, %v2156_v25, %v2153_v63  ;;  %v2222_v3 = vmul.f32 0.01, %v2150_v11 }
 0x312   :  { %v4568_v15 = vpop.eup %4567  ;;  %v2180_v20 = vmul.f32 0.6931472, %v4566_v42  ;;  %v2223_v24 = vmul.f32 0.01, %v2159_v23 }
 0x313   :  { %4380 = vmatprep.subr.bf16.mxu1 %v4379_v44  ;;  %v2189_v62 = vmul.f32 0.6931472, %v4568_v15  ;;  %v2254_v45 = vsel %vm2238_vm2, %v5720_v26, %v2222_v3  ;;  %v5833_v26 = vld [vmem:[%s6482_s7 + $0x8] sm:$0xff] }
 0x314   :  { %4382 = vmatpush1.bf16.msra.mxu1 %v4381_v38  ;;  %v2186_v27 = vsel %vm2185_vm0, %v2183_v46, %v2180_v20  ;;  %v2255_v55 = vsel %vm2239_vm5, %v5724_v30, %v2223_v24  ;;  %v5841_v30 = vld [vmem:[%s6482_s7 + $0x10] sm:$0xff] }
 0x315   :  { %v2195_v22 = vsel %vm2194_vm1, %v2192_v60, %v2189_v62  ;;  %v2226_v48 = vmul.f32 0.01, %v2186_v27 }
 0x316   :  { %v2227_v49 = vmul.f32 0.01, %v2195_v22 }
 0x317   :  { %v2258_v17 = vsel %vm2242_vm3, %v5736_v53, %v2226_v48 }
 0x318   :  { %v2259_v12 = vsel %vm2243_vm6, %v5740_v40, %v2227_v49  ;;  %v4385_v37 = vpack.c.bf16 %v2258_v17, %v2254_v45 }
 0x319   :  { %v4383_v52 = vpack.c.bf16 %v2259_v12, %v2255_v55 }
 0x31b   :  { %4384 = vmatprep.subr.bf16.mxu1 %v4383_v52 }
 0x31c   :  { %4386 = vmatpush1.bf16.msra.mxu1 %v4385_v37 }
 0x31f   :  { %3792 = vmatmul.mubr.msk.f32.vlgmr.msra.gmra.mrb[32].mxu1 %vm1815_vm4, %v5825_v16 }
 0x320   :  { %2372 = vmatprep.mubr.f32.mxu1 %v4665_v56 }
 0x323   :  { %3793 = vmatmul.mubr.msk.f32.gmra.mrb[34].mxu1 %vm1815_vm4, %v5833_v26 }
 0x324   :  { %2378 = vmatprep.mubr.f32.mxu1 %v4665_v56 }
 0x327   :  { %v1983_v34 = vpop.f32.mrb[24].mxu1  ;;  %3794 = vmatmul.mubr.msk.f32.gmra.mrb[36].mxu1 %vm1815_vm4, %v5841_v30 }
 0x328   :  { %v5846_v53 = vadd.f32 %v1983_v34, %v5686_v36  ;;  %v1985_v40 = vpop.f32.mrb[25].mxu1  ;;  %2384 = vmatprep.mubr.f32.mxu1 %v4665_v56 }
 0x329   :  { %v5855_v47 = vadd.f32 %v1985_v40, %v5686_v36 }
 0x32a   :  { %v5858_v6 = vmul.f32 100.0, %v5846_v53 }
 0x32b   :  { %v5861_v39 = vmul.f32 100.0, %v5855_v47  ;;  %v1989_v21 = vpop.f32.mrb[26].mxu1  ;;  %3795 = vmatmul.mubr.msk.f32.gmra.mrb[38].mxu1 %vm1815_vm4, %v5852_v10 }
 0x32c   :  { %v2024_v29 = vmin.f32 %v5858_v6, 20.0  ;;  %v5867_v5 = vadd.f32 %v1989_v21, %v5688_v31  ;;  %v1991_v61 = vpop.f32.mrb[27].mxu1  ;;  %2455 = vmatprep.mubr.f32.mxu1 %v4665_v56  ;;  %vm2232_vm8 = vcmp.gt.f32.partialorder %v5858_v6, 20.0 }
 0x32d   :  { %v2025_v36 = vmin.f32 %v5861_v39, 20.0  ;;  %v5872_v18 = vadd.f32 %v1991_v61, %v5688_v31  ;;  %vm2233_vm10 = vcmp.gt.f32.partialorder %v5861_v39, 20.0 }
 0x32e   :  { %v2042_v13 = vmul.f32 1.442695, %v2024_v29  ;;  %v5875_v57 = vmul.f32 100.0, %v5867_v5 }
 0x32f   :  { %v2044_v41 = vmul.f32 1.442695, %v2025_v36  ;;  %v5878_v14 = vmul.f32 100.0, %v5872_v18  ;;  %v1995_v0 = vpop.f32.mrb[28].mxu1 }
 0x330   :  { %4569 = vpow2.f32 %v2042_v13  ;;  %v2028_v59 = vmin.f32 %v5875_v57, 20.0  ;;  %v5882_v7 = vadd.f32 %v1995_v0, %v5710_v35  ;;  %v1997_v43 = vpop.f32.mrb[29].mxu1  ;;  %vm2236_vm9 = vcmp.gt.f32.partialorder %v5875_v57, 20.0 }
 0x331   :  { %4571 = vpow2.f32 %v2044_v41  ;;  %v2029_v31 = vmin.f32 %v5878_v14, 20.0  ;;  %v5886_v2 = vadd.f32 %v1997_v43, %v5710_v35  ;;  %vm2237_vm11 = vcmp.gt.f32.partialorder %v5878_v14, 20.0 }
 0x332   :  { %v2050_v51 = vmul.f32 1.442695, %v2028_v59  ;;  %v5889_v58 = vmul.f32 100.0, %v5882_v7 }
 0x333   :  { %v2052_v54 = vmul.f32 1.442695, %v2029_v31  ;;  %v5892_v4 = vmul.f32 100.0, %v5886_v2  ;;  %v2001_v25 = vpop.f32.mrb[30].mxu1 }
 0x334   :  { %4573 = vpow2.f32 %v2050_v51  ;;  %v2032_v50 = vmin.f32 %v5889_v58, 20.0  ;;  %v5896_v28 = vadd.f32 %v2001_v25, %v5732_v8  ;;  %v2003_v19 = vpop.f32.mrb[31].mxu1  ;;  %vm2240_vm3 = vcmp.gt.f32.partialorder %v5889_v58, 20.0 }
 0x335   :  { %4575 = vpow2.f32 %v2052_v54  ;;  %v2033_v35 = vmin.f32 %v5892_v4, 20.0  ;;  %v5900_v33 = vadd.f32 %v2003_v19, %v5732_v8  ;;  %vm2241_vm6 = vcmp.gt.f32.partialorder %v5892_v4, 20.0 }
 0x336   :  { %v2058_v63 = vmul.f32 1.442695, %v2032_v50  ;;  %v5903_v32 = vmul.f32 100.0, %v5896_v28 }
 0x337   :  { %v2060_v9 = vmul.f32 1.442695, %v2033_v35  ;;  %v5906_v1 = vmul.f32 100.0, %v5900_v33 }
 0x338   :  { %4577 = vpow2.f32 %v2058_v63  ;;  %v2036_v38 = vmin.f32 %v5903_v32, 20.0  ;;  %vm2244_vm5 = vcmp.gt.f32.partialorder %v5903_v32, 20.0 }
 0x339   :  { %4579 = vpow2.f32 %v2060_v9  ;;  %v2037_v11 = vmin.f32 %v5906_v1, 20.0 }
 0x33a   :  { %v4570_v42 = vpop.eup %4569  ;;  %v2066_v44 = vmul.f32 1.442695, %v2036_v38 }
 0x33b   :  { %v4572_v23 = vpop.eup %4571  ;;  %v2088_v15 = vadd.f32 1.0, %v4570_v42  ;;  %v2068_v8 = vmul.f32 1.442695, %v2037_v11  ;;  %v2091_v3 = vmul.f32 -0.5, %v4570_v42  ;;  %v2094_v45 = vand.u32 2147483647, %v4570_v42 }
 0x33c   :  { %4581 = vpow2.f32 %v2066_v44  ;;  %v2097_v20 = vadd.f32 1.0, %v4572_v23  ;;  %v2100_v27 = vmul.f32 -0.5, %v4572_v23  ;;  %v2103_v34 = vand.u32 2147483647, %v4572_v23 }
 0x33d   :  { %4583 = vlog2.f32 %v2088_v15  ;;  %v2092_v12 = vadd.f32 1.0, %v2091_v3  ;;  %vm5915_vm7 = vcmp.lt.f32.partialorder %v2094_v45, 0.0004427343 }
 0x33e   :  { %v4574_v46 = vpop.eup %4573  ;;  %4585 = vpow2.f32 %v2068_v8  ;;  %v2101_v52 = vadd.f32 1.0, %v2100_v27  ;;  %vm5927_vm12 = vcmp.lt.f32.partialorder %v2103_v34, 0.0004427343 }
 0x33f   :  { %v4576_v62 = vpop.eup %4575  ;;  %v2124_v60 = vadd.f32 1.0, %v4574_v46  ;;  %4587 = vlog2.f32 %v2097_v20  ;;  %v2127_v48 = vmul.f32 -0.5, %v4574_v46  ;;  %v2130_v29 = vand.u32 2147483647, %v4574_v46 }
 0x340   :  { %v2133_v24 = vadd.f32 1.0, %v4576_v62  ;;  %v2136_v55 = vmul.f32 -0.5, %v4576_v62  ;;  %v2093_v31 = vmul.f32 %v4570_v42, %v2092_v12  ;;  %v2139_v51 = vand.u32 2147483647, %v4576_v62 }
 0x341   :  { %4589 = vlog2.f32 %v2124_v60  ;;  %v2128_v21 = vadd.f32 1.0, %v2127_v48  ;;  %v2102_v25 = vmul.f32 %v4572_v23, %v2101_v52  ;;  %vm5934_vm13 = vcmp.lt.f32.partialorder %v2130_v29, 0.0004427343 }
 0x342   :  { %v4578_v22 = vpop.eup %4577  ;;  %4591 = vlog2.f32 %v2133_v24  ;;  %v2137_v0 = vadd.f32 1.0, %v2136_v55  ;;  %vm5939_vm14 = vcmp.lt.f32.partialorder %v2139_v51, 0.0004427343 }
 0x343   :  { %v5910_v49 = vpop.eup %4579  ;;  %v2160_v17 = vadd.f32 1.0, %v4578_v22  ;;  %v2163_v13 = vmul.f32 -0.5, %v4578_v22  ;;  %v2129_v9 = vmul.f32 %v4574_v46, %v2128_v21  ;;  %v2166_v11 = vand.u32 2147483647, %v4578_v22 }
 0x344   :  { %v2169_v37 = vadd.f32 1.0, %v5910_v49  ;;  %v2172_v54 = vmul.f32 -0.5, %v5910_v49  ;;  %v2138_v23 = vmul.f32 %v4576_v62, %v2137_v0  ;;  %v2175_v12 = vand.u32 2147483647, %v5910_v49 }
 0x345   :  { %4593 = vlog2.f32 %v2160_v17  ;;  %v2164_v44 = vadd.f32 1.0, %v2163_v13  ;;  %vm5948_vm15 = vcmp.lt.f32.partialorder %v2166_v11, 0.0004427343 }
 0x346   :  { %v5913_v40 = vpop.eup %4581  ;;  %4595 = vlog2.f32 %v2169_v37  ;;  %v2173_v24 = vadd.f32 1.0, %v2172_v54  ;;  %vm2176_vm0 = vcmp.lt.f32.partialorder %v2175_v12, 0.0004427343 }
 0x347   :  { %v4584_v61 = vpop.eup %4583  ;;  %v2196_v41 = vadd.f32 1.0, %v5913_v40  ;;  %v2199_v60 = vmul.f32 -0.5, %v5913_v40  ;;  %v2165_v34 = vmul.f32 %v4578_v22, %v2164_v44  ;;  %v2202_v21 = vand.u32 2147483647, %v5913_v40 }
 0x348   :  { %v5920_v59 = vpop.eup %4585  ;;  %v2090_v43 = vmul.f32 0.6931472, %v4584_v61  ;;  %v2174_v0 = vmul.f32 %v5910_v49, %v2173_v24 }
 0x349   :  { %4597 = vlog2.f32 %v2196_v41  ;;  %v2205_v19 = vadd.f32 1.0, %v5920_v59  ;;  %v4588_v35 = vpop.eup %4587  ;;  %v2208_v45 = vmul.f32 -0.5, %v5920_v59  ;;  %v2200_v13 = vadd.f32 1.0, %v2199_v60 }
 0x34a   :  { %v2096_v63 = vsel %vm5915_vm7, %v2093_v31, %v2090_v43  ;;  %v2099_v15 = vmul.f32 0.6931472, %v4588_v35  ;;  %v2211_v57 = vand.u32 2147483647, %v5920_v59  ;;  %vm2203_vm1 = vcmp.lt.f32.partialorder %v2202_v21, 0.0004427343 }
 0x34b   :  { %v4590_v42 = vpop.eup %4589  ;;  %4599 = vlog2.f32 %v2205_v19  ;;  %v2216_v46 = vmul.f32 0.01, %v2096_v63  ;;  %v2209_v51 = vadd.f32 1.0, %v2208_v45  ;;  %v2201_v19 = vmul.f32 %v5913_v40, %v2200_v13 }
 0x34c   :  { %v4592_v8 = vpop.eup %4591  ;;  %v2126_v20 = vmul.f32 0.6931472, %v4590_v42  ;;  %v2105_v27 = vsel %vm5927_vm12, %v2102_v25, %v2099_v15  ;;  %vm2212_vm2 = vcmp.lt.f32.partialorder %v2211_v57, 0.0004427343  ;;  %vm2245_vm7 = vcmp.gt.f32.partialorder %v5906_v1, 20.0 }
 0x34d   :  { %v2135_v48 = vmul.f32 0.6931472, %v4592_v8  ;;  %v2217_v55 = vmul.f32 0.01, %v2105_v27  ;;  %v2248_v43 = vsel %vm2232_vm8, %v5846_v53, %v2216_v46  ;;  %v2210_v39 = vmul.f32 %v5920_v59, %v2209_v51 }
 0x34e   :  { %v2132_v62 = vsel %vm5934_vm13, %v2129_v9, %v2126_v20 }
 0x34f   :  { %v4594_v37 = vpop.eup %4593  ;;  %v2220_v52 = vmul.f32 0.01, %v2132_v62  ;;  %v2141_v29 = vsel %vm5939_vm14, %v2138_v23, %v2135_v48  ;;  %v2249_v50 = vsel %vm2233_vm10, %v5855_v47, %v2217_v55 }
 0x350   :  { %v4596_v61 = vpop.eup %4595  ;;  %v2162_v36 = vmul.f32 0.6931472, %v4594_v37  ;;  %v2221_v41 = vmul.f32 0.01, %v2141_v29 }
 0x351   :  { %v2252_v31 = vsel %vm2236_vm9, %v5867_v5, %v2220_v52  ;;  %v2171_v22 = vmul.f32 0.6931472, %v4596_v61 }
 0x352   :  { %v4389_v54 = vpack.c.bf16 %v2252_v31, %v2248_v43  ;;  %v2168_v25 = vsel %vm5948_vm15, %v2165_v34, %v2162_v36  ;;  %v2253_v49 = vsel %vm2237_vm11, %v5872_v18, %v2221_v41 }
 0x353   :  { %v4598_v6 = vpop.eup %4597  ;;  %v4387_v53 = vpack.c.bf16 %v2253_v49, %v2249_v50  ;;  %v2177_v35 = vsel %vm2176_vm0, %v2174_v0, %v2171_v22  ;;  %v2224_v9 = vmul.f32 0.01, %v2168_v25 }
 0x354   :  { %v2198_v5 = vmul.f32 0.6931472, %v4598_v6  ;;  %v2225_v18 = vmul.f32 0.01, %v2177_v35 }
 0x355   :  { %v4600_v63 = vpop.eup %4599  ;;  %4388 = vmatprep.subr.bf16.mxu1 %v4387_v53  ;;  %v2256_v40 = vsel %vm2240_vm3, %v5882_v7, %v2224_v9  ;;  %v5993_v7 = vpop.permute.xlu1 %2272 }
 0x356   :  { %v2204_v38 = vsel %vm2203_vm1, %v2201_v19, %v2198_v5  ;;  %4390 = vmatpush1.bf16.msra.mxu1 %v4389_v54  ;;  %v2207_v47 = vmul.f32 0.6931472, %v4600_v63  ;;  %v2257_v59 = vsel %vm2241_vm6, %v5886_v2, %v2225_v18 }
 0x357   :  { %v2228_v14 = vmul.f32 0.01, %v2204_v38 }
 0x358   :  { %v2213_v11 = vsel %vm2212_vm2, %v2210_v39, %v2207_v47 }
 0x359   :  { %v2260_v42 = vsel %vm2244_vm5, %v5896_v28, %v2228_v14  ;;  %v2229_v44 = vmul.f32 0.01, %v2213_v11  ;;  %v6004_v28 = vpop.permute.xlu0 %2277  ;;  %v6020_v24 = vpop.permute.xlu1 %2282 }
 0x35a   :  { %v4393_v15 = vpack.c.bf16 %v2260_v42, %v2256_v40 }
 0x35b   :  { %v2261_v23 = vsel %vm2245_vm7, %v5900_v33, %v2229_v44 }
 0x35c   :  { %v4391_v8 = vpack.c.bf16 %v2261_v23, %v2257_v59 }
 0x35d   :  { %v6036_v34 = vpop.permute.xlu0 %2287 }
 0x35e   :  { %4392 = vmatprep.subr.bf16.mxu1 %v4391_v8 }
 0x35f   :  { %4394 = vmatpush1.bf16.msra.mxu1 %v4393_v15 }
 0x362   :  { %3796 = vmatmul.mubr.msk.f32.vlgmr.msra.gmra.mrb[40].mxu1 %vm1815_vm4, %v5825_v16 }
 0x363   :  { %2461 = vmatprep.mubr.f32.mxu1 %v4665_v56 }
 0x366   :  { %3797 = vmatmul.mubr.msk.f32.gmra.mrb[42].mxu1 %vm1815_vm4, %v5833_v26 }
 0x367   :  { %2467 = vmatprep.mubr.f32.mxu1 %v4665_v56 }
 0x36a   :  { %3798 = vmatmul.mubr.msk.f32.gmra.mrb[44].mxu1 %vm1815_vm4, %v5841_v30 }
 0x36b   :  { %2473 = vmatprep.mubr.f32.mxu1 %v4665_v56 }
 0x36e   :  { %3799 = vmatmul.mubr.msk.f32.gmra.mrb[46].mxu1 %vm1815_vm4, %v5852_v10 }
 0x3f2   :  { %v2368_v2 = vpop.f32.mrb[32].mxu1 }
 0x3f3   :  { %v5996_v16 = vadd.f32 %v2368_v2, %v5993_v7  ;;  %v2370_v58 = vpop.f32.mrb[33].mxu1 }
 0x3f4   :  { %v5999_v4 = vadd.f32 %v2370_v58, %v5993_v7 }
 0x3f5   :  { %v6002_v26 = vmul.f32 100.0, %v5996_v16 }
 0x3f6   :  { %v6007_v56 = vmul.f32 100.0, %v5999_v4  ;;  %v2374_v30 = vpop.f32.mrb[34].mxu1 }
 0x3f7   :  { %v2496_v10 = vmin.f32 %v6002_v26, 20.0  ;;  %v6011_v33 = vadd.f32 %v2374_v30, %v6004_v28  ;;  %v2376_v32 = vpop.f32.mrb[35].mxu1  ;;  %vm2704_vm8 = vcmp.gt.f32.partialorder %v6002_v26, 20.0 }
 0x3f8   :  { %v2497_v1 = vmin.f32 %v6007_v56, 20.0  ;;  %v6015_v20 = vadd.f32 %v2376_v32, %v6004_v28  ;;  %vm2705_vm10 = vcmp.gt.f32.partialorder %v6007_v56, 20.0 }
 0x3f9   :  { %v2512_v60 = vmul.f32 1.442695, %v2496_v10  ;;  %v6018_v3 = vmul.f32 100.0, %v6011_v33 }
 0x3fa   :  { %v2514_v46 = vmul.f32 1.442695, %v2497_v1  ;;  %v6023_v27 = vmul.f32 100.0, %v6015_v20  ;;  %v2380_v48 = vpop.f32.mrb[36].mxu1 }
 0x3fb   :  { %4601 = vpow2.f32 %v2512_v60  ;;  %v2500_v45 = vmin.f32 %v6018_v3, 20.0  ;;  %v6027_v62 = vadd.f32 %v2380_v48, %v6020_v24  ;;  %v2382_v17 = vpop.f32.mrb[37].mxu1  ;;  %vm2708_vm13 = vcmp.gt.f32.partialorder %v6018_v3, 20.0 }
 0x3fc   :  { %4603 = vpow2.f32 %v2514_v46  ;;  %v2501_v55 = vmin.f32 %v6023_v27, 20.0  ;;  %v6031_v12 = vadd.f32 %v2382_v17, %v6020_v24  ;;  %vm2709_vm15 = vcmp.gt.f32.partialorder %v6023_v27, 20.0 }
 0x3fd   :  { %v2520_v37 = vmul.f32 1.442695, %v2500_v45  ;;  %v6034_v52 = vmul.f32 100.0, %v6027_v62 }
 0x3fe   :  { %v2522_v21 = vmul.f32 1.442695, %v2501_v55  ;;  %v6039_v29 = vmul.f32 100.0, %v6031_v12  ;;  %v2386_v61 = vpop.f32.mrb[38].mxu1 }
 0x3ff   :  { %4605 = vpow2.f32 %v2520_v37  ;;  %v2504_v36 = vmin.f32 %v6034_v52, 20.0  ;;  %v6043_v13 = vadd.f32 %v2386_v61, %v6036_v34  ;;  %v2388_v41 = vpop.f32.mrb[39].mxu1  ;;  %vm2712_vm2 = vcmp.gt.f32.partialorder %v6034_v52, 20.0 }
 0x400   :  { %4607 = vpow2.f32 %v2522_v21  ;;  %v2505_v0 = vmin.f32 %v6039_v29, 20.0  ;;  %v6047_v43 = vadd.f32 %v2388_v41, %v6036_v34  ;;  %vm2713_vm3 = vcmp.gt.f32.partialorder %v6039_v29, 20.0 }
 0x401   :  { %v2528_v31 = vmul.f32 1.442695, %v2504_v36  ;;  %v6050_v22 = vmul.f32 100.0, %v6043_v13 }
 0x402   :  { %v2530_v51 = vmul.f32 1.442695, %v2505_v0  ;;  %v6053_v54 = vmul.f32 100.0, %v6047_v43 }
 0x403   :  { %4609 = vpow2.f32 %v2528_v31  ;;  %v2508_v25 = vmin.f32 %v6050_v22, 20.0  ;;  %vm2716_vm7 = vcmp.gt.f32.partialorder %v6050_v22, 20.0 }
 0x404   :  { %4611 = vpow2.f32 %v2530_v51  ;;  %v2509_v50 = vmin.f32 %v6053_v54, 20.0 }
 0x405   :  { %v4602_v49 = vpop.eup %4601  ;;  %v2536_v6 = vmul.f32 1.442695, %v2508_v25 }
 0x406   :  { %v4604_v53 = vpop.eup %4603  ;;  %v2538_v57 = vmul.f32 1.442695, %v2509_v50  ;;  %v2544_v5 = vadd.f32 1.0, %v4602_v49  ;;  %v2547_v38 = vmul.f32 -0.5, %v4602_v49  ;;  %v2550_v40 = vand.u32 2147483647, %v4602_v49 }
 0x407   :  { %4613 = vpow2.f32 %v2536_v6  ;;  %v2553_v19 = vadd.f32 1.0, %v4604_v53  ;;  %v2556_v39 = vmul.f32 -0.5, %v4604_v53  ;;  %v2559_v59 = vand.u32 2147483647, %v4604_v53 }
 0x408   :  { %4615 = vpow2.f32 %v2538_v57  ;;  %v2548_v15 = vadd.f32 1.0, %v2547_v38  ;;  %vm6066_vm9 = vcmp.lt.f32.partialorder %v2550_v40, 0.0004427343 }
 0x409   :  { %v4606_v35 = vpop.eup %4605  ;;  %4617 = vlog2.f32 %v2544_v5  ;;  %v2557_v2 = vadd.f32 1.0, %v2556_v39  ;;  %vm6075_vm11 = vcmp.lt.f32.partialorder %v2559_v59, 0.0004427343 }
 0x40a   :  { %v4608_v63 = vpop.eup %4607  ;;  %v2580_v9 = vadd.f32 1.0, %v4606_v35  ;;  %4619 = vlog2.f32 %v2553_v19  ;;  %v2583_v18 = vmul.f32 -0.5, %v4606_v35  ;;  %v2586_v23 = vand.u32 2147483647, %v4606_v35 }
 0x40b   :  { %v2589_v47 = vadd.f32 1.0, %v4608_v63  ;;  %v2592_v11 = vmul.f32 -0.5, %v4608_v63  ;;  %v2595_v58 = vand.u32 2147483647, %v4608_v63  ;;  %v2549_v45 = vmul.f32 %v4602_v49, %v2548_v15 }
 0x40c   :  { %4621 = vlog2.f32 %v2580_v9  ;;  %v2584_v10 = vadd.f32 1.0, %v2583_v18  ;;  %vm6079_vm12 = vcmp.lt.f32.partialorder %v2586_v23, 0.0004427343  ;;  %v2558_v36 = vmul.f32 %v4604_v53, %v2557_v2  ;;  %v2864_v9 = vld [vmem:[%s6484_s9] sm:$0xff] }
 0x40d   :  { %v6057_v14 = vpop.eup %4609  ;;  %4623 = vlog2.f32 %v2589_v47  ;;  %v2593_v32 = vadd.f32 1.0, %v2592_v11  ;;  %vm6086_vm14 = vcmp.lt.f32.partialorder %v2595_v58, 0.0004427343 }
 0x40e   :  { %v6059_v42 = vpop.eup %4611  ;;  %v2616_v44 = vadd.f32 1.0, %v6057_v14  ;;  %v2619_v46 = vmul.f32 -0.5, %v6057_v14  ;;  %v2622_v21 = vand.u32 2147483647, %v6057_v14  ;;  %v2585_v25 = vmul.f32 %v4606_v35, %v2584_v10  ;;  %v2865_v35 = vld [vmem:[%s6484_s9 + $0x8] sm:$0xff] }
 0x40f   :  { %v2625_v8 = vadd.f32 1.0, %v6059_v42  ;;  %v2628_v0 = vmul.f32 -0.5, %v6059_v42  ;;  %v2594_v50 = vmul.f32 %v4608_v63, %v2593_v32  ;;  %v2631_v49 = vand.u32 2147483647, %v6059_v42 }
 0x410   :  { %4625 = vlog2.f32 %v2616_v44  ;;  %v2620_v57 = vadd.f32 1.0, %v2619_v46  ;;  %vm6102_vm0 = vcmp.lt.f32.partialorder %v2622_v21, 0.0004427343  ;;  %v4395_v18 = vpack.c.bf16 %v2865_v35, %v2864_v9 }
 0x411   :  { %v6064_v30 = vpop.eup %4613  ;;  %4627 = vlog2.f32 %v2625_v8  ;;  %v2629_v40 = vadd.f32 1.0, %v2628_v0  ;;  %vm2632_vm1 = vcmp.lt.f32.partialorder %v2631_v49, 0.0004427343 }
 0x412   :  { %v6070_v60 = vpop.eup %4615  ;;  %v2652_v48 = vadd.f32 1.0, %v6064_v30  ;;  %v2655_v53 = vmul.f32 -0.5, %v6064_v30  ;;  %v2658_v23 = vand.u32 2147483647, %v6064_v30  ;;  %4396 = vmatprep.subr.bf16.mxu1 %v4395_v18  ;;  %v2621_v1 = vmul.f32 %v6057_v14, %v2620_v57 }
 0x413   :  { %v4618_v55 = vpop.eup %4617  ;;  %v2661_v61 = vadd.f32 1.0, %v6070_v60  ;;  %v2664_v44 = vmul.f32 -0.5, %v6070_v60  ;;  %4398 = vmatpush3.bf16.msra.mxu1 %v4395_v18 }
 0x414   :  { %4629 = vlog2.f32 %v2652_v48  ;;  %v2546_v31 = vmul.f32 0.6931472, %v4618_v55  ;;  %v4620_v51 = vpop.eup %4619  ;;  %v2656_v46 = vadd.f32 1.0, %v2655_v53  ;;  %v2866_v48 = vld [vmem:[%s6484_s9 + $0x10] sm:$0xff]  ;;  %vm2659_vm5 = vcmp.lt.f32.partialorder %v2658_v23, 0.0004427343 }
 0x415   :  { %4631 = vlog2.f32 %v2661_v61  ;;  %v2555_v19 = vmul.f32 0.6931472, %v4620_v51  ;;  %v2630_v61 = vmul.f32 %v6059_v42, %v2629_v40 }
 0x416   :  { %v4622_v6 = vpop.eup %4621  ;;  %v2552_v5 = vsel %vm6066_vm9, %v2549_v45, %v2546_v31 }
 0x417   :  { %v4624_v63 = vpop.eup %4623  ;;  %v2582_v38 = vmul.f32 0.6931472, %v4622_v6  ;;  %v2688_v39 = vmul.f32 0.01, %v2552_v5  ;;  %v2561_v15 = vsel %vm6075_vm11, %v2558_v36, %v2555_v19  ;;  %v2665_v36 = vadd.f32 1.0, %v2664_v44 }
 0x418   :  { %v2591_v11 = vmul.f32 0.6931472, %v4624_v63  ;;  %v2689_v2 = vmul.f32 0.01, %v2561_v15 }
 0x419   :  { %v2588_v59 = vsel %vm6079_vm12, %v2585_v25, %v2582_v38  ;;  %v2720_v8 = vsel %vm2704_vm8, %v5996_v16, %v2688_v39  ;;  %v2867_v16 = vld [vmem:[%s6484_s9 + $0x18] sm:$0xff]  ;;  %vm2717_vm8 = vcmp.gt.f32.partialorder %v6053_v54, 20.0 }
 0x41a   :  { %v4626_v58 = vpop.eup %4625  ;;  %v2692_v10 = vmul.f32 0.01, %v2588_v59  ;;  %v2597_v32 = vsel %vm6086_vm14, %v2594_v50, %v2591_v11  ;;  %2736 = vxpose.xlu1.b32.start [1/4] (short) %v2720_v8, 128  ;;  %v2721_v55 = vsel %vm2705_vm10, %v5999_v4, %v2689_v2  ;;  %v4399_v37 = vpack.c.bf16 %v2867_v16, %v2866_v48 }
 0x41b   :  { %v4628_v26 = vpop.eup %4627  ;;  %v2693_v45 = vmul.f32 0.01, %v2597_v32  ;;  %v2618_v17 = vmul.f32 0.6931472, %v4626_v58  ;;  %2768 = vxpose.xlu0.b32.start [1/4] (short) %v2721_v55, 128  ;;  %v2667_v4 = vand.u32 2147483647, %v6070_v60  ;;  %v2666_v50 = vmul.f32 %v6070_v60, %v2665_v36 }
 0x41c   :  { %v2724_v14 = vsel %vm2708_vm13, %v6011_v33, %v2692_v10  ;;  %v2627_v21 = vmul.f32 0.6931472, %v4628_v26  ;;  %4400 = vmatprep.subr.bf16.mxu1 %v4399_v37 }
 0x41d   :  { %v2725_v41 = vsel %vm2709_vm15, %v6015_v20, %v2693_v45  ;;  %v2624_v0 = vsel %vm6102_vm0, %v2621_v1, %v2618_v17  ;;  %4402 = vmatpush3.bf16.msra.mxu1 %v4399_v37  ;;  %v2657_v20 = vmul.f32 %v6064_v30, %v2656_v46  ;;  %vm2668_vm6 = vcmp.lt.f32.partialorder %v2667_v4, 0.0004427343 }
 0x41e   :  { %v4630_v56 = vpop.eup %4629  ;;  %v2696_v31 = vmul.f32 0.01, %v2624_v0  ;;  %v2633_v33 = vsel %vm2632_vm1, %v2630_v61, %v2627_v21  ;;  %2737 = vxpose.xlu1.b32.cont [2/4] (short) %v2724_v14, 128 }
 0x41f   :  { %v4632_v3 = vpop.eup %4631  ;;  %v2697_v42 = vmul.f32 0.01, %v2633_v33  ;;  %v2654_v27 = vmul.f32 0.6931472, %v4630_v56  ;;  %2769 = vxpose.xlu0.b32.cont [2/4] (short) %v2725_v41, 128 }
 0x420   :  { %v2728_v51 = vsel %vm2712_vm2, %v6027_v62, %v2696_v31  ;;  %v2663_v25 = vmul.f32 0.6931472, %v4632_v3 }
 0x421   :  { %v2729_v49 = vsel %vm2713_vm3, %v6031_v12, %v2697_v42  ;;  %v2660_v52 = vsel %vm2659_vm5, %v2657_v20, %v2654_v27 }
 0x422   :  { %v2700_v6 = vmul.f32 0.01, %v2660_v52  ;;  %v2669_v57 = vsel %vm2668_vm6, %v2666_v50, %v2663_v25  ;;  %2738 = vxpose.xlu1.b32.cont [3/4] (short) %v2728_v51, 128 }
 0x423   :  { %v2701_v29 = vmul.f32 0.01, %v2669_v57  ;;  %2770 = vxpose.xlu0.b32.cont [3/4] (short) %v2729_v49, 128 }
 0x424   :  { %v2732_v53 = vsel %vm2716_vm7, %v6043_v13, %v2700_v6 }
 0x425   :  { %v2733_v62 = vsel %vm2717_vm8, %v6047_v43, %v2701_v29 }
 0x426   :  { %2739 = vxpose.xlu1.b32.end [4/4] (short) %v2732_v53, 128 }
 0x427   :  { %2771 = vxpose.xlu0.b32.end [4/4] (short) %v2733_v62, 128 }
 0x435   :  { %v2457_v30 = vpop.f32.mrb[40].mxu1 }
 0x436   :  { %v6148_v12 = vadd.f32 %v2457_v30, %v5993_v7  ;;  %v2459_v60 = vpop.f32.mrb[41].mxu1 }
 0x437   :  { %v6151_v5 = vadd.f32 %v2459_v60, %v5993_v7 }
 0x438   :  { %v6154_v22 = vmul.f32 100.0, %v6148_v12 }
 0x439   :  { %v6157_v13 = vmul.f32 100.0, %v6151_v5  ;;  %v2463_v54 = vpop.f32.mrb[42].mxu1 }
 0x43a   :  { %v2498_v19 = vmin.f32 %v6154_v22, 20.0  ;;  %v6161_v43 = vadd.f32 %v2463_v54, %v6004_v28  ;;  %v2465_v9 = vpop.f32.mrb[43].mxu1  ;;  %vm2706_vm9 = vcmp.gt.f32.partialorder %v6154_v22, 20.0 }
 0x43b   :  { %v2499_v35 = vmin.f32 %v6157_v13, 20.0  ;;  %v6165_v63 = vadd.f32 %v2465_v9, %v6004_v28  ;;  %vm2707_vm11 = vcmp.gt.f32.partialorder %v6157_v13, 20.0 }
 0x43c   :  { %v2516_v7 = vmul.f32 1.442695, %v2498_v19  ;;  %v6168_v38 = vmul.f32 100.0, %v6161_v43 }
 0x43d   :  { %v2518_v47 = vmul.f32 1.442695, %v2499_v35  ;;  %v6171_v39 = vmul.f32 100.0, %v6165_v63  ;;  %v2469_v18 = vpop.f32.mrb[44].mxu1 }
 0x43e   :  { %4633 = vpow2.f32 %v2516_v7  ;;  %v2502_v11 = vmin.f32 %v6168_v38, 20.0  ;;  %v6175_v40 = vadd.f32 %v2469_v18, %v6020_v24  ;;  %v2471_v44 = vpop.f32.mrb[45].mxu1  ;;  %vm2710_vm12 = vcmp.gt.f32.partialorder %v6168_v38, 20.0 }
 0x43f   :  { %4635 = vpow2.f32 %v2518_v47  ;;  %v2503_v28 = vmin.f32 %v6171_v39, 20.0  ;;  %v6179_v15 = vadd.f32 %v2471_v44, %v6020_v24  ;;  %vm2711_vm14 = vcmp.gt.f32.partialorder %v6171_v39, 20.0 }
 0x440   :  { %v2524_v59 = vmul.f32 1.442695, %v2502_v11  ;;  %v6182_v23 = vmul.f32 100.0, %v6175_v40 }
 0x441   :  { %v2526_v8 = vmul.f32 1.442695, %v2503_v28  ;;  %v6185_v2 = vmul.f32 100.0, %v6179_v15  ;;  %v2475_v58 = vpop.f32.mrb[46].mxu1 }
 0x442   :  { %4637 = vpow2.f32 %v2524_v59  ;;  %v2506_v10 = vmin.f32 %v6182_v23, 20.0  ;;  %v6189_v32 = vadd.f32 %v2475_v58, %v6036_v34  ;;  %v2477_v1 = vpop.f32.mrb[47].mxu1  ;;  %vm2714_vm3 = vcmp.gt.f32.partialorder %v6182_v23, 20.0 }
 0x443   :  { %4639 = vpow2.f32 %v2526_v8  ;;  %v2507_v24 = vmin.f32 %v6185_v2, 20.0  ;;  %v6193_v46 = vadd.f32 %v2477_v1, %v6036_v34  ;;  %vm2715_vm5 = vcmp.gt.f32.partialorder %v6185_v2, 20.0 }
 0x444   :  { %v2532_v48 = vmul.f32 1.442695, %v2506_v10  ;;  %v6196_v16 = vmul.f32 100.0, %v6189_v32 }
 0x445   :  { %v2534_v26 = vmul.f32 1.442695, %v2507_v24  ;;  %v6199_v45 = vmul.f32 100.0, %v6193_v46 }
 0x446   :  { %4641 = vpow2.f32 %v2532_v48  ;;  %v2510_v17 = vmin.f32 %v6196_v16, 20.0  ;;  %vm2718_vm8 = vcmp.gt.f32.partialorder %v6196_v16, 20.0 }
 0x447   :  { %4643 = vpow2.f32 %v2534_v26  ;;  %v2511_v55 = vmin.f32 %v6199_v45, 20.0 }
 0x448   :  { %v4634_v37 = vpop.eup %4633  ;;  %v2540_v14 = vmul.f32 1.442695, %v2510_v17 }
 0x449   :  { %v4636_v21 = vpop.eup %4635  ;;  %v2542_v61 = vmul.f32 1.442695, %v2511_v55  ;;  %v2562_v34 = vadd.f32 1.0, %v4634_v37  ;;  %v2565_v56 = vmul.f32 -0.5, %v4634_v37  ;;  %v2568_v42 = vand.u32 2147483647, %v4634_v37 }
 0x44a   :  { %4645 = vpow2.f32 %v2540_v14  ;;  %v2571_v36 = vadd.f32 1.0, %v4636_v21  ;;  %v2574_v31 = vmul.f32 -0.5, %v4636_v21  ;;  %v2577_v49 = vand.u32 2147483647, %v4636_v21 }
 0x44b   :  { %4647 = vpow2.f32 %v2542_v61  ;;  %v2566_v25 = vadd.f32 1.0, %v2565_v56  ;;  %vm6212_vm10 = vcmp.lt.f32.partialorder %v2568_v42, 0.0004427343 }
 0x44c   :  { %v4638_v41 = vpop.eup %4637  ;;  %4649 = vlog2.f32 %v2562_v34  ;;  %v2575_v50 = vadd.f32 1.0, %v2574_v31  ;;  %vm6223_vm13 = vcmp.lt.f32.partialorder %v2577_v49, 0.0004427343 }
 0x44d   :  { %v4640_v0 = vpop.eup %4639  ;;  %4651 = vlog2.f32 %v2571_v36  ;;  %v2598_v4 = vadd.f32 1.0, %v4638_v41  ;;  %v2601_v27 = vmul.f32 -0.5, %v4638_v41  ;;  %v2604_v6 = vand.u32 2147483647, %v4638_v41 }
 0x44e   :  { %v2607_v33 = vadd.f32 1.0, %v4640_v0  ;;  %v2610_v57 = vmul.f32 -0.5, %v4640_v0  ;;  %v2613_v60 = vand.u32 2147483647, %v4640_v0  ;;  %v2567_v7 = vmul.f32 %v4634_v37, %v2566_v25 }
 0x44f   :  { %4653 = vlog2.f32 %v2598_v4  ;;  %v2602_v62 = vadd.f32 1.0, %v2601_v27  ;;  %v2576_v47 = vmul.f32 %v4636_v21, %v2575_v50  ;;  %vm6229_vm15 = vcmp.lt.f32.partialorder %v2604_v6, 0.0004427343 }
 0x450   :  { %v6203_v3 = vpop.eup %4641  ;;  %4655 = vlog2.f32 %v2607_v33  ;;  %v2611_v8 = vadd.f32 1.0, %v2610_v57  ;;  %vm6236_vm0 = vcmp.lt.f32.partialorder %v2613_v60, 0.0004427343 }
 0x451   :  { %v6205_v20 = vpop.eup %4643  ;;  %v2634_v51 = vadd.f32 1.0, %v6203_v3  ;;  %v2637_v54 = vmul.f32 -0.5, %v6203_v3  ;;  %v2603_v10 = vmul.f32 %v4638_v41, %v2602_v62  ;;  %v2640_v1 = vand.u32 2147483647, %v6203_v3 }
 0x452   :  { %v2643_v52 = vadd.f32 1.0, %v6205_v20  ;;  %v2646_v19 = vmul.f32 -0.5, %v6205_v20  ;;  %v2612_v4 = vmul.f32 %v4640_v0, %v2611_v8  ;;  %v2649_v27 = vand.u32 2147483647, %v6205_v20 }
 0x453   :  { %4657 = vlog2.f32 %v2634_v51  ;;  %v2638_v17 = vadd.f32 1.0, %v2637_v54  ;;  %vm6249_vm1 = vcmp.lt.f32.partialorder %v2640_v1, 0.0004427343 }
 0x454   :  { %v6210_v29 = vpop.eup %4645  ;;  %4659 = vlog2.f32 %v2643_v52  ;;  %v2647_v55 = vadd.f32 1.0, %v2646_v19  ;;  %vm2650_vm2 = vcmp.lt.f32.partialorder %v2649_v27, 0.0004427343 }
 0x455   :  { %v6217_v30 = vpop.eup %4647  ;;  %v2670_v9 = vadd.f32 1.0, %v6210_v29  ;;  %v2673_v34 = vmul.f32 -0.5, %v6210_v29 }
 0x456   :  { %v4650_v35 = vpop.eup %4649  ;;  %v2679_v11 = vadd.f32 1.0, %v6217_v30  ;;  %v2682_v56 = vmul.f32 -0.5, %v6217_v30  ;;  %v2648_v6 = vmul.f32 %v6205_v20, %v2647_v55  ;;  %v2685_v54 = vand.u32 2147483647, %v6217_v30 }
 0x457   :  { %v4652_v44 = vpop.eup %4651  ;;  %v2564_v28 = vmul.f32 0.6931472, %v4650_v35  ;;  %4661 = vlog2.f32 %v2670_v9  ;;  %v2674_v57 = vadd.f32 1.0, %v2673_v34 }
 0x458   :  { %v2573_v58 = vmul.f32 0.6931472, %v4652_v44  ;;  %4663 = vlog2.f32 %v2679_v11  ;;  %v2683_v13 = vadd.f32 1.0, %v2682_v56  ;;  %vm2686_vm7 = vcmp.lt.f32.partialorder %v2685_v54, 0.0004427343 }
 0x459   :  { %v4654_v24 = vpop.eup %4653  ;;  %v2570_v48 = vsel %vm6212_vm10, %v2567_v7, %v2564_v28  ;;  %vm3452_vm10 = vcmask 130048  }
 0x45a   :  { %v4656_v37 = vpop.eup %4655  ;;  %v2690_v14 = vmul.f32 0.01, %v2570_v48  ;;  %v2579_v21 = vsel %vm6223_vm13, %v2576_v47, %v2573_v58  ;;  %v2600_v61 = vmul.f32 0.6931472, %v4654_v24  ;;  %v2684_v47 = vmul.f32 %v6217_v30, %v2683_v13 }
 0x45b   :  { %v2691_v36 = vmul.f32 0.01, %v2579_v21  ;;  %v2609_v41 = vmul.f32 0.6931472, %v4656_v37 }
 0x45c   :  { %v2722_v31 = vsel %vm2706_vm9, %v6148_v12, %v2690_v14  ;;  %v2606_v33 = vsel %vm6229_vm15, %v2603_v10, %v2600_v61  ;;  %v2639_v12 = vmul.f32 %v6203_v3, %v2638_v17  ;;  %vm2719_vm9 = vcmp.gt.f32.partialorder %v6199_v45, 20.0 }
 0x45d   :  { %v4658_v51 = vpop.eup %4657  ;;  %2800 = vxpose.xlu0.b32.start [1/4] (short) %v2722_v31, 128  ;;  %v2723_v0 = vsel %vm2707_vm11, %v6151_v5, %v2691_v36  ;;  %v2694_v25 = vmul.f32 0.01, %v2606_v33  ;;  %v2615_v22 = vsel %vm6236_vm0, %v2612_v4, %v2609_v41  ;;  %v2676_v5 = vand.u32 2147483647, %v6210_v29 }
 0x45e   :  { %v4660_v50 = vpop.eup %4659  ;;  %2832 = vxpose.xlu1.b32.start [1/4] (short) %v2723_v0, 128  ;;  %v2695_v49 = vmul.f32 0.01, %v2615_v22  ;;  %v2636_v52 = vmul.f32 0.6931472, %v4658_v51 }
 0x45f   :  { %v2726_v53 = vsel %vm2710_vm12, %v6161_v43, %v2694_v25  ;;  %v2645_v62 = vmul.f32 0.6931472, %v4660_v50  ;;  %vm2677_vm6 = vcmp.lt.f32.partialorder %v2676_v5, 0.0004427343 }
 0x460   :  { %v2727_v60 = vsel %vm2711_vm14, %v6165_v63, %v2695_v49  ;;  %v2642_v3 = vsel %vm6249_vm1, %v2639_v12, %v2636_v52  ;;  %v2675_v63 = vmul.f32 %v6210_v29, %v2674_v57 }
 0x461   :  { %v4662_v20 = vpop.eup %4661  ;;  %2801 = vxpose.xlu0.b32.cont [2/4] (short) %v2726_v53, 128  ;;  %v2698_v38 = vmul.f32 0.01, %v2642_v3  ;;  %v2651_v43 = vsel %vm2650_vm2, %v2648_v6, %v2645_v62 }
 0x462   :  { %v4664_v19 = vpop.eup %4663  ;;  %2833 = vxpose.xlu1.b32.cont [2/4] (short) %v2727_v60, 128  ;;  %v2699_v9 = vmul.f32 0.01, %v2651_v43  ;;  %v2672_v35 = vmul.f32 0.6931472, %v4662_v20 }
 0x463   :  { %v2730_v39 = vsel %vm2714_vm3, %v6175_v40, %v2698_v38  ;;  %v2681_v7 = vmul.f32 0.6931472, %v4664_v19 }
 0x464   :  { %v2731_v18 = vsel %vm2715_vm5, %v6179_v15, %v2699_v9  ;;  %v2678_v23 = vsel %vm2677_vm6, %v2675_v63, %v2672_v35 }
 0x465   :  { %2802 = vxpose.xlu0.b32.cont [3/4] (short) %v2730_v39, 128  ;;  %v2702_v11 = vmul.f32 0.01, %v2678_v23  ;;  %v2687_v44 = vsel %vm2686_vm7, %v2684_v47, %v2681_v7 }
 0x466   :  { %2834 = vxpose.xlu1.b32.cont [3/4] (short) %v2731_v18, 128  ;;  %v2703_v2 = vmul.f32 0.01, %v2687_v44 }
 0x467   :  { %v2734_v29 = vsel %vm2718_vm8, %v6189_v32, %v2702_v11 }
 0x468   :  { %v2735_v40 = vsel %vm2719_vm9, %v6193_v46, %v2703_v2 }
 0x469   :  { %2803 = vxpose.xlu0.b32.end [4/4] (short) %v2734_v29, 128 }
 0x46a   :  { %2835 = vxpose.xlu1.b32.end [4/4] (short) %v2735_v40, 128 }
 0x49a   :  { %v2752_v30 = vpop.trf.xlu1 }
 0x49b   :  { %4267 = vmatprep.mubr.msk.f32.mxu1 %vm1815_vm4, %v2752_v30  ;;  %v2784_v15 = vpop.trf.xlu0  ;;  %v6348_v30 = vld [vmem:[%s6485_s10] ss:$0 sm:$0xff] }
 0x49e   :  { %v2753_v28 = vpop.trf.xlu1 }
 0x49f   :  { %4268 = vmatmul.mubr.msk.f32.vlgmr.msra.gmra.mrb[48].mxu1 %vm1815_vm4, %v2753_v28  ;;  %v2785_v59 = vpop.trf.xlu0 }
 0x4a2   :  { %v2754_v8 = vpop.trf.xlu1 }
 0x4a3   :  { %4270 = vmatprep.mubr.msk.f32.mxu1 %vm1815_vm4, %v2754_v8  ;;  %v2786_v16 = vpop.trf.xlu0 }
 0x4a6   :  { %v2755_v58 = vpop.trf.xlu1 }
 0x4a7   :  { %4271 = vmatmul.mubr.msk.f32.gmra.mrb[50].mxu1 %vm1815_vm4, %v2755_v58  ;;  %v2787_v32 = vpop.trf.xlu0 }
 0x4aa   :  { %v2756_v45 = vpop.trf.xlu1 }
 0x4ab   :  { %4273 = vmatprep.mubr.msk.f32.mxu1 %vm1815_vm4, %v2756_v45  ;;  %v2788_v46 = vpop.trf.xlu0 }
 0x4ae   :  { %v2757_v10 = vpop.trf.xlu1 }
 0x4af   :  { %4274 = vmatmul.mubr.msk.f32.gmra.mrb[52].mxu1 %vm1815_vm4, %v2757_v10  ;;  %v2789_v1 = vpop.trf.xlu0 }
 0x4b2   :  { %v2758_v24 = vpop.trf.xlu1 }
 0x4b3   :  { %4276 = vmatprep.mubr.msk.f32.mxu1 %vm1815_vm4, %v2758_v24  ;;  %v2790_v48 = vpop.trf.xlu0 }
 0x4b6   :  { %v2759_v26 = vpop.trf.xlu1 }
 0x4b7   :  { %4277 = vmatmul.mubr.msk.f32.gmra.mrb[54].mxu1 %vm1815_vm4, %v2759_v26  ;;  %v2791_v17 = vpop.trf.xlu0 }
 0x4ba   :  { %v2760_v55 = vpop.trf.xlu1 }
 0x4bb   :  { %4279 = vmatprep.mubr.msk.f32.mxu1 %vm1815_vm4, %v2760_v55  ;;  %v2792_v37 = vpop.trf.xlu0 }
 0x4be   :  { %v2761_v14 = vpop.trf.xlu1 }
 0x4bf   :  { %4280 = vmatmul.mubr.msk.f32.gmra.mrb[56].mxu1 %vm1815_vm4, %v2761_v14  ;;  %v2793_v21 = vpop.trf.xlu0 }
 0x4c2   :  { %v2762_v61 = vpop.trf.xlu1 }
 0x4c3   :  { %4282 = vmatprep.mubr.msk.f32.mxu1 %vm1815_vm4, %v2762_v61  ;;  %v2794_v34 = vpop.trf.xlu0 }
 0x4c6   :  { %v2763_v36 = vpop.trf.xlu1 }
 0x4c7   :  { %4283 = vmatmul.mubr.msk.f32.gmra.mrb[58].mxu1 %vm1815_vm4, %v2763_v36  ;;  %v2795_v41 = vpop.trf.xlu0 }
 0x4ca   :  { %v2764_v4 = vpop.trf.xlu1 }
 0x4cb   :  { %4285 = vmatprep.mubr.msk.f32.mxu1 %vm1815_vm4, %v2764_v4  ;;  %v2796_v56 = vpop.trf.xlu0 }
 0x4ce   :  { %v2765_v31 = vpop.trf.xlu1 }
 0x4cf   :  { %4286 = vmatmul.mubr.msk.f32.gmra.mrb[60].mxu1 %vm1815_vm4, %v2765_v31  ;;  %v2797_v33 = vpop.trf.xlu0 }
 0x4d2   :  { %v2766_v42 = vpop.trf.xlu1 }
 0x4d3   :  { %4288 = vmatprep.mubr.msk.f32.mxu1 %vm1815_vm4, %v2766_v42  ;;  %v2798_v27 = vpop.trf.xlu0 }
 0x4d6   :  { %v2767_v51 = vpop.trf.xlu1 }
 0x4d7   :  { %4289 = vmatmul.mubr.msk.f32.gmra.mrb[62].mxu1 %vm1815_vm4, %v2767_v51  ;;  %v2799_v0 = vpop.trf.xlu0 }
 0x4d8   :  { %4291 = vmatprep.mubr.msk.f32.mxu1 %vm1815_vm4, %v2784_v15 }
 0x4db   :  { %4292 = vmatmul.mubr.msk.f32.gmra.mrb[64].mxu1 %vm1815_vm4, %v2785_v59 }
 0x4dc   :  { %4294 = vmatprep.mubr.msk.f32.mxu1 %vm1815_vm4, %v2786_v16 }
 0x4dd   :  { %v2816_v25 = vpop.trf.xlu0 }
 0x4de   :  { %v2848_v22 = vpop.trf.xlu1 }
 0x4df   :  { %4295 = vmatmul.mubr.msk.f32.gmra.mrb[66].mxu1 %vm1815_vm4, %v2787_v32 }
 0x4e0   :  { %4297 = vmatprep.mubr.msk.f32.mxu1 %vm1815_vm4, %v2788_v46 }
 0x4e1   :  { %v2817_v12 = vpop.trf.xlu0 }
 0x4e2   :  { %v2849_v50 = vpop.trf.xlu1 }
 0x4e3   :  { %4298 = vmatmul.mubr.msk.f32.gmra.mrb[68].mxu1 %vm1815_vm4, %v2789_v1 }
 0x4e4   :  { %4300 = vmatprep.mubr.msk.f32.mxu1 %vm1815_vm4, %v2790_v48 }
 0x4e5   :  { %v2818_v49 = vpop.trf.xlu0 }
 0x4e6   :  { %v2850_v6 = vpop.trf.xlu1 }
 0x4e7   :  { %4301 = vmatmul.mubr.msk.f32.gmra.mrb[70].mxu1 %vm1815_vm4, %v2791_v17 }
 0x4e8   :  { %4303 = vmatprep.mubr.msk.f32.mxu1 %vm1815_vm4, %v2792_v37 }
 0x4e9   :  { %v2819_v52 = vpop.trf.xlu0 }
 0x4ea   :  { %v2851_v53 = vpop.trf.xlu1 }
 0x4eb   :  { %4304 = vmatmul.mubr.msk.f32.gmra.mrb[72].mxu1 %vm1815_vm4, %v2793_v21 }
 0x4ec   :  { %4306 = vmatprep.mubr.msk.f32.mxu1 %vm1815_vm4, %v2794_v34 }
 0x4ed   :  { %v2820_v57 = vpop.trf.xlu0 }
 0x4ee   :  { %v2852_v13 = vpop.trf.xlu1 }
 0x4ef   :  { %4307 = vmatmul.mubr.msk.f32.gmra.mrb[74].mxu1 %vm1815_vm4, %v2795_v41 }
 0x4f0   :  { %4309 = vmatprep.mubr.msk.f32.mxu1 %vm1815_vm4, %v2796_v56 }
 0x4f1   :  { %v2821_v62 = vpop.trf.xlu0 }
 0x4f2   :  { %v2853_v3 = vpop.trf.xlu1 }
 0x4f3   :  { %4310 = vmatmul.mubr.msk.f32.gmra.mrb[76].mxu1 %vm1815_vm4, %v2797_v33 }
 0x4f4   :  { %4312 = vmatprep.mubr.msk.f32.mxu1 %vm1815_vm4, %v2798_v27 }
 0x4f5   :  { %v2822_v5 = vpop.trf.xlu0 }
 0x4f6   :  { %v2854_v38 = vpop.trf.xlu1 }
 0x4f7   :  { %4313 = vmatmul.mubr.msk.f32.gmra.mrb[78].mxu1 %vm1815_vm4, %v2799_v0 }
 0x4f8   :  { %4315 = vmatprep.mubr.msk.f32.mxu1 %vm1815_vm4, %v2816_v25 }
 0x4f9   :  { %v2823_v60 = vpop.trf.xlu0 }
 0x4fa   :  { %v2855_v19 = vpop.trf.xlu1 }
 0x4fb   :  { %4316 = vmatmul.mubr.msk.f32.gmra.mrb[80].mxu1 %vm1815_vm4, %v2817_v12 }
 0x4fc   :  { %4318 = vmatprep.mubr.msk.f32.mxu1 %vm1815_vm4, %v2818_v49 }
 0x4fd   :  { %v2824_v54 = vpop.trf.xlu0 }
 0x4fe   :  { %v2856_v63 = vpop.trf.xlu1 }
 0x4ff   :  { %4319 = vmatmul.mubr.msk.f32.gmra.mrb[82].mxu1 %vm1815_vm4, %v2819_v52 }
 0x500   :  { %4321 = vmatprep.mubr.msk.f32.mxu1 %vm1815_vm4, %v2820_v57 }
 0x501   :  { %v2825_v20 = vpop.trf.xlu0 }
 0x502   :  { %v2857_v7 = vpop.trf.xlu1 }
 0x503   :  { %4322 = vmatmul.mubr.msk.f32.gmra.mrb[84].mxu1 %vm1815_vm4, %v2821_v62 }
 0x504   :  { %4324 = vmatprep.mubr.msk.f32.mxu1 %vm1815_vm4, %v2822_v5 }
 0x505   :  { %v2826_v43 = vpop.trf.xlu0 }
 0x506   :  { %v2858_v23 = vpop.trf.xlu1 }
 0x507   :  { %4325 = vmatmul.mubr.msk.f32.gmra.mrb[86].mxu1 %vm1815_vm4, %v2823_v60 }
 0x508   :  { %4327 = vmatprep.mubr.msk.f32.mxu1 %vm1815_vm4, %v2824_v54 }
 0x509   :  { %v2827_v9 = vpop.trf.xlu0 }
 0x50a   :  { %v2859_v11 = vpop.trf.xlu1 }
 0x50b   :  { %4328 = vmatmul.mubr.msk.f32.gmra.mrb[88].mxu1 %vm1815_vm4, %v2825_v20 }
 0x50c   :  { %4330 = vmatprep.mubr.msk.f32.mxu1 %vm1815_vm4, %v2826_v43 }
 0x50d   :  { %v2828_v35 = vpop.trf.xlu0 }
 0x50e   :  { %v2860_v44 = vpop.trf.xlu1 }
 0x50f   :  { %4331 = vmatmul.mubr.msk.f32.gmra.mrb[90].mxu1 %vm1815_vm4, %v2827_v9 }
 0x510   :  { %4333 = vmatprep.mubr.msk.f32.mxu1 %vm1815_vm4, %v2828_v35 }
 0x511   :  { %v2829_v39 = vpop.trf.xlu0 }
 0x512   :  { %v2861_v2 = vpop.trf.xlu1 }
 0x513   :  { %4334 = vmatmul.mubr.msk.f32.gmra.mrb[92].mxu1 %vm1815_vm4, %v2829_v39 }
 0x515   :  { %v2830_v47 = vpop.trf.xlu0 }
 0x516   :  { %4336 = vmatprep.mubr.msk.f32.mxu1 %vm1815_vm4, %v2830_v47  ;;  %v2862_v29 = vpop.trf.xlu1 }
 0x519   :  { %v2831_v18 = vpop.trf.xlu0 }
 0x51a   :  { %4337 = vmatmul.mubr.msk.f32.gmra.mrb[94].mxu1 %vm1815_vm4, %v2831_v18  ;;  %v2863_v40 = vpop.trf.xlu1 }
 0x51b   :  { %4339 = vmatprep.mubr.msk.f32.mxu1 %vm1815_vm4, %v2848_v22 }
 0x51e   :  { %4340 = vmatmul.mubr.msk.f32.gmra.mrb[96].mxu1 %vm1815_vm4, %v2849_v50 }
 0x51f   :  { %4342 = vmatprep.mubr.msk.f32.mxu1 %vm1815_vm4, %v2850_v6 }
 0x522   :  { %4343 = vmatmul.mubr.msk.f32.gmra.mrb[98].mxu1 %vm1815_vm4, %v2851_v53 }
 0x523   :  { %4345 = vmatprep.mubr.msk.f32.mxu1 %vm1815_vm4, %v2852_v13 }
 0x526   :  { %4346 = vmatmul.mubr.msk.f32.gmra.mrb[100].mxu1 %vm1815_vm4, %v2853_v3 }
 0x527   :  { %4348 = vmatprep.mubr.msk.f32.mxu1 %vm1815_vm4, %v2854_v38 }
 0x52a   :  { %4349 = vmatmul.mubr.msk.f32.gmra.mrb[102].mxu1 %vm1815_vm4, %v2855_v19 }
 0x52b   :  { %4351 = vmatprep.mubr.msk.f32.mxu1 %vm1815_vm4, %v2856_v63 }
 0x52e   :  { %4352 = vmatmul.mubr.msk.f32.gmra.mrb[104].mxu1 %vm1815_vm4, %v2857_v7 }
 0x52f   :  { %4354 = vmatprep.mubr.msk.f32.mxu1 %vm1815_vm4, %v2858_v23 }
 0x532   :  { %4355 = vmatmul.mubr.msk.f32.gmra.mrb[106].mxu1 %vm1815_vm4, %v2859_v11 }
 0x533   :  { %4357 = vmatprep.mubr.msk.f32.mxu1 %vm1815_vm4, %v2860_v44 }
 0x536   :  { %4358 = vmatmul.mubr.msk.f32.gmra.mrb[108].mxu1 %vm1815_vm4, %v2861_v2 }
 0x537   :  { %4360 = vmatprep.mubr.msk.f32.mxu1 %vm1815_vm4, %v2862_v29 }
 0x53a   :  { %4361 = vmatmul.mubr.msk.f32.gmra.mrb[110].mxu1 %vm1815_vm4, %v2863_v40 }
 0x572   :  { %v4269_v15 = vpop.f32.mrb[48].mxu1 }
 0x573   :  { %v3139_v28 = vadd.f32 %v4269_v15, %v6348_v30  ;;  %v3133_v59 = vpop.f32.mrb[49].mxu1 }
 0x574   :  { %v3134_v8 = vadd.f32 %v6348_v30, %v3133_v59 }
 0x575   :  { %3454 = vst.msk [vmem:[#allocation2 + $0x8] sm:$0xff] %vm3452_vm10, %v3139_v28 }
 0x576   :  { %3453 = vst.msk [vmem:[#allocation2] sm:$0xff] %vm3452_vm10, %v3134_v8 }
 0x57a   :  { %v4272_v16 = vpop.f32.mrb[50].mxu1 }
 0x57b   :  { %v3149_v58 = vadd.f32 %v4272_v16, %v6348_v30  ;;  %v3143_v32 = vpop.f32.mrb[51].mxu1 }
 0x57c   :  { %v3596_v45 = vld [vmem:[#allocation2 + $0x8] sm:$0xff]  ;;  %v3144_v46 = vadd.f32 %v6348_v30, %v3143_v32 }
 0x57d   :  { %3597 = vst [vmem:[%s6486_s11 + $0x8] sm:$0xff] %v3596_v45  ;;  %v3594_v10 = vld [vmem:[#allocation2] sm:$0xff]  ;;  %3456 = vst.msk [vmem:[#allocation2 + $0x18] sm:$0xff] %vm3452_vm10, %v3149_v58 }
 0x57e   :  { %3595 = vst [vmem:[%s6486_s11] sm:$0xff] %v3594_v10  ;;  %3455 = vst.msk [vmem:[#allocation2 + $0x10] sm:$0xff] %vm3452_vm10, %v3144_v46 }
 0x582   :  { %v4275_v1 = vpop.f32.mrb[52].mxu1 }
 0x583   :  { %v3159_v24 = vadd.f32 %v4275_v1, %v6348_v30  ;;  %v3153_v48 = vpop.f32.mrb[53].mxu1 }
 0x584   :  { %v3600_v26 = vld [vmem:[#allocation2 + $0x18] sm:$0xff]  ;;  %v3154_v17 = vadd.f32 %v6348_v30, %v3153_v48 }
 0x585   :  { %3601 = vst [vmem:[%s6486_s11 + $0x18] sm:$0xff] %v3600_v26  ;;  %v3598_v55 = vld [vmem:[#allocation2 + $0x10] sm:$0xff]  ;;  %3458 = vst.msk [vmem:[#allocation2 + $0x28] sm:$0xff] %vm3452_vm10, %v3159_v24 }
 0x586   :  { %3599 = vst [vmem:[%s6486_s11 + $0x10] sm:$0xff] %v3598_v55  ;;  %3457 = vst.msk [vmem:[#allocation2 + $0x20] sm:$0xff] %vm3452_vm10, %v3154_v17 }
 0x58a   :  { %v4278_v37 = vpop.f32.mrb[54].mxu1 }
 0x58b   :  { %v3169_v14 = vadd.f32 %v4278_v37, %v6348_v30  ;;  %v3163_v21 = vpop.f32.mrb[55].mxu1 }
 0x58c   :  { %v3604_v61 = vld [vmem:[#allocation2 + $0x28] sm:$0xff]  ;;  %v3164_v34 = vadd.f32 %v6348_v30, %v3163_v21 }
 0x58d   :  { %3605 = vst [vmem:[%s6486_s11 + $0x28] sm:$0xff] %v3604_v61  ;;  %v3602_v36 = vld [vmem:[#allocation2 + $0x20] sm:$0xff]  ;;  %3460 = vst.msk [vmem:[#allocation2 + $0x38] sm:$0xff] %vm3452_vm10, %v3169_v14 }
 0x58e   :  { %3603 = vst [vmem:[%s6486_s11 + $0x20] sm:$0xff] %v3602_v36  ;;  %3459 = vst.msk [vmem:[#allocation2 + $0x30] sm:$0xff] %vm3452_vm10, %v3164_v34 }
 0x592   :  { %v4281_v41 = vpop.f32.mrb[56].mxu1 }
 0x593   :  { %v3179_v4 = vadd.f32 %v4281_v41, %v6348_v30  ;;  %v3173_v56 = vpop.f32.mrb[57].mxu1 }
 0x594   :  { %v3608_v31 = vld [vmem:[#allocation2 + $0x38] sm:$0xff]  ;;  %v3174_v33 = vadd.f32 %v6348_v30, %v3173_v56 }
 0x595   :  { %3609 = vst [vmem:[%s6486_s11 + $0x38] sm:$0xff] %v3608_v31  ;;  %v3606_v42 = vld [vmem:[#allocation2 + $0x30] sm:$0xff]  ;;  %3462 = vst.msk [vmem:[#allocation2 + $0x48] sm:$0xff] %vm3452_vm10, %v3179_v4 }
 0x596   :  { %3607 = vst [vmem:[%s6486_s11 + $0x30] sm:$0xff] %v3606_v42  ;;  %3461 = vst.msk [vmem:[#allocation2 + $0x40] sm:$0xff] %vm3452_vm10, %v3174_v33 }
 0x59a   :  { %v4284_v27 = vpop.f32.mrb[58].mxu1 }
 0x59b   :  { %v3189_v51 = vadd.f32 %v4284_v27, %v6348_v30  ;;  %v3183_v0 = vpop.f32.mrb[59].mxu1 }
 0x59c   :  { %v3612_v25 = vld [vmem:[#allocation2 + $0x48] sm:$0xff]  ;;  %v3184_v22 = vadd.f32 %v6348_v30, %v3183_v0 }
 0x59d   :  { %3613 = vst [vmem:[%s6486_s11 + $0x48] sm:$0xff] %v3612_v25  ;;  %v3610_v12 = vld [vmem:[#allocation2 + $0x40] sm:$0xff]  ;;  %3464 = vst.msk [vmem:[#allocation2 + $0x58] sm:$0xff] %vm3452_vm10, %v3189_v51 }
 0x59e   :  { %3611 = vst [vmem:[%s6486_s11 + $0x40] sm:$0xff] %v3610_v12  ;;  %3463 = vst.msk [vmem:[#allocation2 + $0x50] sm:$0xff] %vm3452_vm10, %v3184_v22 }
 0x5a2   :  { %v4287_v50 = vpop.f32.mrb[60].mxu1 }
 0x5a3   :  { %v3199_v49 = vadd.f32 %v4287_v50, %v6348_v30  ;;  %v3193_v52 = vpop.f32.mrb[61].mxu1 }
 0x5a4   :  { %v3616_v6 = vld [vmem:[#allocation2 + $0x58] sm:$0xff]  ;;  %v3194_v57 = vadd.f32 %v6348_v30, %v3193_v52 }
 0x5a5   :  { %3617 = vst [vmem:[%s6486_s11 + $0x58] sm:$0xff] %v3616_v6  ;;  %v3614_v53 = vld [vmem:[#allocation2 + $0x50] sm:$0xff]  ;;  %3466 = vst.msk [vmem:[#allocation2 + $0x68] sm:$0xff] %vm3452_vm10, %v3199_v49 }
 0x5a6   :  { %3615 = vst [vmem:[%s6486_s11 + $0x50] sm:$0xff] %v3614_v53  ;;  %3465 = vst.msk [vmem:[#allocation2 + $0x60] sm:$0xff] %vm3452_vm10, %v3194_v57 }
 0x5aa   :  { %v4290_v62 = vpop.f32.mrb[62].mxu1 }
 0x5ab   :  { %v3209_v5 = vadd.f32 %v4290_v62, %v6348_v30  ;;  %v3203_v13 = vpop.f32.mrb[63].mxu1 }
 0x5ac   :  { %v3620_v60 = vld [vmem:[#allocation2 + $0x68] sm:$0xff]  ;;  %v3204_v3 = vadd.f32 %v6348_v30, %v3203_v13 }
 0x5ad   :  { %3621 = vst [vmem:[%s6486_s11 + $0x68] sm:$0xff] %v3620_v60  ;;  %v3618_v54 = vld [vmem:[#allocation2 + $0x60] sm:$0xff]  ;;  %3468 = vst.msk [vmem:[#allocation2 + $0x78] sm:$0xff] %vm3452_vm10, %v3209_v5 }
 0x5ae   :  { %3619 = vst [vmem:[%s6486_s11 + $0x60] sm:$0xff] %v3618_v54  ;;  %3467 = vst.msk [vmem:[#allocation2 + $0x70] sm:$0xff] %vm3452_vm10, %v3204_v3  ;;  %v4293_v20 = vpop.f32.mrb[64].mxu1 }
 0x5af   :  { %v3219_v38 = vadd.f32 %v4293_v20, %v6348_v30  ;;  %v3213_v43 = vpop.f32.mrb[65].mxu1 }
 0x5b0   :  { %v3214_v19 = vadd.f32 %v6348_v30, %v3213_v43 }
 0x5b1   :  { %3470 = vst.msk [vmem:[#allocation2 + $0x88] sm:$0xff] %vm3452_vm10, %v3219_v38 }
 0x5b2   :  { %3469 = vst.msk [vmem:[#allocation2 + $0x80] sm:$0xff] %vm3452_vm10, %v3214_v19  ;;  %v4296_v9 = vpop.f32.mrb[66].mxu1 }
 0x5b3   :  { %v3229_v35 = vadd.f32 %v4296_v9, %v6348_v30  ;;  %v3223_v63 = vpop.f32.mrb[67].mxu1 }
 0x5b4   :  { %v3624_v39 = vld [vmem:[#allocation2 + $0x78] sm:$0xff]  ;;  %v3224_v7 = vadd.f32 %v6348_v30, %v3223_v63 }
 0x5b5   :  { %3625 = vst [vmem:[%s6486_s11 + $0x78] sm:$0xff] %v3624_v39  ;;  %v3622_v47 = vld [vmem:[#allocation2 + $0x70] sm:$0xff]  ;;  %3472 = vst.msk [vmem:[#allocation2 + $0x98] sm:$0xff] %vm3452_vm10, %v3229_v35 }
 0x5b6   :  { %3623 = vst [vmem:[%s6486_s11 + $0x70] sm:$0xff] %v3622_v47  ;;  %3471 = vst.msk [vmem:[#allocation2 + $0x90] sm:$0xff] %vm3452_vm10, %v3224_v7  ;;  %v4299_v18 = vpop.f32.mrb[68].mxu1 }
 0x5b7   :  { %v3239_v23 = vadd.f32 %v4299_v18, %v6348_v30  ;;  %v3233_v11 = vpop.f32.mrb[69].mxu1 }
 0x5b8   :  { %v3628_v44 = vld [vmem:[#allocation2 + $0x88] sm:$0xff]  ;;  %v3234_v2 = vadd.f32 %v6348_v30, %v3233_v11 }
 0x5b9   :  { %3629 = vst [vmem:[%s6486_s11 + $0x88] sm:$0xff] %v3628_v44  ;;  %v3626_v29 = vld [vmem:[#allocation2 + $0x80] sm:$0xff]  ;;  %3474 = vst.msk [vmem:[#allocation2 + $0xa8] sm:$0xff] %vm3452_vm10, %v3239_v23 }
 0x5ba   :  { %3627 = vst [vmem:[%s6486_s11 + $0x80] sm:$0xff] %v3626_v29  ;;  %3473 = vst.msk [vmem:[#allocation2 + $0xa0] sm:$0xff] %vm3452_vm10, %v3234_v2  ;;  %v4302_v40 = vpop.f32.mrb[70].mxu1 }
 0x5bb   :  { %v3249_v15 = vadd.f32 %v4302_v40, %v6348_v30  ;;  %v3243_v28 = vpop.f32.mrb[71].mxu1 }
 0x5bc   :  { %v3632_v59 = vld [vmem:[#allocation2 + $0x98] sm:$0xff]  ;;  %v3244_v8 = vadd.f32 %v6348_v30, %v3243_v28 }
 0x5bd   :  { %3633 = vst [vmem:[%s6486_s11 + $0x98] sm:$0xff] %v3632_v59  ;;  %v3630_v16 = vld [vmem:[#allocation2 + $0x90] sm:$0xff]  ;;  %3476 = vst.msk [vmem:[#allocation2 + $0xb8] sm:$0xff] %vm3452_vm10, %v3249_v15 }
 0x5be   :  { %3631 = vst [vmem:[%s6486_s11 + $0x90] sm:$0xff] %v3630_v16  ;;  %3475 = vst.msk [vmem:[#allocation2 + $0xb0] sm:$0xff] %vm3452_vm10, %v3244_v8  ;;  %v4305_v58 = vpop.f32.mrb[72].mxu1 }
 0x5bf   :  { %v3253_v32 = vpop.f32.mrb[73].mxu1 }
 0x5c0   :  { %v3636_v45 = vld [vmem:[#allocation2 + $0xa8] sm:$0xff]  ;;  %v3254_v46 = vadd.f32 %v6348_v30, %v3253_v32 }
 0x5c1   :  { %3637 = vst [vmem:[%s6486_s11 + $0xa8] sm:$0xff] %v3636_v45  ;;  %v3634_v10 = vld [vmem:[#allocation2 + $0xa0] sm:$0xff] }
 0x5c2   :  { %3635 = vst [vmem:[%s6486_s11 + $0xa0] sm:$0xff] %v3634_v10  ;;  %3477 = vst.msk [vmem:[#allocation2 + $0xc0] sm:$0xff] %vm3452_vm10, %v3254_v46  ;;  %v4308_v1 = vpop.f32.mrb[74].mxu1 }
 0x5c3   :  { %v3263_v24 = vpop.f32.mrb[75].mxu1 }
 0x5c4   :  { %v3640_v48 = vld [vmem:[#allocation2 + $0xb8] sm:$0xff] }
 0x5c5   :  { %3641 = vst [vmem:[%s6486_s11 + $0xb8] sm:$0xff] %v3640_v48  ;;  %v3638_v26 = vld [vmem:[#allocation2 + $0xb0] sm:$0xff] }
 0x5c6   :  { %3639 = vst [vmem:[%s6486_s11 + $0xb0] sm:$0xff] %v3638_v26  ;;  %v4311_v30 = vpop.f32.mrb[76].mxu1 }
 0x5c7   :  { %v3273_v17 = vpop.f32.mrb[77].mxu1 }
 0x5c9   :  { %v3642_v55 = vld [vmem:[#allocation2 + $0xc0] sm:$0xff] }
 0x5ca   :  { %3643 = vst [vmem:[%s6486_s11 + $0xc0] sm:$0xff] %v3642_v55  ;;  %v4314_v37 = vpop.f32.mrb[78].mxu1 }
 0x5cb   :  { %v3283_v14 = vpop.f32.mrb[79].mxu1 }
 0x5ce   :  { %v4317_v21 = vpop.f32.mrb[80].mxu1 }
 0x5cf   :  { %v3293_v61 = vpop.f32.mrb[81].mxu1 }
 0x5d2   :  { %v4320_v34 = vpop.f32.mrb[82].mxu1 }
 0x5d3   :  { %v3303_v36 = vpop.f32.mrb[83].mxu1 }
 0x5d6   :  { %v4323_v41 = vpop.f32.mrb[84].mxu1 }
 0x5d7   :  { %v3313_v4 = vpop.f32.mrb[85].mxu1 }
 0x5da   :  { %v4326_v56 = vpop.f32.mrb[86].mxu1 }
 0x5db   :  { %v3323_v31 = vpop.f32.mrb[87].mxu1 }
 0x5de   :  { %v4329_v33 = vpop.f32.mrb[88].mxu1 }
 0x5df   :  { %v3333_v42 = vpop.f32.mrb[89].mxu1 }
 0x5e2   :  { %v4332_v27 = vpop.f32.mrb[90].mxu1 }
 0x5e3   :  { %v3343_v51 = vpop.f32.mrb[91].mxu1 }
 0x5e6   :  { %v4335_v0 = vpop.f32.mrb[92].mxu1 }
 0x5e7   :  { %v3353_v25 = vpop.f32.mrb[93].mxu1 }
 0x5ed   :  { %v4338_v22 = vpop.f32.mrb[94].mxu1 }
 0x5ee   :  { %v3363_v12 = vpop.f32.mrb[95].mxu1 }
 0x5f1   :  { %v4341_v50 = vpop.f32.mrb[96].mxu1 }
 0x5f2   :  { %v3373_v49 = vpop.f32.mrb[97].mxu1 }
 0x5f5   :  { %v4344_v52 = vpop.f32.mrb[98].mxu1 }
 0x5f6   :  { %v3383_v6 = vpop.f32.mrb[99].mxu1 }
 0x5f9   :  { %v4347_v57 = vpop.f32.mrb[100].mxu1 }
 0x5fa   :  { %v3393_v53 = vpop.f32.mrb[101].mxu1 }
 0x5fd   :  { %v4350_v62 = vpop.f32.mrb[102].mxu1 }
 0x5fe   :  { %v3403_v5 = vpop.f32.mrb[103].mxu1 }
 0x601   :  { %v4353_v13 = vpop.f32.mrb[104].mxu1 }
 0x602   :  { %v3413_v60 = vpop.f32.mrb[105].mxu1 }
 0x605   :  { %v4356_v3 = vpop.f32.mrb[106].mxu1 }
 0x606   :  { %v3423_v54 = vpop.f32.mrb[107].mxu1 }
 0x609   :  { %v4359_v20 = vpop.f32.mrb[108].mxu1 }
 0x60a   :  { %v3433_v38 = vpop.f32.mrb[109].mxu1 }
 0x60d   :  { %v4362_v43 = vpop.f32.mrb[110].mxu1 }
 0x60e   :  { %v3443_v19 = vpop.f32.mrb[111].mxu1 }

</bundles_post_ra>
